<compile_context>
chip_gen: v6e
topology: v6e:2x2x1
jax: 0.10.0
libtpu: 0.0.40
codegen_flags: <defaults>
</compile_context>

<pallas_src>
import jax
import jax.numpy as jnp
from jax.experimental import pallas as pl
from jax.experimental.pallas import tpu as pltpu

BATCH_TILE = 64  # images per grid step (sublane axis); must be a multiple of 8


def _round_up(a, b):
    return (a + b - 1) // b * b


# ---------------------------------------------------------------------------
# Single fused kernel: conv1+pool1 -> conv2+pool2 -> MLP, one batch tile/step.
# ---------------------------------------------------------------------------
def _lenet_kernel(x_ref, w1b_ref, b1_ref, w2b_ref, b2_ref,
                  w1p_ref, lb1_ref, w2t_ref, lb2_ref, w3t_ref, lb3_ref,
                  o_ref, s1_ref):
    # x_ref : (30, Bt, 30)  zero-padded input, layout (row, batch, col)
    # w1b   : (3, 30, 256)  conv1 band;  out lane = (x%2)*128 + (x//2)*6 + c
    # b1    : (1, 84)       conv1 bias tiled over px
    # w2b   : (5, 84, 256)  conv2 band;  in lane = x*6+ci, out lane as above*16
    # b2    : (1, 80)
    # w1p   : (5, 80, 120)  Linear(400,120) weight split per pooled conv2 row
    # w2t   : (120, 84)     w3t: (84, 10)   lb*: (1, ·) biases
    # o_ref : (Bt, 10)
    # s1_ref: (14, Bt, 84)  pooled conv1 activations, layout (row, batch, x*6+c)
    f32 = jnp.float32
    bt = x_ref.shape[1]

    # ---- conv1(3x3, pad=1) + bias + ReLU + 2x2 max-pool, as band matmuls.
    # For each pooled output row: M = 2*Bt conv rows, 3 dots (one per kernel
    # row i); y-pool = max over sublane halves, x-pool = max over lane halves.
    b1row = b1_ref[...]
    for py in range(14):
        acc = None
        for i in range(3):
            a = x_ref[pl.ds(2 * py + i, 2)].reshape(2 * bt, 30)
            d = jnp.dot(a, w1b_ref[i], preferred_element_type=f32)
            acc = d if acc is None else acc + d
        m = jnp.maximum(acc[:bt], acc[bt:])             # pool rows 2py, 2py+1
        m = jnp.maximum(m[:, 0:84], m[:, 128:212])      # pool cols 2px, 2px+1
        s1_ref[py] = jnp.maximum(m + b1row, 0.0)        # (Bt, 84)

    # ---- conv2(5x5) + bias + ReLU + 2x2 max-pool + Linear(400,120) partial
    # accumulation, same band-matmul structure (M = 2*Bt, K = 84, N = 256).
    b2row = b2_ref[...]
    h = None
    for po in range(5):
        acc = None
        for di in range(5):
            a = s1_ref[pl.ds(2 * po + di, 2)].reshape(2 * bt, 84)
            d = jnp.dot(a, w2b_ref[di], preferred_element_type=f32)
            acc = d if acc is None else acc + d
        m = jnp.maximum(acc[:bt], acc[bt:])             # y-pool
        m = jnp.maximum(m[:, 0:80], m[:, 128:208])      # x-pool -> (Bt, 80)
        s2 = jnp.maximum(m + b2row, 0.0)                # pooled conv2 row `po`
        d = jnp.dot(s2, w1p_ref[po], preferred_element_type=f32)
        h = d if h is None else h + d                   # (Bt, 120)

    # ---- rest of the MLP; intermediates stay in vregs.
    h = jnp.maximum(h + lb1_ref[...], 0.0)              # (Bt, 120)
    h = jnp.dot(h, w2t_ref[...], preferred_element_type=f32)
    h = jnp.maximum(h + lb2_ref[...], 0.0)              # (Bt, 84)
    o_ref[...] = (jnp.dot(h, w3t_ref[...], preferred_element_type=f32)
                  + lb3_ref[...])


# ---------------------------------------------------------------------------
# Parameter init (PyTorch layout) and one-time conversion to kernel layouts.
# ---------------------------------------------------------------------------
def init_params(key):
    def uniform(k, shape, fan_in):
        bound = 1.0 / jnp.sqrt(float(fan_in))
        return jax.random.uniform(k, shape, jnp.float32, -bound, bound)

    ks = jax.random.split(key, 10)
    return {
        "conv1_w": uniform(ks[0], (6, 1, 3, 3), 9),
        "conv1_b": uniform(ks[1], (6,), 9),
        "conv2_w": uniform(ks[2], (16, 6, 5, 5), 150),
        "conv2_b": uniform(ks[3], (16,), 150),
        "lin1_w": uniform(ks[4], (120, 400), 400),
        "lin1_b": uniform(ks[5], (120,), 400),
        "lin2_w": uniform(ks[6], (84, 120), 120),
        "lin2_b": uniform(ks[7], (84,), 120),
        "lin3_w": uniform(ks[8], (10, 84), 84),
        "lin3_b": uniform(ks[9], (10,), 84),
    }


def prepare_params(p):
    """One-time conversion of PyTorch-layout params into kernel layouts."""
    f32 = jnp.float32

    # conv1 Toeplitz band: W1band[i, x+j, (x%2)*128 + (x//2)*6 + c] = w1[c,0,i,j]
    w1 = p["conv1_w"].astype(f32)
    ii, jj, xx, cc = jnp.meshgrid(jnp.arange(3), jnp.arange(3),
                                  jnp.arange(28), jnp.arange(6), indexing="ij")
    w1band = jnp.zeros((3, 30, 256), f32).at[
        ii, xx + jj, (xx % 2) * 128 + (xx // 2) * 6 + cc
    ].set(w1[cc, 0, ii, jj])
    b1row = jnp.tile(p["conv1_b"].astype(f32), 14).reshape(1, 84)

    # conv2 band: W2band[di, (x+dj)*6+ci, (x%2)*128 + (x//2)*16 + oc] = w2[oc,ci,di,dj]
    w2 = p["conv2_w"].astype(f32)
    dd, ee, x2, ci, oc = jnp.meshgrid(jnp.arange(5), jnp.arange(5),
                                      jnp.arange(10), jnp.arange(6),
                                      jnp.arange(16), indexing="ij")
    w2band = jnp.zeros((5, 84, 256), f32).at[
        dd, (x2 + ee) * 6 + ci, (x2 % 2) * 128 + (x2 // 2) * 16 + oc
    ].set(w2[oc, ci, dd, ee])
    b2row = jnp.tile(p["conv2_b"].astype(f32), 5).reshape(1, 80)

    # Linear(400,120) split per pooled conv2 row.  Kernel lane order inside a
    # row is px*16+oc; PyTorch flatten index of s2 (N,16,5,5) is oc*25+po*5+px.
    po_, px_, oc_ = jnp.meshgrid(jnp.arange(5), jnp.arange(5), jnp.arange(16),
                                 indexing="ij")
    feat = (oc_ * 25 + po_ * 5 + px_).reshape(5, 80)
    w1p = jnp.transpose(p["lin1_w"].astype(f32)[:, feat], (1, 2, 0))  # (5,80,120)

    return {
        "w1band": w1band, "b1row": b1row,
        "w2band": w2band, "b2row": b2row,
        "w1p": w1p,
        "lb1": p["lin1_b"].astype(f32).reshape(1, 120),
        "w2t": p["lin2_w"].astype(f32).T,
        "lb2": p["lin2_b"].astype(f32).reshape(1, 84),
        "w3t": p["lin3_w"].astype(f32).T,
        "lb3": p["lin3_b"].astype(f32).reshape(1, 10),
    }


# ---------------------------------------------------------------------------
# Forward pass: one pallas_call; wrapper does only transpose/pad plumbing.
# ---------------------------------------------------------------------------
@jax.jit
def forward(kp, x):
    n = x.shape[0]
    bt = BATCH_TILE if n >= BATCH_TILE else _round_up(max(n, 1), 8)
    npad = _round_up(n, bt)

    # Layout plumbing only: (N,1,28,28) -> (row, batch, col), zero-padded to
    # (30, Npad, 30) so conv1's padding=1 and the batch remainder come free.
    xt = jnp.transpose(x.reshape(n, 28, 28), (1, 0, 2))
    xt = jnp.pad(xt, ((1, 1), (0, npad - n), (1, 1)))

    out = pl.pallas_call(
        _lenet_kernel,
        out_shape=jax.ShapeDtypeStruct((npad, 10), jnp.float32),
        grid=(npad // bt,),
        in_specs=[
            pl.BlockSpec((30, bt, 30), lambda i: (0, i, 0)),
            pl.BlockSpec((3, 30, 256), lambda i: (0, 0, 0)),
            pl.BlockSpec((1, 84), lambda i: (0, 0)),
            pl.BlockSpec((5, 84, 256), lambda i: (0, 0, 0)),
            pl.BlockSpec((1, 80), lambda i: (0, 0)),
            pl.BlockSpec((5, 80, 120), lambda i: (0, 0, 0)),
            pl.BlockSpec((1, 120), lambda i: (0, 0)),
            pl.BlockSpec((120, 84), lambda i: (0, 0)),
            pl.BlockSpec((1, 84), lambda i: (0, 0)),
            pl.BlockSpec((84, 10), lambda i: (0, 0)),
            pl.BlockSpec((1, 10), lambda i: (0, 0)),
        ],
        out_specs=pl.BlockSpec((bt, 10), lambda i: (i, 0)),
        scratch_shapes=[pltpu.VMEM((14, bt, 84), jnp.float32)],
        compiler_params=pltpu.CompilerParams(
            dimension_semantics=("parallel",)),
    )(xt, kp["w1band"], kp["b1row"], kp["w2band"], kp["b2row"],
      kp["w1p"], kp["lb1"], kp["w2t"], kp["lb2"], kp["w3t"], kp["lb3"])
    return out[:n]


# ---------------------------------------------------------------------------
# Pure-JAX reference (direct translation of the PyTorch module).
# ---------------------------------------------------------------------------
def reference_forward(p, x):
    dn = ("NCHW", "OIHW", "NCHW")
    c1 = jax.lax.conv_general_dilated(x, p["conv1_w"], (1, 1), "SAME",
                                      dimension_numbers=dn)
    c1 = jax.nn.relu(c1 + p["conv1_b"].reshape(1, 6, 1, 1))
    s1 = jax.lax.reduce_window(c1, -jnp.inf, jax.lax.max,
                               (1, 1, 2, 2), (1, 1, 2, 2), "VALID")
    c2 = jax.lax.conv_general_dilated(s1, p["conv2_w"], (1, 1), "VALID",
                                      dimension_numbers=dn)
    c2 = jax.nn.relu(c2 + p["conv2_b"].reshape(1, 16, 1, 1))
    s2 = jax.lax.reduce_window(c2, -jnp.inf, jax.lax.max,
                               (1, 1, 2, 2), (1, 1, 2, 2), "VALID")
    f = s2.reshape(x.shape[0], 400)
    f1 = jax.nn.relu(f @ p["lin1_w"].T + p["lin1_b"])
    f2 = jax.nn.relu(f1 @ p["lin2_w"].T + p["lin2_b"])
    return f2 @ p["lin3_w"].T + p["lin3_b"]


if __name__ == "__main__":
    key = jax.random.PRNGKey(0)
    k_param, k_x = jax.random.split(key)
    params = init_params(k_param)
    kparams = prepare_params(params)          # one-time layout conversion
    # MNIST-shaped input required by Linear(400, ...): (N, 1, 28, 28).
    x = jax.random.normal(k_x, (2, 1, 28, 28), dtype=jnp.float32)

    out = jax.block_until_ready(forward(kparams, x))
    assert out.shape == (2, 10) and out.dtype == jnp.float32

    ref = reference_forward(params, x)
    err = float(jnp.max(jnp.abs(out - ref)))
    assert err < 1e-3, f"max abs error vs reference: {err}"
    print("KERNEL_OK")
</pallas_src>

<mosaic_0001>
module attributes {stable_mosaic.version = 11 : i64} {
  func.func @_lenet_kernel(%arg0: i32, %arg1: memref<30x8x30xf32, #tpu.memory_space<vmem>>, %arg2: memref<3x30x256xf32, #tpu.memory_space<vmem>>, %arg3: memref<1x84xf32, #tpu.memory_space<vmem>>, %arg4: memref<5x84x256xf32, #tpu.memory_space<vmem>>, %arg5: memref<1x80xf32, #tpu.memory_space<vmem>>, %arg6: memref<5x80x120xf32, #tpu.memory_space<vmem>>, %arg7: memref<1x120xf32, #tpu.memory_space<vmem>>, %arg8: memref<120x84xf32, #tpu.memory_space<vmem>>, %arg9: memref<1x84xf32, #tpu.memory_space<vmem>>, %arg10: memref<84x10xf32, #tpu.memory_space<vmem>>, %arg11: memref<1x10xf32, #tpu.memory_space<vmem>>, %arg12: memref<8x10xf32, #tpu.memory_space<vmem>>, %arg13: memref<14x8x84xf32, #tpu.memory_space<vmem>>) attributes {dimension_semantics = [#tpu.dimension_semantics<parallel>], iteration_bounds = array<i64: 1>, scalar_prefetch = 0 : i64, scratch_operands = 1 : i64, tpu.core_type = #tpu.core_type<tc>, window_params = [{transform_indices = @transform_0, window_bounds = array<i64: 30, 8, 30>}, {pipeline_mode = #tpu.pipeline_mode<synchronous>, transform_indices = @transform_1, window_bounds = array<i64: 3, 30, 256>}, {pipeline_mode = #tpu.pipeline_mode<synchronous>, transform_indices = @transform_2, window_bounds = array<i64: 1, 84>}, {pipeline_mode = #tpu.pipeline_mode<synchronous>, transform_indices = @transform_3, window_bounds = array<i64: 5, 84, 256>}, {pipeline_mode = #tpu.pipeline_mode<synchronous>, transform_indices = @transform_4, window_bounds = array<i64: 1, 80>}, {pipeline_mode = #tpu.pipeline_mode<synchronous>, transform_indices = @transform_5, window_bounds = array<i64: 5, 80, 120>}, {pipeline_mode = #tpu.pipeline_mode<synchronous>, transform_indices = @transform_6, window_bounds = array<i64: 1, 120>}, {pipeline_mode = #tpu.pipeline_mode<synchronous>, transform_indices = @transform_7, window_bounds = array<i64: 120, 84>}, {pipeline_mode = #tpu.pipeline_mode<synchronous>, transform_indices = @transform_8, window_bounds = array<i64: 1, 84>}, {pipeline_mode = #tpu.pipeline_mode<synchronous>, transform_indices = @transform_9, window_bounds = array<i64: 84, 10>}, {pipeline_mode = #tpu.pipeline_mode<synchronous>, transform_indices = @transform_10, window_bounds = array<i64: 1, 10>}, {transform_indices = @transform_11, window_bounds = array<i64: 8, 10>}]} {
    %c0 = arith.constant 0 : index
    %c0_0 = arith.constant 0 : index
    %0 = vector.load %arg3[%c0, %c0_0] : memref<1x84xf32, #tpu.memory_space<vmem>>, vector<1x84xf32>
    %c0_1 = arith.constant 0 : index
    %c0_2 = arith.constant 0 : index
    %c0_3 = arith.constant 0 : index
    %1 = vector.load %arg1[%c0_1, %c0_2, %c0_3] : memref<30x8x30xf32, #tpu.memory_space<vmem>>, vector<2x8x30xf32>
    %2 = vector.shape_cast %1 : vector<2x8x30xf32> to vector<16x30xf32>
    %c0_4 = arith.constant 0 : index
    %c0_5 = arith.constant 0 : index
    %c0_6 = arith.constant 0 : index
    %3 = vector.load %arg2[%c0_4, %c0_5, %c0_6] : memref<3x30x256xf32, #tpu.memory_space<vmem>>, vector<1x30x256xf32>
    %4 = vector.shape_cast %3 : vector<1x30x256xf32> to vector<30x256xf32>
    %cst = arith.constant dense<0.000000e+00> : vector<16x256xf32>
    %5 = tpu.matmul %2, %4, %cst {dimension_numbers = #tpu.dot_dimension_numbers<[1], [0], [0], [1], [0, 0, 1, 1], [], []>} : vector<16x30xf32>, vector<30x256xf32>, vector<16x256xf32> -> vector<16x256xf32>
    %c1 = arith.constant 1 : index
    %c0_7 = arith.constant 0 : index
    %c0_8 = arith.constant 0 : index
    %6 = vector.load %arg1[%c1, %c0_7, %c0_8] : memref<30x8x30xf32, #tpu.memory_space<vmem>>, vector<2x8x30xf32>
    %7 = vector.shape_cast %6 : vector<2x8x30xf32> to vector<16x30xf32>
    %c1_9 = arith.constant 1 : index
    %c0_10 = arith.constant 0 : index
    %c0_11 = arith.constant 0 : index
    %8 = vector.load %arg2[%c1_9, %c0_10, %c0_11] : memref<3x30x256xf32, #tpu.memory_space<vmem>>, vector<1x30x256xf32>
    %9 = vector.shape_cast %8 : vector<1x30x256xf32> to vector<30x256xf32>
    %cst_12 = arith.constant dense<0.000000e+00> : vector<16x256xf32>
    %10 = tpu.matmul %7, %9, %cst_12 {dimension_numbers = #tpu.dot_dimension_numbers<[1], [0], [0], [1], [0, 0, 1, 1], [], []>} : vector<16x30xf32>, vector<30x256xf32>, vector<16x256xf32> -> vector<16x256xf32>
    %11 = arith.addf %5, %10 : vector<16x256xf32>
    %c2 = arith.constant 2 : index
    %c0_13 = arith.constant 0 : index
    %c0_14 = arith.constant 0 : index
    %12 = vector.load %arg1[%c2, %c0_13, %c0_14] : memref<30x8x30xf32, #tpu.memory_space<vmem>>, vector<2x8x30xf32>
    %13 = vector.shape_cast %12 : vector<2x8x30xf32> to vector<16x30xf32>
    %c2_15 = arith.constant 2 : index
    %c0_16 = arith.constant 0 : index
    %c0_17 = arith.constant 0 : index
    %14 = vector.load %arg2[%c2_15, %c0_16, %c0_17] : memref<3x30x256xf32, #tpu.memory_space<vmem>>, vector<1x30x256xf32>
    %15 = vector.shape_cast %14 : vector<1x30x256xf32> to vector<30x256xf32>
    %cst_18 = arith.constant dense<0.000000e+00> : vector<16x256xf32>
    %16 = tpu.matmul %13, %15, %cst_18 {dimension_numbers = #tpu.dot_dimension_numbers<[1], [0], [0], [1], [0, 0, 1, 1], [], []>} : vector<16x30xf32>, vector<30x256xf32>, vector<16x256xf32> -> vector<16x256xf32>
    %17 = arith.addf %11, %16 : vector<16x256xf32>
    %18 = vector.extract_strided_slice %17 {offsets = [0, 0], sizes = [8, 256], strides = [1, 1]} : vector<16x256xf32> to vector<8x256xf32>
    %19 = vector.extract_strided_slice %17 {offsets = [8, 0], sizes = [8, 256], strides = [1, 1]} : vector<16x256xf32> to vector<8x256xf32>
    %20 = arith.maximumf %18, %19 : vector<8x256xf32>
    %21 = vector.extract_strided_slice %20 {offsets = [0, 0], sizes = [8, 84], strides = [1, 1]} : vector<8x256xf32> to vector<8x84xf32>
    %22 = vector.extract_strided_slice %20 {offsets = [0, 128], sizes = [8, 84], strides = [1, 1]} : vector<8x256xf32> to vector<8x84xf32>
    %23 = arith.maximumf %21, %22 : vector<8x84xf32>
    %24 = vector.broadcast %0 : vector<1x84xf32> to vector<8x84xf32>
    %25 = arith.addf %23, %24 : vector<8x84xf32>
    %cst_19 = arith.constant 0.000000e+00 : f32
    %26 = vector.broadcast %cst_19 : f32 to vector<8x84xf32>
    %27 = arith.maximumf %25, %26 : vector<8x84xf32>
    %c0_20 = arith.constant 0 : index
    %c0_21 = arith.constant 0 : index
    %c0_22 = arith.constant 0 : index
    %28 = vector.load %arg13[%c0_20, %c0_21, %c0_22] : memref<14x8x84xf32, #tpu.memory_space<vmem>>, vector<1x8x84xf32>
    %29 = vector.shape_cast %28 : vector<1x8x84xf32> to vector<8x84xf32>
    %30 = vector.shape_cast %27 : vector<8x84xf32> to vector<1x8x84xf32>
    tpu.vector_store %arg13[%c0_20, %c0_21, %c0_22], %30 {strides = array<i32>} : memref<14x8x84xf32, #tpu.memory_space<vmem>>, vector<1x8x84xf32>,
    %c2_23 = arith.constant 2 : index
    %c0_24 = arith.constant 0 : index
    %c0_25 = arith.constant 0 : index
    %31 = vector.load %arg1[%c2_23, %c0_24, %c0_25] : memref<30x8x30xf32, #tpu.memory_space<vmem>>, vector<2x8x30xf32>
    %32 = vector.shape_cast %31 : vector<2x8x30xf32> to vector<16x30xf32>
    %c0_26 = arith.constant 0 : index
    %c0_27 = arith.constant 0 : index
    %c0_28 = arith.constant 0 : index
    %33 = vector.load %arg2[%c0_26, %c0_27, %c0_28] : memref<3x30x256xf32, #tpu.memory_space<vmem>>, vector<1x30x256xf32>
    %34 = vector.shape_cast %33 : vector<1x30x256xf32> to vector<30x256xf32>
    %cst_29 = arith.constant dense<0.000000e+00> : vector<16x256xf32>
    %35 = tpu.matmul %32, %34, %cst_29 {dimension_numbers = #tpu.dot_dimension_numbers<[1], [0], [0], [1], [0, 0, 1, 1], [], []>} : vector<16x30xf32>, vector<30x256xf32>, vector<16x256xf32> -> vector<16x256xf32>
    %c3 = arith.constant 3 : index
    %c0_30 = arith.constant 0 : index
    %c0_31 = arith.constant 0 : index
    %36 = vector.load %arg1[%c3, %c0_30, %c0_31] : memref<30x8x30xf32, #tpu.memory_space<vmem>>, vector<2x8x30xf32>
    %37 = vector.shape_cast %36 : vector<2x8x30xf32> to vector<16x30xf32>
    %c1_32 = arith.constant 1 : index
    %c0_33 = arith.constant 0 : index
    %c0_34 = arith.constant 0 : index
    %38 = vector.load %arg2[%c1_32, %c0_33, %c0_34] : memref<3x30x256xf32, #tpu.memory_space<vmem>>, vector<1x30x256xf32>
    %39 = vector.shape_cast %38 : vector<1x30x256xf32> to vector<30x256xf32>
    %cst_35 = arith.constant dense<0.000000e+00> : vector<16x256xf32>
    %40 = tpu.matmul %37, %39, %cst_35 {dimension_numbers = #tpu.dot_dimension_numbers<[1], [0], [0], [1], [0, 0, 1, 1], [], []>} : vector<16x30xf32>, vector<30x256xf32>, vector<16x256xf32> -> vector<16x256xf32>
    %41 = arith.addf %35, %40 : vector<16x256xf32>
    %c4 = arith.constant 4 : index
    %c0_36 = arith.constant 0 : index
    %c0_37 = arith.constant 0 : index
    %42 = vector.load %arg1[%c4, %c0_36, %c0_37] : memref<30x8x30xf32, #tpu.memory_space<vmem>>, vector<2x8x30xf32>
    %43 = vector.shape_cast %42 : vector<2x8x30xf32> to vector<16x30xf32>
    %c2_38 = arith.constant 2 : index
    %c0_39 = arith.constant 0 : index
    %c0_40 = arith.constant 0 : index
    %44 = vector.load %arg2[%c2_38, %c0_39, %c0_40] : memref<3x30x256xf32, #tpu.memory_space<vmem>>, vector<1x30x256xf32>
    %45 = vector.shape_cast %44 : vector<1x30x256xf32> to vector<30x256xf32>
    %cst_41 = arith.constant dense<0.000000e+00> : vector<16x256xf32>
    %46 = tpu.matmul %43, %45, %cst_41 {dimension_numbers = #tpu.dot_dimension_numbers<[1], [0], [0], [1], [0, 0, 1, 1], [], []>} : vector<16x30xf32>, vector<30x256xf32>, vector<16x256xf32> -> vector<16x256xf32>
    %47 = arith.addf %41, %46 : vector<16x256xf32>
    %48 = vector.extract_strided_slice %47 {offsets = [0, 0], sizes = [8, 256], strides = [1, 1]} : vector<16x256xf32> to vector<8x256xf32>
    %49 = vector.extract_strided_slice %47 {offsets = [8, 0], sizes = [8, 256], strides = [1, 1]} : vector<16x256xf32> to vector<8x256xf32>
    %50 = arith.maximumf %48, %49 : vector<8x256xf32>
    %51 = vector.extract_strided_slice %50 {offsets = [0, 0], sizes = [8, 84], strides = [1, 1]} : vector<8x256xf32> to vector<8x84xf32>
    %52 = vector.extract_strided_slice %50 {offsets = [0, 128], sizes = [8, 84], strides = [1, 1]} : vector<8x256xf32> to vector<8x84xf32>
    %53 = arith.maximumf %51, %52 : vector<8x84xf32>
    %54 = vector.broadcast %0 : vector<1x84xf32> to vector<8x84xf32>
    %55 = arith.addf %53, %54 : vector<8x84xf32>
    %cst_42 = arith.constant 0.000000e+00 : f32
    %56 = vector.broadcast %cst_42 : f32 to vector<8x84xf32>
    %57 = arith.maximumf %55, %56 : vector<8x84xf32>
    %c1_43 = arith.constant 1 : index
    %c0_44 = arith.constant 0 : index
    %c0_45 = arith.constant 0 : index
    %58 = vector.load %arg13[%c1_43, %c0_44, %c0_45] : memref<14x8x84xf32, #tpu.memory_space<vmem>>, vector<1x8x84xf32>
    %59 = vector.shape_cast %58 : vector<1x8x84xf32> to vector<8x84xf32>
    %60 = vector.shape_cast %57 : vector<8x84xf32> to vector<1x8x84xf32>
    tpu.vector_store %arg13[%c1_43, %c0_44, %c0_45], %60 {strides = array<i32>} : memref<14x8x84xf32, #tpu.memory_space<vmem>>, vector<1x8x84xf32>,
    %c4_46 = arith.constant 4 : index
    %c0_47 = arith.constant 0 : index
    %c0_48 = arith.constant 0 : index
    %61 = vector.load %arg1[%c4_46, %c0_47, %c0_48] : memref<30x8x30xf32, #tpu.memory_space<vmem>>, vector<2x8x30xf32>
    %62 = vector.shape_cast %61 : vector<2x8x30xf32> to vector<16x30xf32>
    %c0_49 = arith.constant 0 : index
    %c0_50 = arith.constant 0 : index
    %c0_51 = arith.constant 0 : index
    %63 = vector.load %arg2[%c0_49, %c0_50, %c0_51] : memref<3x30x256xf32, #tpu.memory_space<vmem>>, vector<1x30x256xf32>
    %64 = vector.shape_cast %63 : vector<1x30x256xf32> to vector<30x256xf32>
    %cst_52 = arith.constant dense<0.000000e+00> : vector<16x256xf32>
    %65 = tpu.matmul %62, %64, %cst_52 {dimension_numbers = #tpu.dot_dimension_numbers<[1], [0], [0], [1], [0, 0, 1, 1], [], []>} : vector<16x30xf32>, vector<30x256xf32>, vector<16x256xf32> -> vector<16x256xf32>
    %c5 = arith.constant 5 : index
    %c0_53 = arith.constant 0 : index
    %c0_54 = arith.constant 0 : index
    %66 = vector.load %arg1[%c5, %c0_53, %c0_54] : memref<30x8x30xf32, #tpu.memory_space<vmem>>, vector<2x8x30xf32>
    %67 = vector.shape_cast %66 : vector<2x8x30xf32> to vector<16x30xf32>
    %c1_55 = arith.constant 1 : index
    %c0_56 = arith.constant 0 : index
    %c0_57 = arith.constant 0 : index
    %68 = vector.load %arg2[%c1_55, %c0_56, %c0_57] : memref<3x30x256xf32, #tpu.memory_space<vmem>>, vector<1x30x256xf32>
    %69 = vector.shape_cast %68 : vector<1x30x256xf32> to vector<30x256xf32>
    %cst_58 = arith.constant dense<0.000000e+00> : vector<16x256xf32>
    %70 = tpu.matmul %67, %69, %cst_58 {dimension_numbers = #tpu.dot_dimension_numbers<[1], [0], [0], [1], [0, 0, 1, 1], [], []>} : vector<16x30xf32>, vector<30x256xf32>, vector<16x256xf32> -> vector<16x256xf32>
    %71 = arith.addf %65, %70 : vector<16x256xf32>
    %c6 = arith.constant 6 : index
    %c0_59 = arith.constant 0 : index
    %c0_60 = arith.constant 0 : index
    %72 = vector.load %arg1[%c6, %c0_59, %c0_60] : memref<30x8x30xf32, #tpu.memory_space<vmem>>, vector<2x8x30xf32>
    %73 = vector.shape_cast %72 : vector<2x8x30xf32> to vector<16x30xf32>
    %c2_61 = arith.constant 2 : index
    %c0_62 = arith.constant 0 : index
    %c0_63 = arith.constant 0 : index
    %74 = vector.load %arg2[%c2_61, %c0_62, %c0_63] : memref<3x30x256xf32, #tpu.memory_space<vmem>>, vector<1x30x256xf32>
    %75 = vector.shape_cast %74 : vector<1x30x256xf32> to vector<30x256xf32>
    %cst_64 = arith.constant dense<0.000000e+00> : vector<16x256xf32>
    %76 = tpu.matmul %73, %75, %cst_64 {dimension_numbers = #tpu.dot_dimension_numbers<[1], [0], [0], [1], [0, 0, 1, 1], [], []>} : vector<16x30xf32>, vector<30x256xf32>, vector<16x256xf32> -> vector<16x256xf32>
    %77 = arith.addf %71, %76 : vector<16x256xf32>
    %78 = vector.extract_strided_slice %77 {offsets = [0, 0], sizes = [8, 256], strides = [1, 1]} : vector<16x256xf32> to vector<8x256xf32>
    %79 = vector.extract_strided_slice %77 {offsets = [8, 0], sizes = [8, 256], strides = [1, 1]} : vector<16x256xf32> to vector<8x256xf32>
    %80 = arith.maximumf %78, %79 : vector<8x256xf32>
    %81 = vector.extract_strided_slice %80 {offsets = [0, 0], sizes = [8, 84], strides = [1, 1]} : vector<8x256xf32> to vector<8x84xf32>
    %82 = vector.extract_strided_slice %80 {offsets = [0, 128], sizes = [8, 84], strides = [1, 1]} : vector<8x256xf32> to vector<8x84xf32>
    %83 = arith.maximumf %81, %82 : vector<8x84xf32>
    %84 = vector.broadcast %0 : vector<1x84xf32> to vector<8x84xf32>
    %85 = arith.addf %83, %84 : vector<8x84xf32>
    %cst_65 = arith.constant 0.000000e+00 : f32
    %86 = vector.broadcast %cst_65 : f32 to vector<8x84xf32>
    %87 = arith.maximumf %85, %86 : vector<8x84xf32>
    %c2_66 = arith.constant 2 : index
    %c0_67 = arith.constant 0 : index
    %c0_68 = arith.constant 0 : index
    %88 = vector.load %arg13[%c2_66, %c0_67, %c0_68] : memref<14x8x84xf32, #tpu.memory_space<vmem>>, vector<1x8x84xf32>
    %89 = vector.shape_cast %88 : vector<1x8x84xf32> to vector<8x84xf32>
    %90 = vector.shape_cast %87 : vector<8x84xf32> to vector<1x8x84xf32>
    tpu.vector_store %arg13[%c2_66, %c0_67, %c0_68], %90 {strides = array<i32>} : memref<14x8x84xf32, #tpu.memory_space<vmem>>, vector<1x8x84xf32>,
    %c6_69 = arith.constant 6 : index
    %c0_70 = arith.constant 0 : index
    %c0_71 = arith.constant 0 : index
    %91 = vector.load %arg1[%c6_69, %c0_70, %c0_71] : memref<30x8x30xf32, #tpu.memory_space<vmem>>, vector<2x8x30xf32>
    %92 = vector.shape_cast %91 : vector<2x8x30xf32> to vector<16x30xf32>
    %c0_72 = arith.constant 0 : index
    %c0_73 = arith.constant 0 : index
    %c0_74 = arith.constant 0 : index
    %93 = vector.load %arg2[%c0_72, %c0_73, %c0_74] : memref<3x30x256xf32, #tpu.memory_space<vmem>>, vector<1x30x256xf32>
    %94 = vector.shape_cast %93 : vector<1x30x256xf32> to vector<30x256xf32>
    %cst_75 = arith.constant dense<0.000000e+00> : vector<16x256xf32>
    %95 = tpu.matmul %92, %94, %cst_75 {dimension_numbers = #tpu.dot_dimension_numbers<[1], [0], [0], [1], [0, 0, 1, 1], [], []>} : vector<16x30xf32>, vector<30x256xf32>, vector<16x256xf32> -> vector<16x256xf32>
    %c7 = arith.constant 7 : index
    %c0_76 = arith.constant 0 : index
    %c0_77 = arith.constant 0 : index
    %96 = vector.load %arg1[%c7, %c0_76, %c0_77] : memref<30x8x30xf32, #tpu.memory_space<vmem>>, vector<2x8x30xf32>
    %97 = vector.shape_cast %96 : vector<2x8x30xf32> to vector<16x30xf32>
    %c1_78 = arith.constant 1 : index
    %c0_79 = arith.constant 0 : index
    %c0_80 = arith.constant 0 : index
    %98 = vector.load %arg2[%c1_78, %c0_79, %c0_80] : memref<3x30x256xf32, #tpu.memory_space<vmem>>, vector<1x30x256xf32>
    %99 = vector.shape_cast %98 : vector<1x30x256xf32> to vector<30x256xf32>
    %cst_81 = arith.constant dense<0.000000e+00> : vector<16x256xf32>
    %100 = tpu.matmul %97, %99, %cst_81 {dimension_numbers = #tpu.dot_dimension_numbers<[1], [0], [0], [1], [0, 0, 1, 1], [], []>} : vector<16x30xf32>, vector<30x256xf32>, vector<16x256xf32> -> vector<16x256xf32>
    %101 = arith.addf %95, %100 : vector<16x256xf32>
    %c8 = arith.constant 8 : index
    %c0_82 = arith.constant 0 : index
    %c0_83 = arith.constant 0 : index
    %102 = vector.load %arg1[%c8, %c0_82, %c0_83] : memref<30x8x30xf32, #tpu.memory_space<vmem>>, vector<2x8x30xf32>
    %103 = vector.shape_cast %102 : vector<2x8x30xf32> to vector<16x30xf32>
    %c2_84 = arith.constant 2 : index
    %c0_85 = arith.constant 0 : index
    %c0_86 = arith.constant 0 : index
    %104 = vector.load %arg2[%c2_84, %c0_85, %c0_86] : memref<3x30x256xf32, #tpu.memory_space<vmem>>, vector<1x30x256xf32>
    %105 = vector.shape_cast %104 : vector<1x30x256xf32> to vector<30x256xf32>
    %cst_87 = arith.constant dense<0.000000e+00> : vector<16x256xf32>
    %106 = tpu.matmul %103, %105, %cst_87 {dimension_numbers = #tpu.dot_dimension_numbers<[1], [0], [0], [1], [0, 0, 1, 1], [], []>} : vector<16x30xf32>, vector<30x256xf32>, vector<16x256xf32> -> vector<16x256xf32>
    %107 = arith.addf %101, %106 : vector<16x256xf32>
    %108 = vector.extract_strided_slice %107 {offsets = [0, 0], sizes = [8, 256], strides = [1, 1]} : vector<16x256xf32> to vector<8x256xf32>
    %109 = vector.extract_strided_slice %107 {offsets = [8, 0], sizes = [8, 256], strides = [1, 1]} : vector<16x256xf32> to vector<8x256xf32>
    %110 = arith.maximumf %108, %109 : vector<8x256xf32>
    %111 = vector.extract_strided_slice %110 {offsets = [0, 0], sizes = [8, 84], strides = [1, 1]} : vector<8x256xf32> to vector<8x84xf32>
    %112 = vector.extract_strided_slice %110 {offsets = [0, 128], sizes = [8, 84], strides = [1, 1]} : vector<8x256xf32> to vector<8x84xf32>
    %113 = arith.maximumf %111, %112 : vector<8x84xf32>
    %114 = vector.broadcast %0 : vector<1x84xf32> to vector<8x84xf32>
    %115 = arith.addf %113, %114 : vector<8x84xf32>
    %cst_88 = arith.constant 0.000000e+00 : f32
    %116 = vector.broadcast %cst_88 : f32 to vector<8x84xf32>
    %117 = arith.maximumf %115, %116 : vector<8x84xf32>
    %c3_89 = arith.constant 3 : index
    %c0_90 = arith.constant 0 : index
    %c0_91 = arith.constant 0 : index
    %118 = vector.load %arg13[%c3_89, %c0_90, %c0_91] : memref<14x8x84xf32, #tpu.memory_space<vmem>>, vector<1x8x84xf32>
    %119 = vector.shape_cast %118 : vector<1x8x84xf32> to vector<8x84xf32>
    %120 = vector.shape_cast %117 : vector<8x84xf32> to vector<1x8x84xf32>
    tpu.vector_store %arg13[%c3_89, %c0_90, %c0_91], %120 {strides = array<i32>} : memref<14x8x84xf32, #tpu.memory_space<vmem>>, vector<1x8x84xf32>,
    %c8_92 = arith.constant 8 : index
    %c0_93 = arith.constant 0 : index
    %c0_94 = arith.constant 0 : index
    %121 = vector.load %arg1[%c8_92, %c0_93, %c0_94] : memref<30x8x30xf32, #tpu.memory_space<vmem>>, vector<2x8x30xf32>
    %122 = vector.shape_cast %121 : vector<2x8x30xf32> to vector<16x30xf32>
    %c0_95 = arith.constant 0 : index
    %c0_96 = arith.constant 0 : index
    %c0_97 = arith.constant 0 : index
    %123 = vector.load %arg2[%c0_95, %c0_96, %c0_97] : memref<3x30x256xf32, #tpu.memory_space<vmem>>, vector<1x30x256xf32>
    %124 = vector.shape_cast %123 : vector<1x30x256xf32> to vector<30x256xf32>
    %cst_98 = arith.constant dense<0.000000e+00> : vector<16x256xf32>
    %125 = tpu.matmul %122, %124, %cst_98 {dimension_numbers = #tpu.dot_dimension_numbers<[1], [0], [0], [1], [0, 0, 1, 1], [], []>} : vector<16x30xf32>, vector<30x256xf32>, vector<16x256xf32> -> vector<16x256xf32>
    %c9 = arith.constant 9 : index
    %c0_99 = arith.constant 0 : index
    %c0_100 = arith.constant 0 : index
    %126 = vector.load %arg1[%c9, %c0_99, %c0_100] : memref<30x8x30xf32, #tpu.memory_space<vmem>>, vector<2x8x30xf32>
    %127 = vector.shape_cast %126 : vector<2x8x30xf32> to vector<16x30xf32>
    %c1_101 = arith.constant 1 : index
    %c0_102 = arith.constant 0 : index
    %c0_103 = arith.constant 0 : index
    %128 = vector.load %arg2[%c1_101, %c0_102, %c0_103] : memref<3x30x256xf32, #tpu.memory_space<vmem>>, vector<1x30x256xf32>
    %129 = vector.shape_cast %128 : vector<1x30x256xf32> to vector<30x256xf32>
    %cst_104 = arith.constant dense<0.000000e+00> : vector<16x256xf32>
    %130 = tpu.matmul %127, %129, %cst_104 {dimension_numbers = #tpu.dot_dimension_numbers<[1], [0], [0], [1], [0, 0, 1, 1], [], []>} : vector<16x30xf32>, vector<30x256xf32>, vector<16x256xf32> -> vector<16x256xf32>
    %131 = arith.addf %125, %130 : vector<16x256xf32>
    %c10 = arith.constant 10 : index
    %c0_105 = arith.constant 0 : index
    %c0_106 = arith.constant 0 : index
    %132 = vector.load %arg1[%c10, %c0_105, %c0_106] : memref<30x8x30xf32, #tpu.memory_space<vmem>>, vector<2x8x30xf32>
    %133 = vector.shape_cast %132 : vector<2x8x30xf32> to vector<16x30xf32>
    %c2_107 = arith.constant 2 : index
    %c0_108 = arith.constant 0 : index
    %c0_109 = arith.constant 0 : index
    %134 = vector.load %arg2[%c2_107, %c0_108, %c0_109] : memref<3x30x256xf32, #tpu.memory_space<vmem>>, vector<1x30x256xf32>
    %135 = vector.shape_cast %134 : vector<1x30x256xf32> to vector<30x256xf32>
    %cst_110 = arith.constant dense<0.000000e+00> : vector<16x256xf32>
    %136 = tpu.matmul %133, %135, %cst_110 {dimension_numbers = #tpu.dot_dimension_numbers<[1], [0], [0], [1], [0, 0, 1, 1], [], []>} : vector<16x30xf32>, vector<30x256xf32>, vector<16x256xf32> -> vector<16x256xf32>
    %137 = arith.addf %131, %136 : vector<16x256xf32>
    %138 = vector.extract_strided_slice %137 {offsets = [0, 0], sizes = [8, 256], strides = [1, 1]} : vector<16x256xf32> to vector<8x256xf32>
    %139 = vector.extract_strided_slice %137 {offsets = [8, 0], sizes = [8, 256], strides = [1, 1]} : vector<16x256xf32> to vector<8x256xf32>
    %140 = arith.maximumf %138, %139 : vector<8x256xf32>
    %141 = vector.extract_strided_slice %140 {offsets = [0, 0], sizes = [8, 84], strides = [1, 1]} : vector<8x256xf32> to vector<8x84xf32>
    %142 = vector.extract_strided_slice %140 {offsets = [0, 128], sizes = [8, 84], strides = [1, 1]} : vector<8x256xf32> to vector<8x84xf32>
    %143 = arith.maximumf %141, %142 : vector<8x84xf32>
    %144 = vector.broadcast %0 : vector<1x84xf32> to vector<8x84xf32>
    %145 = arith.addf %143, %144 : vector<8x84xf32>
    %cst_111 = arith.constant 0.000000e+00 : f32
    %146 = vector.broadcast %cst_111 : f32 to vector<8x84xf32>
    %147 = arith.maximumf %145, %146 : vector<8x84xf32>
    %c4_112 = arith.constant 4 : index
    %c0_113 = arith.constant 0 : index
    %c0_114 = arith.constant 0 : index
    %148 = vector.load %arg13[%c4_112, %c0_113, %c0_114] : memref<14x8x84xf32, #tpu.memory_space<vmem>>, vector<1x8x84xf32>
    %149 = vector.shape_cast %148 : vector<1x8x84xf32> to vector<8x84xf32>
    %150 = vector.shape_cast %147 : vector<8x84xf32> to vector<1x8x84xf32>
    tpu.vector_store %arg13[%c4_112, %c0_113, %c0_114], %150 {strides = array<i32>} : memref<14x8x84xf32, #tpu.memory_space<vmem>>, vector<1x8x84xf32>,
    %c10_115 = arith.constant 10 : index
    %c0_116 = arith.constant 0 : index
    %c0_117 = arith.constant 0 : index
    %151 = vector.load %arg1[%c10_115, %c0_116, %c0_117] : memref<30x8x30xf32, #tpu.memory_space<vmem>>, vector<2x8x30xf32>
    %152 = vector.shape_cast %151 : vector<2x8x30xf32> to vector<16x30xf32>
    %c0_118 = arith.constant 0 : index
    %c0_119 = arith.constant 0 : index
    %c0_120 = arith.constant 0 : index
    %153 = vector.load %arg2[%c0_118, %c0_119, %c0_120] : memref<3x30x256xf32, #tpu.memory_space<vmem>>, vector<1x30x256xf32>
    %154 = vector.shape_cast %153 : vector<1x30x256xf32> to vector<30x256xf32>
    %cst_121 = arith.constant dense<0.000000e+00> : vector<16x256xf32>
    %155 = tpu.matmul %152, %154, %cst_121 {dimension_numbers = #tpu.dot_dimension_numbers<[1], [0], [0], [1], [0, 0, 1, 1], [], []>} : vector<16x30xf32>, vector<30x256xf32>, vector<16x256xf32> -> vector<16x256xf32>
    %c11 = arith.constant 11 : index
    %c0_122 = arith.constant 0 : index
    %c0_123 = arith.constant 0 : index
    %156 = vector.load %arg1[%c11, %c0_122, %c0_123] : memref<30x8x30xf32, #tpu.memory_space<vmem>>, vector<2x8x30xf32>
    %157 = vector.shape_cast %156 : vector<2x8x30xf32> to vector<16x30xf32>
    %c1_124 = arith.constant 1 : index
    %c0_125 = arith.constant 0 : index
    %c0_126 = arith.constant 0 : index
    %158 = vector.load %arg2[%c1_124, %c0_125, %c0_126] : memref<3x30x256xf32, #tpu.memory_space<vmem>>, vector<1x30x256xf32>
    %159 = vector.shape_cast %158 : vector<1x30x256xf32> to vector<30x256xf32>
    %cst_127 = arith.constant dense<0.000000e+00> : vector<16x256xf32>
    %160 = tpu.matmul %157, %159, %cst_127 {dimension_numbers = #tpu.dot_dimension_numbers<[1], [0], [0], [1], [0, 0, 1, 1], [], []>} : vector<16x30xf32>, vector<30x256xf32>, vector<16x256xf32> -> vector<16x256xf32>
    %161 = arith.addf %155, %160 : vector<16x256xf32>
    %c12 = arith.constant 12 : index
    %c0_128 = arith.constant 0 : index
    %c0_129 = arith.constant 0 : index
    %162 = vector.load %arg1[%c12, %c0_128, %c0_129] : memref<30x8x30xf32, #tpu.memory_space<vmem>>, vector<2x8x30xf32>
    %163 = vector.shape_cast %162 : vector<2x8x30xf32> to vector<16x30xf32>
    %c2_130 = arith.constant 2 : index
    %c0_131 = arith.constant 0 : index
    %c0_132 = arith.constant 0 : index
    %164 = vector.load %arg2[%c2_130, %c0_131, %c0_132] : memref<3x30x256xf32, #tpu.memory_space<vmem>>, vector<1x30x256xf32>
    %165 = vector.shape_cast %164 : vector<1x30x256xf32> to vector<30x256xf32>
    %cst_133 = arith.constant dense<0.000000e+00> : vector<16x256xf32>
    %166 = tpu.matmul %163, %165, %cst_133 {dimension_numbers = #tpu.dot_dimension_numbers<[1], [0], [0], [1], [0, 0, 1, 1], [], []>} : vector<16x30xf32>, vector<30x256xf32>, vector<16x256xf32> -> vector<16x256xf32>
    %167 = arith.addf %161, %166 : vector<16x256xf32>
    %168 = vector.extract_strided_slice %167 {offsets = [0, 0], sizes = [8, 256], strides = [1, 1]} : vector<16x256xf32> to vector<8x256xf32>
    %169 = vector.extract_strided_slice %167 {offsets = [8, 0], sizes = [8, 256], strides = [1, 1]} : vector<16x256xf32> to vector<8x256xf32>
    %170 = arith.maximumf %168, %169 : vector<8x256xf32>
    %171 = vector.extract_strided_slice %170 {offsets = [0, 0], sizes = [8, 84], strides = [1, 1]} : vector<8x256xf32> to vector<8x84xf32>
    %172 = vector.extract_strided_slice %170 {offsets = [0, 128], sizes = [8, 84], strides = [1, 1]} : vector<8x256xf32> to vector<8x84xf32>
    %173 = arith.maximumf %171, %172 : vector<8x84xf32>
    %174 = vector.broadcast %0 : vector<1x84xf32> to vector<8x84xf32>
    %175 = arith.addf %173, %174 : vector<8x84xf32>
    %cst_134 = arith.constant 0.000000e+00 : f32
    %176 = vector.broadcast %cst_134 : f32 to vector<8x84xf32>
    %177 = arith.maximumf %175, %176 : vector<8x84xf32>
    %c5_135 = arith.constant 5 : index
    %c0_136 = arith.constant 0 : index
    %c0_137 = arith.constant 0 : index
    %178 = vector.load %arg13[%c5_135, %c0_136, %c0_137] : memref<14x8x84xf32, #tpu.memory_space<vmem>>, vector<1x8x84xf32>
    %179 = vector.shape_cast %178 : vector<1x8x84xf32> to vector<8x84xf32>
    %180 = vector.shape_cast %177 : vector<8x84xf32> to vector<1x8x84xf32>
    tpu.vector_store %arg13[%c5_135, %c0_136, %c0_137], %180 {strides = array<i32>} : memref<14x8x84xf32, #tpu.memory_space<vmem>>, vector<1x8x84xf32>,
    %c12_138 = arith.constant 12 : index
    %c0_139 = arith.constant 0 : index
    %c0_140 = arith.constant 0 : index
    %181 = vector.load %arg1[%c12_138, %c0_139, %c0_140] : memref<30x8x30xf32, #tpu.memory_space<vmem>>, vector<2x8x30xf32>
    %182 = vector.shape_cast %181 : vector<2x8x30xf32> to vector<16x30xf32>
    %c0_141 = arith.constant 0 : index
    %c0_142 = arith.constant 0 : index
    %c0_143 = arith.constant 0 : index
    %183 = vector.load %arg2[%c0_141, %c0_142, %c0_143] : memref<3x30x256xf32, #tpu.memory_space<vmem>>, vector<1x30x256xf32>
    %184 = vector.shape_cast %183 : vector<1x30x256xf32> to vector<30x256xf32>
    %cst_144 = arith.constant dense<0.000000e+00> : vector<16x256xf32>
    %185 = tpu.matmul %182, %184, %cst_144 {dimension_numbers = #tpu.dot_dimension_numbers<[1], [0], [0], [1], [0, 0, 1, 1], [], []>} : vector<16x30xf32>, vector<30x256xf32>, vector<16x256xf32> -> vector<16x256xf32>
    %c13 = arith.constant 13 : index
    %c0_145 = arith.constant 0 : index
    %c0_146 = arith.constant 0 : index
    %186 = vector.load %arg1[%c13, %c0_145, %c0_146] : memref<30x8x30xf32, #tpu.memory_space<vmem>>, vector<2x8x30xf32>
    %187 = vector.shape_cast %186 : vector<2x8x30xf32> to vector<16x30xf32>
    %c1_147 = arith.constant 1 : index
    %c0_148 = arith.constant 0 : index
    %c0_149 = arith.constant 0 : index
    %188 = vector.load %arg2[%c1_147, %c0_148, %c0_149] : memref<3x30x256xf32, #tpu.memory_space<vmem>>, vector<1x30x256xf32>
    %189 = vector.shape_cast %188 : vector<1x30x256xf32> to vector<30x256xf32>
    %cst_150 = arith.constant dense<0.000000e+00> : vector<16x256xf32>
    %190 = tpu.matmul %187, %189, %cst_150 {dimension_numbers = #tpu.dot_dimension_numbers<[1], [0], [0], [1], [0, 0, 1, 1], [], []>} : vector<16x30xf32>, vector<30x256xf32>, vector<16x256xf32> -> vector<16x256xf32>
    %191 = arith.addf %185, %190 : vector<16x256xf32>
    %c14 = arith.constant 14 : index
    %c0_151 = arith.constant 0 : index
    %c0_152 = arith.constant 0 : index
    %192 = vector.load %arg1[%c14, %c0_151, %c0_152] : memref<30x8x30xf32, #tpu.memory_space<vmem>>, vector<2x8x30xf32>
    %193 = vector.shape_cast %192 : vector<2x8x30xf32> to vector<16x30xf32>
    %c2_153 = arith.constant 2 : index
    %c0_154 = arith.constant 0 : index
    %c0_155 = arith.constant 0 : index
    %194 = vector.load %arg2[%c2_153, %c0_154, %c0_155] : memref<3x30x256xf32, #tpu.memory_space<vmem>>, vector<1x30x256xf32>
    %195 = vector.shape_cast %194 : vector<1x30x256xf32> to vector<30x256xf32>
    %cst_156 = arith.constant dense<0.000000e+00> : vector<16x256xf32>
    %196 = tpu.matmul %193, %195, %cst_156 {dimension_numbers = #tpu.dot_dimension_numbers<[1], [0], [0], [1], [0, 0, 1, 1], [], []>} : vector<16x30xf32>, vector<30x256xf32>, vector<16x256xf32> -> vector<16x256xf32>
    %197 = arith.addf %191, %196 : vector<16x256xf32>
    %198 = vector.extract_strided_slice %197 {offsets = [0, 0], sizes = [8, 256], strides = [1, 1]} : vector<16x256xf32> to vector<8x256xf32>
    %199 = vector.extract_strided_slice %197 {offsets = [8, 0], sizes = [8, 256], strides = [1, 1]} : vector<16x256xf32> to vector<8x256xf32>
    %200 = arith.maximumf %198, %199 : vector<8x256xf32>
    %201 = vector.extract_strided_slice %200 {offsets = [0, 0], sizes = [8, 84], strides = [1, 1]} : vector<8x256xf32> to vector<8x84xf32>
    %202 = vector.extract_strided_slice %200 {offsets = [0, 128], sizes = [8, 84], strides = [1, 1]} : vector<8x256xf32> to vector<8x84xf32>
    %203 = arith.maximumf %201, %202 : vector<8x84xf32>
    %204 = vector.broadcast %0 : vector<1x84xf32> to vector<8x84xf32>
    %205 = arith.addf %203, %204 : vector<8x84xf32>
    %cst_157 = arith.constant 0.000000e+00 : f32
    %206 = vector.broadcast %cst_157 : f32 to vector<8x84xf32>
    %207 = arith.maximumf %205, %206 : vector<8x84xf32>
    %c6_158 = arith.constant 6 : index
    %c0_159 = arith.constant 0 : index
    %c0_160 = arith.constant 0 : index
    %208 = vector.load %arg13[%c6_158, %c0_159, %c0_160] : memref<14x8x84xf32, #tpu.memory_space<vmem>>, vector<1x8x84xf32>
    %209 = vector.shape_cast %208 : vector<1x8x84xf32> to vector<8x84xf32>
    %210 = vector.shape_cast %207 : vector<8x84xf32> to vector<1x8x84xf32>
    tpu.vector_store %arg13[%c6_158, %c0_159, %c0_160], %210 {strides = array<i32>} : memref<14x8x84xf32, #tpu.memory_space<vmem>>, vector<1x8x84xf32>,
    %c14_161 = arith.constant 14 : index
    %c0_162 = arith.constant 0 : index
    %c0_163 = arith.constant 0 : index
    %211 = vector.load %arg1[%c14_161, %c0_162, %c0_163] : memref<30x8x30xf32, #tpu.memory_space<vmem>>, vector<2x8x30xf32>
    %212 = vector.shape_cast %211 : vector<2x8x30xf32> to vector<16x30xf32>
    %c0_164 = arith.constant 0 : index
    %c0_165 = arith.constant 0 : index
    %c0_166 = arith.constant 0 : index
    %213 = vector.load %arg2[%c0_164, %c0_165, %c0_166] : memref<3x30x256xf32, #tpu.memory_space<vmem>>, vector<1x30x256xf32>
    %214 = vector.shape_cast %213 : vector<1x30x256xf32> to vector<30x256xf32>
    %cst_167 = arith.constant dense<0.000000e+00> : vector<16x256xf32>
    %215 = tpu.matmul %212, %214, %cst_167 {dimension_numbers = #tpu.dot_dimension_numbers<[1], [0], [0], [1], [0, 0, 1, 1], [], []>} : vector<16x30xf32>, vector<30x256xf32>, vector<16x256xf32> -> vector<16x256xf32>
    %c15 = arith.constant 15 : index
    %c0_168 = arith.constant 0 : index
    %c0_169 = arith.constant 0 : index
    %216 = vector.load %arg1[%c15, %c0_168, %c0_169] : memref<30x8x30xf32, #tpu.memory_space<vmem>>, vector<2x8x30xf32>
    %217 = vector.shape_cast %216 : vector<2x8x30xf32> to vector<16x30xf32>
    %c1_170 = arith.constant 1 : index
    %c0_171 = arith.constant 0 : index
    %c0_172 = arith.constant 0 : index
    %218 = vector.load %arg2[%c1_170, %c0_171, %c0_172] : memref<3x30x256xf32, #tpu.memory_space<vmem>>, vector<1x30x256xf32>
    %219 = vector.shape_cast %218 : vector<1x30x256xf32> to vector<30x256xf32>
    %cst_173 = arith.constant dense<0.000000e+00> : vector<16x256xf32>
    %220 = tpu.matmul %217, %219, %cst_173 {dimension_numbers = #tpu.dot_dimension_numbers<[1], [0], [0], [1], [0, 0, 1, 1], [], []>} : vector<16x30xf32>, vector<30x256xf32>, vector<16x256xf32> -> vector<16x256xf32>
    %221 = arith.addf %215, %220 : vector<16x256xf32>
    %c16 = arith.constant 16 : index
    %c0_174 = arith.constant 0 : index
    %c0_175 = arith.constant 0 : index
    %222 = vector.load %arg1[%c16, %c0_174, %c0_175] : memref<30x8x30xf32, #tpu.memory_space<vmem>>, vector<2x8x30xf32>
    %223 = vector.shape_cast %222 : vector<2x8x30xf32> to vector<16x30xf32>
    %c2_176 = arith.constant 2 : index
    %c0_177 = arith.constant 0 : index
    %c0_178 = arith.constant 0 : index
    %224 = vector.load %arg2[%c2_176, %c0_177, %c0_178] : memref<3x30x256xf32, #tpu.memory_space<vmem>>, vector<1x30x256xf32>
    %225 = vector.shape_cast %224 : vector<1x30x256xf32> to vector<30x256xf32>
    %cst_179 = arith.constant dense<0.000000e+00> : vector<16x256xf32>
    %226 = tpu.matmul %223, %225, %cst_179 {dimension_numbers = #tpu.dot_dimension_numbers<[1], [0], [0], [1], [0, 0, 1, 1], [], []>} : vector<16x30xf32>, vector<30x256xf32>, vector<16x256xf32> -> vector<16x256xf32>
    %227 = arith.addf %221, %226 : vector<16x256xf32>
    %228 = vector.extract_strided_slice %227 {offsets = [0, 0], sizes = [8, 256], strides = [1, 1]} : vector<16x256xf32> to vector<8x256xf32>
    %229 = vector.extract_strided_slice %227 {offsets = [8, 0], sizes = [8, 256], strides = [1, 1]} : vector<16x256xf32> to vector<8x256xf32>
    %230 = arith.maximumf %228, %229 : vector<8x256xf32>
    %231 = vector.extract_strided_slice %230 {offsets = [0, 0], sizes = [8, 84], strides = [1, 1]} : vector<8x256xf32> to vector<8x84xf32>
    %232 = vector.extract_strided_slice %230 {offsets = [0, 128], sizes = [8, 84], strides = [1, 1]} : vector<8x256xf32> to vector<8x84xf32>
    %233 = arith.maximumf %231, %232 : vector<8x84xf32>
    %234 = vector.broadcast %0 : vector<1x84xf32> to vector<8x84xf32>
    %235 = arith.addf %233, %234 : vector<8x84xf32>
    %cst_180 = arith.constant 0.000000e+00 : f32
    %236 = vector.broadcast %cst_180 : f32 to vector<8x84xf32>
    %237 = arith.maximumf %235, %236 : vector<8x84xf32>
    %c7_181 = arith.constant 7 : index
    %c0_182 = arith.constant 0 : index
    %c0_183 = arith.constant 0 : index
    %238 = vector.load %arg13[%c7_181, %c0_182, %c0_183] : memref<14x8x84xf32, #tpu.memory_space<vmem>>, vector<1x8x84xf32>
    %239 = vector.shape_cast %238 : vector<1x8x84xf32> to vector<8x84xf32>
    %240 = vector.shape_cast %237 : vector<8x84xf32> to vector<1x8x84xf32>
    tpu.vector_store %arg13[%c7_181, %c0_182, %c0_183], %240 {strides = array<i32>} : memref<14x8x84xf32, #tpu.memory_space<vmem>>, vector<1x8x84xf32>,
    %c16_184 = arith.constant 16 : index
    %c0_185 = arith.constant 0 : index
    %c0_186 = arith.constant 0 : index
    %241 = vector.load %arg1[%c16_184, %c0_185, %c0_186] : memref<30x8x30xf32, #tpu.memory_space<vmem>>, vector<2x8x30xf32>
    %242 = vector.shape_cast %241 : vector<2x8x30xf32> to vector<16x30xf32>
    %c0_187 = arith.constant 0 : index
    %c0_188 = arith.constant 0 : index
    %c0_189 = arith.constant 0 : index
    %243 = vector.load %arg2[%c0_187, %c0_188, %c0_189] : memref<3x30x256xf32, #tpu.memory_space<vmem>>, vector<1x30x256xf32>
    %244 = vector.shape_cast %243 : vector<1x30x256xf32> to vector<30x256xf32>
    %cst_190 = arith.constant dense<0.000000e+00> : vector<16x256xf32>
    %245 = tpu.matmul %242, %244, %cst_190 {dimension_numbers = #tpu.dot_dimension_numbers<[1], [0], [0], [1], [0, 0, 1, 1], [], []>} : vector<16x30xf32>, vector<30x256xf32>, vector<16x256xf32> -> vector<16x256xf32>
    %c17 = arith.constant 17 : index
    %c0_191 = arith.constant 0 : index
    %c0_192 = arith.constant 0 : index
    %246 = vector.load %arg1[%c17, %c0_191, %c0_192] : memref<30x8x30xf32, #tpu.memory_space<vmem>>, vector<2x8x30xf32>
    %247 = vector.shape_cast %246 : vector<2x8x30xf32> to vector<16x30xf32>
    %c1_193 = arith.constant 1 : index
    %c0_194 = arith.constant 0 : index
    %c0_195 = arith.constant 0 : index
    %248 = vector.load %arg2[%c1_193, %c0_194, %c0_195] : memref<3x30x256xf32, #tpu.memory_space<vmem>>, vector<1x30x256xf32>
    %249 = vector.shape_cast %248 : vector<1x30x256xf32> to vector<30x256xf32>
    %cst_196 = arith.constant dense<0.000000e+00> : vector<16x256xf32>
    %250 = tpu.matmul %247, %249, %cst_196 {dimension_numbers = #tpu.dot_dimension_numbers<[1], [0], [0], [1], [0, 0, 1, 1], [], []>} : vector<16x30xf32>, vector<30x256xf32>, vector<16x256xf32> -> vector<16x256xf32>
    %251 = arith.addf %245, %250 : vector<16x256xf32>
    %c18 = arith.constant 18 : index
    %c0_197 = arith.constant 0 : index
    %c0_198 = arith.constant 0 : index
    %252 = vector.load %arg1[%c18, %c0_197, %c0_198] : memref<30x8x30xf32, #tpu.memory_space<vmem>>, vector<2x8x30xf32>
    %253 = vector.shape_cast %252 : vector<2x8x30xf32> to vector<16x30xf32>
    %c2_199 = arith.constant 2 : index
    %c0_200 = arith.constant 0 : index
    %c0_201 = arith.constant 0 : index
    %254 = vector.load %arg2[%c2_199, %c0_200, %c0_201] : memref<3x30x256xf32, #tpu.memory_space<vmem>>, vector<1x30x256xf32>
    %255 = vector.shape_cast %254 : vector<1x30x256xf32> to vector<30x256xf32>
    %cst_202 = arith.constant dense<0.000000e+00> : vector<16x256xf32>
    %256 = tpu.matmul %253, %255, %cst_202 {dimension_numbers = #tpu.dot_dimension_numbers<[1], [0], [0], [1], [0, 0, 1, 1], [], []>} : vector<16x30xf32>, vector<30x256xf32>, vector<16x256xf32> -> vector<16x256xf32>
    %257 = arith.addf %251, %256 : vector<16x256xf32>
    %258 = vector.extract_strided_slice %257 {offsets = [0, 0], sizes = [8, 256], strides = [1, 1]} : vector<16x256xf32> to vector<8x256xf32>
    %259 = vector.extract_strided_slice %257 {offsets = [8, 0], sizes = [8, 256], strides = [1, 1]} : vector<16x256xf32> to vector<8x256xf32>
    %260 = arith.maximumf %258, %259 : vector<8x256xf32>
    %261 = vector.extract_strided_slice %260 {offsets = [0, 0], sizes = [8, 84], strides = [1, 1]} : vector<8x256xf32> to vector<8x84xf32>
    %262 = vector.extract_strided_slice %260 {offsets = [0, 128], sizes = [8, 84], strides = [1, 1]} : vector<8x256xf32> to vector<8x84xf32>
    %263 = arith.maximumf %261, %262 : vector<8x84xf32>
    %264 = vector.broadcast %0 : vector<1x84xf32> to vector<8x84xf32>
    %265 = arith.addf %263, %264 : vector<8x84xf32>
    %cst_203 = arith.constant 0.000000e+00 : f32
    %266 = vector.broadcast %cst_203 : f32 to vector<8x84xf32>
    %267 = arith.maximumf %265, %266 : vector<8x84xf32>
    %c8_204 = arith.constant 8 : index
    %c0_205 = arith.constant 0 : index
    %c0_206 = arith.constant 0 : index
    %268 = vector.load %arg13[%c8_204, %c0_205, %c0_206] : memref<14x8x84xf32, #tpu.memory_space<vmem>>, vector<1x8x84xf32>
    %269 = vector.shape_cast %268 : vector<1x8x84xf32> to vector<8x84xf32>
    %270 = vector.shape_cast %267 : vector<8x84xf32> to vector<1x8x84xf32>
    tpu.vector_store %arg13[%c8_204, %c0_205, %c0_206], %270 {strides = array<i32>} : memref<14x8x84xf32, #tpu.memory_space<vmem>>, vector<1x8x84xf32>,
    %c18_207 = arith.constant 18 : index
    %c0_208 = arith.constant 0 : index
    %c0_209 = arith.constant 0 : index
    %271 = vector.load %arg1[%c18_207, %c0_208, %c0_209] : memref<30x8x30xf32, #tpu.memory_space<vmem>>, vector<2x8x30xf32>
    %272 = vector.shape_cast %271 : vector<2x8x30xf32> to vector<16x30xf32>
    %c0_210 = arith.constant 0 : index
    %c0_211 = arith.constant 0 : index
    %c0_212 = arith.constant 0 : index
    %273 = vector.load %arg2[%c0_210, %c0_211, %c0_212] : memref<3x30x256xf32, #tpu.memory_space<vmem>>, vector<1x30x256xf32>
    %274 = vector.shape_cast %273 : vector<1x30x256xf32> to vector<30x256xf32>
    %cst_213 = arith.constant dense<0.000000e+00> : vector<16x256xf32>
    %275 = tpu.matmul %272, %274, %cst_213 {dimension_numbers = #tpu.dot_dimension_numbers<[1], [0], [0], [1], [0, 0, 1, 1], [], []>} : vector<16x30xf32>, vector<30x256xf32>, vector<16x256xf32> -> vector<16x256xf32>
    %c19 = arith.constant 19 : index
    %c0_214 = arith.constant 0 : index
    %c0_215 = arith.constant 0 : index
    %276 = vector.load %arg1[%c19, %c0_214, %c0_215] : memref<30x8x30xf32, #tpu.memory_space<vmem>>, vector<2x8x30xf32>
    %277 = vector.shape_cast %276 : vector<2x8x30xf32> to vector<16x30xf32>
    %c1_216 = arith.constant 1 : index
    %c0_217 = arith.constant 0 : index
    %c0_218 = arith.constant 0 : index
    %278 = vector.load %arg2[%c1_216, %c0_217, %c0_218] : memref<3x30x256xf32, #tpu.memory_space<vmem>>, vector<1x30x256xf32>
    %279 = vector.shape_cast %278 : vector<1x30x256xf32> to vector<30x256xf32>
    %cst_219 = arith.constant dense<0.000000e+00> : vector<16x256xf32>
    %280 = tpu.matmul %277, %279, %cst_219 {dimension_numbers = #tpu.dot_dimension_numbers<[1], [0], [0], [1], [0, 0, 1, 1], [], []>} : vector<16x30xf32>, vector<30x256xf32>, vector<16x256xf32> -> vector<16x256xf32>
    %281 = arith.addf %275, %280 : vector<16x256xf32>
    %c20 = arith.constant 20 : index
    %c0_220 = arith.constant 0 : index
    %c0_221 = arith.constant 0 : index
    %282 = vector.load %arg1[%c20, %c0_220, %c0_221] : memref<30x8x30xf32, #tpu.memory_space<vmem>>, vector<2x8x30xf32>
    %283 = vector.shape_cast %282 : vector<2x8x30xf32> to vector<16x30xf32>
    %c2_222 = arith.constant 2 : index
    %c0_223 = arith.constant 0 : index
    %c0_224 = arith.constant 0 : index
    %284 = vector.load %arg2[%c2_222, %c0_223, %c0_224] : memref<3x30x256xf32, #tpu.memory_space<vmem>>, vector<1x30x256xf32>
    %285 = vector.shape_cast %284 : vector<1x30x256xf32> to vector<30x256xf32>
    %cst_225 = arith.constant dense<0.000000e+00> : vector<16x256xf32>
    %286 = tpu.matmul %283, %285, %cst_225 {dimension_numbers = #tpu.dot_dimension_numbers<[1], [0], [0], [1], [0, 0, 1, 1], [], []>} : vector<16x30xf32>, vector<30x256xf32>, vector<16x256xf32> -> vector<16x256xf32>
    %287 = arith.addf %281, %286 : vector<16x256xf32>
    %288 = vector.extract_strided_slice %287 {offsets = [0, 0], sizes = [8, 256], strides = [1, 1]} : vector<16x256xf32> to vector<8x256xf32>
    %289 = vector.extract_strided_slice %287 {offsets = [8, 0], sizes = [8, 256], strides = [1, 1]} : vector<16x256xf32> to vector<8x256xf32>
    %290 = arith.maximumf %288, %289 : vector<8x256xf32>
    %291 = vector.extract_strided_slice %290 {offsets = [0, 0], sizes = [8, 84], strides = [1, 1]} : vector<8x256xf32> to vector<8x84xf32>
    %292 = vector.extract_strided_slice %290 {offsets = [0, 128], sizes = [8, 84], strides = [1, 1]} : vector<8x256xf32> to vector<8x84xf32>
    %293 = arith.maximumf %291, %292 : vector<8x84xf32>
    %294 = vector.broadcast %0 : vector<1x84xf32> to vector<8x84xf32>
    %295 = arith.addf %293, %294 : vector<8x84xf32>
    %cst_226 = arith.constant 0.000000e+00 : f32
    %296 = vector.broadcast %cst_226 : f32 to vector<8x84xf32>
    %297 = arith.maximumf %295, %296 : vector<8x84xf32>
    %c9_227 = arith.constant 9 : index
    %c0_228 = arith.constant 0 : index
    %c0_229 = arith.constant 0 : index
    %298 = vector.load %arg13[%c9_227, %c0_228, %c0_229] : memref<14x8x84xf32, #tpu.memory_space<vmem>>, vector<1x8x84xf32>
    %299 = vector.shape_cast %298 : vector<1x8x84xf32> to vector<8x84xf32>
    %300 = vector.shape_cast %297 : vector<8x84xf32> to vector<1x8x84xf32>
    tpu.vector_store %arg13[%c9_227, %c0_228, %c0_229], %300 {strides = array<i32>} : memref<14x8x84xf32, #tpu.memory_space<vmem>>, vector<1x8x84xf32>,
    %c20_230 = arith.constant 20 : index
    %c0_231 = arith.constant 0 : index
    %c0_232 = arith.constant 0 : index
    %301 = vector.load %arg1[%c20_230, %c0_231, %c0_232] : memref<30x8x30xf32, #tpu.memory_space<vmem>>, vector<2x8x30xf32>
    %302 = vector.shape_cast %301 : vector<2x8x30xf32> to vector<16x30xf32>
    %c0_233 = arith.constant 0 : index
    %c0_234 = arith.constant 0 : index
    %c0_235 = arith.constant 0 : index
    %303 = vector.load %arg2[%c0_233, %c0_234, %c0_235] : memref<3x30x256xf32, #tpu.memory_space<vmem>>, vector<1x30x256xf32>
    %304 = vector.shape_cast %303 : vector<1x30x256xf32> to vector<30x256xf32>
    %cst_236 = arith.constant dense<0.000000e+00> : vector<16x256xf32>
    %305 = tpu.matmul %302, %304, %cst_236 {dimension_numbers = #tpu.dot_dimension_numbers<[1], [0], [0], [1], [0, 0, 1, 1], [], []>} : vector<16x30xf32>, vector<30x256xf32>, vector<16x256xf32> -> vector<16x256xf32>
    %c21 = arith.constant 21 : index
    %c0_237 = arith.constant 0 : index
    %c0_238 = arith.constant 0 : index
    %306 = vector.load %arg1[%c21, %c0_237, %c0_238] : memref<30x8x30xf32, #tpu.memory_space<vmem>>, vector<2x8x30xf32>
    %307 = vector.shape_cast %306 : vector<2x8x30xf32> to vector<16x30xf32>
    %c1_239 = arith.constant 1 : index
    %c0_240 = arith.constant 0 : index
    %c0_241 = arith.constant 0 : index
    %308 = vector.load %arg2[%c1_239, %c0_240, %c0_241] : memref<3x30x256xf32, #tpu.memory_space<vmem>>, vector<1x30x256xf32>
    %309 = vector.shape_cast %308 : vector<1x30x256xf32> to vector<30x256xf32>
    %cst_242 = arith.constant dense<0.000000e+00> : vector<16x256xf32>
    %310 = tpu.matmul %307, %309, %cst_242 {dimension_numbers = #tpu.dot_dimension_numbers<[1], [0], [0], [1], [0, 0, 1, 1], [], []>} : vector<16x30xf32>, vector<30x256xf32>, vector<16x256xf32> -> vector<16x256xf32>
    %311 = arith.addf %305, %310 : vector<16x256xf32>
    %c22 = arith.constant 22 : index
    %c0_243 = arith.constant 0 : index
    %c0_244 = arith.constant 0 : index
    %312 = vector.load %arg1[%c22, %c0_243, %c0_244] : memref<30x8x30xf32, #tpu.memory_space<vmem>>, vector<2x8x30xf32>
    %313 = vector.shape_cast %312 : vector<2x8x30xf32> to vector<16x30xf32>
    %c2_245 = arith.constant 2 : index
    %c0_246 = arith.constant 0 : index
    %c0_247 = arith.constant 0 : index
    %314 = vector.load %arg2[%c2_245, %c0_246, %c0_247] : memref<3x30x256xf32, #tpu.memory_space<vmem>>, vector<1x30x256xf32>
    %315 = vector.shape_cast %314 : vector<1x30x256xf32> to vector<30x256xf32>
    %cst_248 = arith.constant dense<0.000000e+00> : vector<16x256xf32>
    %316 = tpu.matmul %313, %315, %cst_248 {dimension_numbers = #tpu.dot_dimension_numbers<[1], [0], [0], [1], [0, 0, 1, 1], [], []>} : vector<16x30xf32>, vector<30x256xf32>, vector<16x256xf32> -> vector<16x256xf32>
    %317 = arith.addf %311, %316 : vector<16x256xf32>
    %318 = vector.extract_strided_slice %317 {offsets = [0, 0], sizes = [8, 256], strides = [1, 1]} : vector<16x256xf32> to vector<8x256xf32>
    %319 = vector.extract_strided_slice %317 {offsets = [8, 0], sizes = [8, 256], strides = [1, 1]} : vector<16x256xf32> to vector<8x256xf32>
    %320 = arith.maximumf %318, %319 : vector<8x256xf32>
    %321 = vector.extract_strided_slice %320 {offsets = [0, 0], sizes = [8, 84], strides = [1, 1]} : vector<8x256xf32> to vector<8x84xf32>
    %322 = vector.extract_strided_slice %320 {offsets = [0, 128], sizes = [8, 84], strides = [1, 1]} : vector<8x256xf32> to vector<8x84xf32>
    %323 = arith.maximumf %321, %322 : vector<8x84xf32>
    %324 = vector.broadcast %0 : vector<1x84xf32> to vector<8x84xf32>
    %325 = arith.addf %323, %324 : vector<8x84xf32>
    %cst_249 = arith.constant 0.000000e+00 : f32
    %326 = vector.broadcast %cst_249 : f32 to vector<8x84xf32>
    %327 = arith.maximumf %325, %326 : vector<8x84xf32>
    %c10_250 = arith.constant 10 : index
    %c0_251 = arith.constant 0 : index
    %c0_252 = arith.constant 0 : index
    %328 = vector.load %arg13[%c10_250, %c0_251, %c0_252] : memref<14x8x84xf32, #tpu.memory_space<vmem>>, vector<1x8x84xf32>
    %329 = vector.shape_cast %328 : vector<1x8x84xf32> to vector<8x84xf32>
    %330 = vector.shape_cast %327 : vector<8x84xf32> to vector<1x8x84xf32>
    tpu.vector_store %arg13[%c10_250, %c0_251, %c0_252], %330 {strides = array<i32>} : memref<14x8x84xf32, #tpu.memory_space<vmem>>, vector<1x8x84xf32>,
    %c22_253 = arith.constant 22 : index
    %c0_254 = arith.constant 0 : index
    %c0_255 = arith.constant 0 : index
    %331 = vector.load %arg1[%c22_253, %c0_254, %c0_255] : memref<30x8x30xf32, #tpu.memory_space<vmem>>, vector<2x8x30xf32>
    %332 = vector.shape_cast %331 : vector<2x8x30xf32> to vector<16x30xf32>
    %c0_256 = arith.constant 0 : index
    %c0_257 = arith.constant 0 : index
    %c0_258 = arith.constant 0 : index
    %333 = vector.load %arg2[%c0_256, %c0_257, %c0_258] : memref<3x30x256xf32, #tpu.memory_space<vmem>>, vector<1x30x256xf32>
    %334 = vector.shape_cast %333 : vector<1x30x256xf32> to vector<30x256xf32>
    %cst_259 = arith.constant dense<0.000000e+00> : vector<16x256xf32>
    %335 = tpu.matmul %332, %334, %cst_259 {dimension_numbers = #tpu.dot_dimension_numbers<[1], [0], [0], [1], [0, 0, 1, 1], [], []>} : vector<16x30xf32>, vector<30x256xf32>, vector<16x256xf32> -> vector<16x256xf32>
    %c23 = arith.constant 23 : index
    %c0_260 = arith.constant 0 : index
    %c0_261 = arith.constant 0 : index
    %336 = vector.load %arg1[%c23, %c0_260, %c0_261] : memref<30x8x30xf32, #tpu.memory_space<vmem>>, vector<2x8x30xf32>
    %337 = vector.shape_cast %336 : vector<2x8x30xf32> to vector<16x30xf32>
    %c1_262 = arith.constant 1 : index
    %c0_263 = arith.constant 0 : index
    %c0_264 = arith.constant 0 : index
    %338 = vector.load %arg2[%c1_262, %c0_263, %c0_264] : memref<3x30x256xf32, #tpu.memory_space<vmem>>, vector<1x30x256xf32>
    %339 = vector.shape_cast %338 : vector<1x30x256xf32> to vector<30x256xf32>
    %cst_265 = arith.constant dense<0.000000e+00> : vector<16x256xf32>
    %340 = tpu.matmul %337, %339, %cst_265 {dimension_numbers = #tpu.dot_dimension_numbers<[1], [0], [0], [1], [0, 0, 1, 1], [], []>} : vector<16x30xf32>, vector<30x256xf32>, vector<16x256xf32> -> vector<16x256xf32>
    %341 = arith.addf %335, %340 : vector<16x256xf32>
    %c24 = arith.constant 24 : index
    %c0_266 = arith.constant 0 : index
    %c0_267 = arith.constant 0 : index
    %342 = vector.load %arg1[%c24, %c0_266, %c0_267] : memref<30x8x30xf32, #tpu.memory_space<vmem>>, vector<2x8x30xf32>
    %343 = vector.shape_cast %342 : vector<2x8x30xf32> to vector<16x30xf32>
    %c2_268 = arith.constant 2 : index
    %c0_269 = arith.constant 0 : index
    %c0_270 = arith.constant 0 : index
    %344 = vector.load %arg2[%c2_268, %c0_269, %c0_270] : memref<3x30x256xf32, #tpu.memory_space<vmem>>, vector<1x30x256xf32>
    %345 = vector.shape_cast %344 : vector<1x30x256xf32> to vector<30x256xf32>
    %cst_271 = arith.constant dense<0.000000e+00> : vector<16x256xf32>
    %346 = tpu.matmul %343, %345, %cst_271 {dimension_numbers = #tpu.dot_dimension_numbers<[1], [0], [0], [1], [0, 0, 1, 1], [], []>} : vector<16x30xf32>, vector<30x256xf32>, vector<16x256xf32> -> vector<16x256xf32>
    %347 = arith.addf %341, %346 : vector<16x256xf32>
    %348 = vector.extract_strided_slice %347 {offsets = [0, 0], sizes = [8, 256], strides = [1, 1]} : vector<16x256xf32> to vector<8x256xf32>
    %349 = vector.extract_strided_slice %347 {offsets = [8, 0], sizes = [8, 256], strides = [1, 1]} : vector<16x256xf32> to vector<8x256xf32>
    %350 = arith.maximumf %348, %349 : vector<8x256xf32>
    %351 = vector.extract_strided_slice %350 {offsets = [0, 0], sizes = [8, 84], strides = [1, 1]} : vector<8x256xf32> to vector<8x84xf32>
    %352 = vector.extract_strided_slice %350 {offsets = [0, 128], sizes = [8, 84], strides = [1, 1]} : vector<8x256xf32> to vector<8x84xf32>
    %353 = arith.maximumf %351, %352 : vector<8x84xf32>
    %354 = vector.broadcast %0 : vector<1x84xf32> to vector<8x84xf32>
    %355 = arith.addf %353, %354 : vector<8x84xf32>
    %cst_272 = arith.constant 0.000000e+00 : f32
    %356 = vector.broadcast %cst_272 : f32 to vector<8x84xf32>
    %357 = arith.maximumf %355, %356 : vector<8x84xf32>
    %c11_273 = arith.constant 11 : index
    %c0_274 = arith.constant 0 : index
    %c0_275 = arith.constant 0 : index
    %358 = vector.load %arg13[%c11_273, %c0_274, %c0_275] : memref<14x8x84xf32, #tpu.memory_space<vmem>>, vector<1x8x84xf32>
    %359 = vector.shape_cast %358 : vector<1x8x84xf32> to vector<8x84xf32>
    %360 = vector.shape_cast %357 : vector<8x84xf32> to vector<1x8x84xf32>
    tpu.vector_store %arg13[%c11_273, %c0_274, %c0_275], %360 {strides = array<i32>} : memref<14x8x84xf32, #tpu.memory_space<vmem>>, vector<1x8x84xf32>,
    %c24_276 = arith.constant 24 : index
    %c0_277 = arith.constant 0 : index
    %c0_278 = arith.constant 0 : index
    %361 = vector.load %arg1[%c24_276, %c0_277, %c0_278] : memref<30x8x30xf32, #tpu.memory_space<vmem>>, vector<2x8x30xf32>
    %362 = vector.shape_cast %361 : vector<2x8x30xf32> to vector<16x30xf32>
    %c0_279 = arith.constant 0 : index
    %c0_280 = arith.constant 0 : index
    %c0_281 = arith.constant 0 : index
    %363 = vector.load %arg2[%c0_279, %c0_280, %c0_281] : memref<3x30x256xf32, #tpu.memory_space<vmem>>, vector<1x30x256xf32>
    %364 = vector.shape_cast %363 : vector<1x30x256xf32> to vector<30x256xf32>
    %cst_282 = arith.constant dense<0.000000e+00> : vector<16x256xf32>
    %365 = tpu.matmul %362, %364, %cst_282 {dimension_numbers = #tpu.dot_dimension_numbers<[1], [0], [0], [1], [0, 0, 1, 1], [], []>} : vector<16x30xf32>, vector<30x256xf32>, vector<16x256xf32> -> vector<16x256xf32>
    %c25 = arith.constant 25 : index
    %c0_283 = arith.constant 0 : index
    %c0_284 = arith.constant 0 : index
    %366 = vector.load %arg1[%c25, %c0_283, %c0_284] : memref<30x8x30xf32, #tpu.memory_space<vmem>>, vector<2x8x30xf32>
    %367 = vector.shape_cast %366 : vector<2x8x30xf32> to vector<16x30xf32>
    %c1_285 = arith.constant 1 : index
    %c0_286 = arith.constant 0 : index
    %c0_287 = arith.constant 0 : index
    %368 = vector.load %arg2[%c1_285, %c0_286, %c0_287] : memref<3x30x256xf32, #tpu.memory_space<vmem>>, vector<1x30x256xf32>
    %369 = vector.shape_cast %368 : vector<1x30x256xf32> to vector<30x256xf32>
    %cst_288 = arith.constant dense<0.000000e+00> : vector<16x256xf32>
    %370 = tpu.matmul %367, %369, %cst_288 {dimension_numbers = #tpu.dot_dimension_numbers<[1], [0], [0], [1], [0, 0, 1, 1], [], []>} : vector<16x30xf32>, vector<30x256xf32>, vector<16x256xf32> -> vector<16x256xf32>
    %371 = arith.addf %365, %370 : vector<16x256xf32>
    %c26 = arith.constant 26 : index
    %c0_289 = arith.constant 0 : index
    %c0_290 = arith.constant 0 : index
    %372 = vector.load %arg1[%c26, %c0_289, %c0_290] : memref<30x8x30xf32, #tpu.memory_space<vmem>>, vector<2x8x30xf32>
    %373 = vector.shape_cast %372 : vector<2x8x30xf32> to vector<16x30xf32>
    %c2_291 = arith.constant 2 : index
    %c0_292 = arith.constant 0 : index
    %c0_293 = arith.constant 0 : index
    %374 = vector.load %arg2[%c2_291, %c0_292, %c0_293] : memref<3x30x256xf32, #tpu.memory_space<vmem>>, vector<1x30x256xf32>
    %375 = vector.shape_cast %374 : vector<1x30x256xf32> to vector<30x256xf32>
    %cst_294 = arith.constant dense<0.000000e+00> : vector<16x256xf32>
    %376 = tpu.matmul %373, %375, %cst_294 {dimension_numbers = #tpu.dot_dimension_numbers<[1], [0], [0], [1], [0, 0, 1, 1], [], []>} : vector<16x30xf32>, vector<30x256xf32>, vector<16x256xf32> -> vector<16x256xf32>
    %377 = arith.addf %371, %376 : vector<16x256xf32>
    %378 = vector.extract_strided_slice %377 {offsets = [0, 0], sizes = [8, 256], strides = [1, 1]} : vector<16x256xf32> to vector<8x256xf32>
    %379 = vector.extract_strided_slice %377 {offsets = [8, 0], sizes = [8, 256], strides = [1, 1]} : vector<16x256xf32> to vector<8x256xf32>
    %380 = arith.maximumf %378, %379 : vector<8x256xf32>
    %381 = vector.extract_strided_slice %380 {offsets = [0, 0], sizes = [8, 84], strides = [1, 1]} : vector<8x256xf32> to vector<8x84xf32>
    %382 = vector.extract_strided_slice %380 {offsets = [0, 128], sizes = [8, 84], strides = [1, 1]} : vector<8x256xf32> to vector<8x84xf32>
    %383 = arith.maximumf %381, %382 : vector<8x84xf32>
    %384 = vector.broadcast %0 : vector<1x84xf32> to vector<8x84xf32>
    %385 = arith.addf %383, %384 : vector<8x84xf32>
    %cst_295 = arith.constant 0.000000e+00 : f32
    %386 = vector.broadcast %cst_295 : f32 to vector<8x84xf32>
    %387 = arith.maximumf %385, %386 : vector<8x84xf32>
    %c12_296 = arith.constant 12 : index
    %c0_297 = arith.constant 0 : index
    %c0_298 = arith.constant 0 : index
    %388 = vector.load %arg13[%c12_296, %c0_297, %c0_298] : memref<14x8x84xf32, #tpu.memory_space<vmem>>, vector<1x8x84xf32>
    %389 = vector.shape_cast %388 : vector<1x8x84xf32> to vector<8x84xf32>
    %390 = vector.shape_cast %387 : vector<8x84xf32> to vector<1x8x84xf32>
    tpu.vector_store %arg13[%c12_296, %c0_297, %c0_298], %390 {strides = array<i32>} : memref<14x8x84xf32, #tpu.memory_space<vmem>>, vector<1x8x84xf32>,
    %c26_299 = arith.constant 26 : index
    %c0_300 = arith.constant 0 : index
    %c0_301 = arith.constant 0 : index
    %391 = vector.load %arg1[%c26_299, %c0_300, %c0_301] : memref<30x8x30xf32, #tpu.memory_space<vmem>>, vector<2x8x30xf32>
    %392 = vector.shape_cast %391 : vector<2x8x30xf32> to vector<16x30xf32>
    %c0_302 = arith.constant 0 : index
    %c0_303 = arith.constant 0 : index
    %c0_304 = arith.constant 0 : index
    %393 = vector.load %arg2[%c0_302, %c0_303, %c0_304] : memref<3x30x256xf32, #tpu.memory_space<vmem>>, vector<1x30x256xf32>
    %394 = vector.shape_cast %393 : vector<1x30x256xf32> to vector<30x256xf32>
    %cst_305 = arith.constant dense<0.000000e+00> : vector<16x256xf32>
    %395 = tpu.matmul %392, %394, %cst_305 {dimension_numbers = #tpu.dot_dimension_numbers<[1], [0], [0], [1], [0, 0, 1, 1], [], []>} : vector<16x30xf32>, vector<30x256xf32>, vector<16x256xf32> -> vector<16x256xf32>
    %c27 = arith.constant 27 : index
    %c0_306 = arith.constant 0 : index
    %c0_307 = arith.constant 0 : index
    %396 = vector.load %arg1[%c27, %c0_306, %c0_307] : memref<30x8x30xf32, #tpu.memory_space<vmem>>, vector<2x8x30xf32>
    %397 = vector.shape_cast %396 : vector<2x8x30xf32> to vector<16x30xf32>
    %c1_308 = arith.constant 1 : index
    %c0_309 = arith.constant 0 : index
    %c0_310 = arith.constant 0 : index
    %398 = vector.load %arg2[%c1_308, %c0_309, %c0_310] : memref<3x30x256xf32, #tpu.memory_space<vmem>>, vector<1x30x256xf32>
    %399 = vector.shape_cast %398 : vector<1x30x256xf32> to vector<30x256xf32>
    %cst_311 = arith.constant dense<0.000000e+00> : vector<16x256xf32>
    %400 = tpu.matmul %397, %399, %cst_311 {dimension_numbers = #tpu.dot_dimension_numbers<[1], [0], [0], [1], [0, 0, 1, 1], [], []>} : vector<16x30xf32>, vector<30x256xf32>, vector<16x256xf32> -> vector<16x256xf32>
    %401 = arith.addf %395, %400 : vector<16x256xf32>
    %c28 = arith.constant 28 : index
    %c0_312 = arith.constant 0 : index
    %c0_313 = arith.constant 0 : index
    %402 = vector.load %arg1[%c28, %c0_312, %c0_313] : memref<30x8x30xf32, #tpu.memory_space<vmem>>, vector<2x8x30xf32>
    %403 = vector.shape_cast %402 : vector<2x8x30xf32> to vector<16x30xf32>
    %c2_314 = arith.constant 2 : index
    %c0_315 = arith.constant 0 : index
    %c0_316 = arith.constant 0 : index
    %404 = vector.load %arg2[%c2_314, %c0_315, %c0_316] : memref<3x30x256xf32, #tpu.memory_space<vmem>>, vector<1x30x256xf32>
    %405 = vector.shape_cast %404 : vector<1x30x256xf32> to vector<30x256xf32>
    %cst_317 = arith.constant dense<0.000000e+00> : vector<16x256xf32>
    %406 = tpu.matmul %403, %405, %cst_317 {dimension_numbers = #tpu.dot_dimension_numbers<[1], [0], [0], [1], [0, 0, 1, 1], [], []>} : vector<16x30xf32>, vector<30x256xf32>, vector<16x256xf32> -> vector<16x256xf32>
    %407 = arith.addf %401, %406 : vector<16x256xf32>
    %408 = vector.extract_strided_slice %407 {offsets = [0, 0], sizes = [8, 256], strides = [1, 1]} : vector<16x256xf32> to vector<8x256xf32>
    %409 = vector.extract_strided_slice %407 {offsets = [8, 0], sizes = [8, 256], strides = [1, 1]} : vector<16x256xf32> to vector<8x256xf32>
    %410 = arith.maximumf %408, %409 : vector<8x256xf32>
    %411 = vector.extract_strided_slice %410 {offsets = [0, 0], sizes = [8, 84], strides = [1, 1]} : vector<8x256xf32> to vector<8x84xf32>
    %412 = vector.extract_strided_slice %410 {offsets = [0, 128], sizes = [8, 84], strides = [1, 1]} : vector<8x256xf32> to vector<8x84xf32>
    %413 = arith.maximumf %411, %412 : vector<8x84xf32>
    %414 = vector.broadcast %0 : vector<1x84xf32> to vector<8x84xf32>
    %415 = arith.addf %413, %414 : vector<8x84xf32>
    %cst_318 = arith.constant 0.000000e+00 : f32
    %416 = vector.broadcast %cst_318 : f32 to vector<8x84xf32>
    %417 = arith.maximumf %415, %416 : vector<8x84xf32>
    %c13_319 = arith.constant 13 : index
    %c0_320 = arith.constant 0 : index
    %c0_321 = arith.constant 0 : index
    %418 = vector.load %arg13[%c13_319, %c0_320, %c0_321] : memref<14x8x84xf32, #tpu.memory_space<vmem>>, vector<1x8x84xf32>
    %419 = vector.shape_cast %418 : vector<1x8x84xf32> to vector<8x84xf32>
    %420 = vector.shape_cast %417 : vector<8x84xf32> to vector<1x8x84xf32>
    tpu.vector_store %arg13[%c13_319, %c0_320, %c0_321], %420 {strides = array<i32>} : memref<14x8x84xf32, #tpu.memory_space<vmem>>, vector<1x8x84xf32>,
    %c0_322 = arith.constant 0 : index
    %c0_323 = arith.constant 0 : index
    %421 = vector.load %arg5[%c0_322, %c0_323] : memref<1x80xf32, #tpu.memory_space<vmem>>, vector<1x80xf32>
    %c0_324 = arith.constant 0 : index
    %c0_325 = arith.constant 0 : index
    %c0_326 = arith.constant 0 : index
    %422 = vector.load %arg13[%c0_324, %c0_325, %c0_326] : memref<14x8x84xf32, #tpu.memory_space<vmem>>, vector<2x8x84xf32>
    %423 = vector.shape_cast %422 : vector<2x8x84xf32> to vector<16x84xf32>
    %c0_327 = arith.constant 0 : index
    %c0_328 = arith.constant 0 : index
    %c0_329 = arith.constant 0 : index
    %424 = vector.load %arg4[%c0_327, %c0_328, %c0_329] : memref<5x84x256xf32, #tpu.memory_space<vmem>>, vector<1x84x256xf32>
    %425 = vector.shape_cast %424 : vector<1x84x256xf32> to vector<84x256xf32>
    %cst_330 = arith.constant dense<0.000000e+00> : vector<16x256xf32>
    %426 = tpu.matmul %423, %425, %cst_330 {dimension_numbers = #tpu.dot_dimension_numbers<[1], [0], [0], [1], [0, 0, 1, 1], [], []>} : vector<16x84xf32>, vector<84x256xf32>, vector<16x256xf32> -> vector<16x256xf32>
    %c1_331 = arith.constant 1 : index
    %c0_332 = arith.constant 0 : index
    %c0_333 = arith.constant 0 : index
    %427 = vector.load %arg13[%c1_331, %c0_332, %c0_333] : memref<14x8x84xf32, #tpu.memory_space<vmem>>, vector<2x8x84xf32>
    %428 = vector.shape_cast %427 : vector<2x8x84xf32> to vector<16x84xf32>
    %c1_334 = arith.constant 1 : index
    %c0_335 = arith.constant 0 : index
    %c0_336 = arith.constant 0 : index
    %429 = vector.load %arg4[%c1_334, %c0_335, %c0_336] : memref<5x84x256xf32, #tpu.memory_space<vmem>>, vector<1x84x256xf32>
    %430 = vector.shape_cast %429 : vector<1x84x256xf32> to vector<84x256xf32>
    %cst_337 = arith.constant dense<0.000000e+00> : vector<16x256xf32>
    %431 = tpu.matmul %428, %430, %cst_337 {dimension_numbers = #tpu.dot_dimension_numbers<[1], [0], [0], [1], [0, 0, 1, 1], [], []>} : vector<16x84xf32>, vector<84x256xf32>, vector<16x256xf32> -> vector<16x256xf32>
    %432 = arith.addf %426, %431 : vector<16x256xf32>
    %c2_338 = arith.constant 2 : index
    %c0_339 = arith.constant 0 : index
    %c0_340 = arith.constant 0 : index
    %433 = vector.load %arg13[%c2_338, %c0_339, %c0_340] : memref<14x8x84xf32, #tpu.memory_space<vmem>>, vector<2x8x84xf32>
    %434 = vector.shape_cast %433 : vector<2x8x84xf32> to vector<16x84xf32>
    %c2_341 = arith.constant 2 : index
    %c0_342 = arith.constant 0 : index
    %c0_343 = arith.constant 0 : index
    %435 = vector.load %arg4[%c2_341, %c0_342, %c0_343] : memref<5x84x256xf32, #tpu.memory_space<vmem>>, vector<1x84x256xf32>
    %436 = vector.shape_cast %435 : vector<1x84x256xf32> to vector<84x256xf32>
    %cst_344 = arith.constant dense<0.000000e+00> : vector<16x256xf32>
    %437 = tpu.matmul %434, %436, %cst_344 {dimension_numbers = #tpu.dot_dimension_numbers<[1], [0], [0], [1], [0, 0, 1, 1], [], []>} : vector<16x84xf32>, vector<84x256xf32>, vector<16x256xf32> -> vector<16x256xf32>
    %438 = arith.addf %432, %437 : vector<16x256xf32>
    %c3_345 = arith.constant 3 : index
    %c0_346 = arith.constant 0 : index
    %c0_347 = arith.constant 0 : index
    %439 = vector.load %arg13[%c3_345, %c0_346, %c0_347] : memref<14x8x84xf32, #tpu.memory_space<vmem>>, vector<2x8x84xf32>
    %440 = vector.shape_cast %439 : vector<2x8x84xf32> to vector<16x84xf32>
    %c3_348 = arith.constant 3 : index
    %c0_349 = arith.constant 0 : index
    %c0_350 = arith.constant 0 : index
    %441 = vector.load %arg4[%c3_348, %c0_349, %c0_350] : memref<5x84x256xf32, #tpu.memory_space<vmem>>, vector<1x84x256xf32>
    %442 = vector.shape_cast %441 : vector<1x84x256xf32> to vector<84x256xf32>
    %cst_351 = arith.constant dense<0.000000e+00> : vector<16x256xf32>
    %443 = tpu.matmul %440, %442, %cst_351 {dimension_numbers = #tpu.dot_dimension_numbers<[1], [0], [0], [1], [0, 0, 1, 1], [], []>} : vector<16x84xf32>, vector<84x256xf32>, vector<16x256xf32> -> vector<16x256xf32>
    %444 = arith.addf %438, %443 : vector<16x256xf32>
    %c4_352 = arith.constant 4 : index
    %c0_353 = arith.constant 0 : index
    %c0_354 = arith.constant 0 : index
    %445 = vector.load %arg13[%c4_352, %c0_353, %c0_354] : memref<14x8x84xf32, #tpu.memory_space<vmem>>, vector<2x8x84xf32>
    %446 = vector.shape_cast %445 : vector<2x8x84xf32> to vector<16x84xf32>
    %c4_355 = arith.constant 4 : index
    %c0_356 = arith.constant 0 : index
    %c0_357 = arith.constant 0 : index
    %447 = vector.load %arg4[%c4_355, %c0_356, %c0_357] : memref<5x84x256xf32, #tpu.memory_space<vmem>>, vector<1x84x256xf32>
    %448 = vector.shape_cast %447 : vector<1x84x256xf32> to vector<84x256xf32>
    %cst_358 = arith.constant dense<0.000000e+00> : vector<16x256xf32>
    %449 = tpu.matmul %446, %448, %cst_358 {dimension_numbers = #tpu.dot_dimension_numbers<[1], [0], [0], [1], [0, 0, 1, 1], [], []>} : vector<16x84xf32>, vector<84x256xf32>, vector<16x256xf32> -> vector<16x256xf32>
    %450 = arith.addf %444, %449 : vector<16x256xf32>
    %451 = vector.extract_strided_slice %450 {offsets = [0, 0], sizes = [8, 256], strides = [1, 1]} : vector<16x256xf32> to vector<8x256xf32>
    %452 = vector.extract_strided_slice %450 {offsets = [8, 0], sizes = [8, 256], strides = [1, 1]} : vector<16x256xf32> to vector<8x256xf32>
    %453 = arith.maximumf %451, %452 : vector<8x256xf32>
    %454 = vector.extract_strided_slice %453 {offsets = [0, 0], sizes = [8, 80], strides = [1, 1]} : vector<8x256xf32> to vector<8x80xf32>
    %455 = vector.extract_strided_slice %453 {offsets = [0, 128], sizes = [8, 80], strides = [1, 1]} : vector<8x256xf32> to vector<8x80xf32>
    %456 = arith.maximumf %454, %455 : vector<8x80xf32>
    %457 = vector.broadcast %421 : vector<1x80xf32> to vector<8x80xf32>
    %458 = arith.addf %456, %457 : vector<8x80xf32>
    %cst_359 = arith.constant 0.000000e+00 : f32
    %459 = vector.broadcast %cst_359 : f32 to vector<8x80xf32>
    %460 = arith.maximumf %458, %459 : vector<8x80xf32>
    %c0_360 = arith.constant 0 : index
    %c0_361 = arith.constant 0 : index
    %c0_362 = arith.constant 0 : index
    %461 = vector.load %arg6[%c0_360, %c0_361, %c0_362] : memref<5x80x120xf32, #tpu.memory_space<vmem>>, vector<1x80x120xf32>
    %462 = vector.shape_cast %461 : vector<1x80x120xf32> to vector<80x120xf32>
    %cst_363 = arith.constant dense<0.000000e+00> : vector<8x120xf32>
    %463 = tpu.matmul %460, %462, %cst_363 {dimension_numbers = #tpu.dot_dimension_numbers<[1], [0], [0], [1], [0, 0, 1, 1], [], []>} : vector<8x80xf32>, vector<80x120xf32>, vector<8x120xf32> -> vector<8x120xf32>
    %c2_364 = arith.constant 2 : index
    %c0_365 = arith.constant 0 : index
    %c0_366 = arith.constant 0 : index
    %464 = vector.load %arg13[%c2_364, %c0_365, %c0_366] : memref<14x8x84xf32, #tpu.memory_space<vmem>>, vector<2x8x84xf32>
    %465 = vector.shape_cast %464 : vector<2x8x84xf32> to vector<16x84xf32>
    %c0_367 = arith.constant 0 : index
    %c0_368 = arith.constant 0 : index
    %c0_369 = arith.constant 0 : index
    %466 = vector.load %arg4[%c0_367, %c0_368, %c0_369] : memref<5x84x256xf32, #tpu.memory_space<vmem>>, vector<1x84x256xf32>
    %467 = vector.shape_cast %466 : vector<1x84x256xf32> to vector<84x256xf32>
    %cst_370 = arith.constant dense<0.000000e+00> : vector<16x256xf32>
    %468 = tpu.matmul %465, %467, %cst_370 {dimension_numbers = #tpu.dot_dimension_numbers<[1], [0], [0], [1], [0, 0, 1, 1], [], []>} : vector<16x84xf32>, vector<84x256xf32>, vector<16x256xf32> -> vector<16x256xf32>
    %c3_371 = arith.constant 3 : index
    %c0_372 = arith.constant 0 : index
    %c0_373 = arith.constant 0 : index
    %469 = vector.load %arg13[%c3_371, %c0_372, %c0_373] : memref<14x8x84xf32, #tpu.memory_space<vmem>>, vector<2x8x84xf32>
    %470 = vector.shape_cast %469 : vector<2x8x84xf32> to vector<16x84xf32>
    %c1_374 = arith.constant 1 : index
    %c0_375 = arith.constant 0 : index
    %c0_376 = arith.constant 0 : index
    %471 = vector.load %arg4[%c1_374, %c0_375, %c0_376] : memref<5x84x256xf32, #tpu.memory_space<vmem>>, vector<1x84x256xf32>
    %472 = vector.shape_cast %471 : vector<1x84x256xf32> to vector<84x256xf32>
    %cst_377 = arith.constant dense<0.000000e+00> : vector<16x256xf32>
    %473 = tpu.matmul %470, %472, %cst_377 {dimension_numbers = #tpu.dot_dimension_numbers<[1], [0], [0], [1], [0, 0, 1, 1], [], []>} : vector<16x84xf32>, vector<84x256xf32>, vector<16x256xf32> -> vector<16x256xf32>
    %474 = arith.addf %468, %473 : vector<16x256xf32>
    %c4_378 = arith.constant 4 : index
    %c0_379 = arith.constant 0 : index
    %c0_380 = arith.constant 0 : index
    %475 = vector.load %arg13[%c4_378, %c0_379, %c0_380] : memref<14x8x84xf32, #tpu.memory_space<vmem>>, vector<2x8x84xf32>
    %476 = vector.shape_cast %475 : vector<2x8x84xf32> to vector<16x84xf32>
    %c2_381 = arith.constant 2 : index
    %c0_382 = arith.constant 0 : index
    %c0_383 = arith.constant 0 : index
    %477 = vector.load %arg4[%c2_381, %c0_382, %c0_383] : memref<5x84x256xf32, #tpu.memory_space<vmem>>, vector<1x84x256xf32>
    %478 = vector.shape_cast %477 : vector<1x84x256xf32> to vector<84x256xf32>
    %cst_384 = arith.constant dense<0.000000e+00> : vector<16x256xf32>
    %479 = tpu.matmul %476, %478, %cst_384 {dimension_numbers = #tpu.dot_dimension_numbers<[1], [0], [0], [1], [0, 0, 1, 1], [], []>} : vector<16x84xf32>, vector<84x256xf32>, vector<16x256xf32> -> vector<16x256xf32>
    %480 = arith.addf %474, %479 : vector<16x256xf32>
    %c5_385 = arith.constant 5 : index
    %c0_386 = arith.constant 0 : index
    %c0_387 = arith.constant 0 : index
    %481 = vector.load %arg13[%c5_385, %c0_386, %c0_387] : memref<14x8x84xf32, #tpu.memory_space<vmem>>, vector<2x8x84xf32>
    %482 = vector.shape_cast %481 : vector<2x8x84xf32> to vector<16x84xf32>
    %c3_388 = arith.constant 3 : index
    %c0_389 = arith.constant 0 : index
    %c0_390 = arith.constant 0 : index
    %483 = vector.load %arg4[%c3_388, %c0_389, %c0_390] : memref<5x84x256xf32, #tpu.memory_space<vmem>>, vector<1x84x256xf32>
    %484 = vector.shape_cast %483 : vector<1x84x256xf32> to vector<84x256xf32>
    %cst_391 = arith.constant dense<0.000000e+00> : vector<16x256xf32>
    %485 = tpu.matmul %482, %484, %cst_391 {dimension_numbers = #tpu.dot_dimension_numbers<[1], [0], [0], [1], [0, 0, 1, 1], [], []>} : vector<16x84xf32>, vector<84x256xf32>, vector<16x256xf32> -> vector<16x256xf32>
    %486 = arith.addf %480, %485 : vector<16x256xf32>
    %c6_392 = arith.constant 6 : index
    %c0_393 = arith.constant 0 : index
    %c0_394 = arith.constant 0 : index
    %487 = vector.load %arg13[%c6_392, %c0_393, %c0_394] : memref<14x8x84xf32, #tpu.memory_space<vmem>>, vector<2x8x84xf32>
    %488 = vector.shape_cast %487 : vector<2x8x84xf32> to vector<16x84xf32>
    %c4_395 = arith.constant 4 : index
    %c0_396 = arith.constant 0 : index
    %c0_397 = arith.constant 0 : index
    %489 = vector.load %arg4[%c4_395, %c0_396, %c0_397] : memref<5x84x256xf32, #tpu.memory_space<vmem>>, vector<1x84x256xf32>
    %490 = vector.shape_cast %489 : vector<1x84x256xf32> to vector<84x256xf32>
    %cst_398 = arith.constant dense<0.000000e+00> : vector<16x256xf32>
    %491 = tpu.matmul %488, %490, %cst_398 {dimension_numbers = #tpu.dot_dimension_numbers<[1], [0], [0], [1], [0, 0, 1, 1], [], []>} : vector<16x84xf32>, vector<84x256xf32>, vector<16x256xf32> -> vector<16x256xf32>
    %492 = arith.addf %486, %491 : vector<16x256xf32>
    %493 = vector.extract_strided_slice %492 {offsets = [0, 0], sizes = [8, 256], strides = [1, 1]} : vector<16x256xf32> to vector<8x256xf32>
    %494 = vector.extract_strided_slice %492 {offsets = [8, 0], sizes = [8, 256], strides = [1, 1]} : vector<16x256xf32> to vector<8x256xf32>
    %495 = arith.maximumf %493, %494 : vector<8x256xf32>
    %496 = vector.extract_strided_slice %495 {offsets = [0, 0], sizes = [8, 80], strides = [1, 1]} : vector<8x256xf32> to vector<8x80xf32>
    %497 = vector.extract_strided_slice %495 {offsets = [0, 128], sizes = [8, 80], strides = [1, 1]} : vector<8x256xf32> to vector<8x80xf32>
    %498 = arith.maximumf %496, %497 : vector<8x80xf32>
    %499 = vector.broadcast %421 : vector<1x80xf32> to vector<8x80xf32>
    %500 = arith.addf %498, %499 : vector<8x80xf32>
    %cst_399 = arith.constant 0.000000e+00 : f32
    %501 = vector.broadcast %cst_399 : f32 to vector<8x80xf32>
    %502 = arith.maximumf %500, %501 : vector<8x80xf32>
    %c1_400 = arith.constant 1 : index
    %c0_401 = arith.constant 0 : index
    %c0_402 = arith.constant 0 : index
    %503 = vector.load %arg6[%c1_400, %c0_401, %c0_402] : memref<5x80x120xf32, #tpu.memory_space<vmem>>, vector<1x80x120xf32>
    %504 = vector.shape_cast %503 : vector<1x80x120xf32> to vector<80x120xf32>
    %cst_403 = arith.constant dense<0.000000e+00> : vector<8x120xf32>
    %505 = tpu.matmul %502, %504, %cst_403 {dimension_numbers = #tpu.dot_dimension_numbers<[1], [0], [0], [1], [0, 0, 1, 1], [], []>} : vector<8x80xf32>, vector<80x120xf32>, vector<8x120xf32> -> vector<8x120xf32>
    %506 = arith.addf %463, %505 : vector<8x120xf32>
    %c4_404 = arith.constant 4 : index
    %c0_405 = arith.constant 0 : index
    %c0_406 = arith.constant 0 : index
    %507 = vector.load %arg13[%c4_404, %c0_405, %c0_406] : memref<14x8x84xf32, #tpu.memory_space<vmem>>, vector<2x8x84xf32>
    %508 = vector.shape_cast %507 : vector<2x8x84xf32> to vector<16x84xf32>
    %c0_407 = arith.constant 0 : index
    %c0_408 = arith.constant 0 : index
    %c0_409 = arith.constant 0 : index
    %509 = vector.load %arg4[%c0_407, %c0_408, %c0_409] : memref<5x84x256xf32, #tpu.memory_space<vmem>>, vector<1x84x256xf32>
    %510 = vector.shape_cast %509 : vector<1x84x256xf32> to vector<84x256xf32>
    %cst_410 = arith.constant dense<0.000000e+00> : vector<16x256xf32>
    %511 = tpu.matmul %508, %510, %cst_410 {dimension_numbers = #tpu.dot_dimension_numbers<[1], [0], [0], [1], [0, 0, 1, 1], [], []>} : vector<16x84xf32>, vector<84x256xf32>, vector<16x256xf32> -> vector<16x256xf32>
    %c5_411 = arith.constant 5 : index
    %c0_412 = arith.constant 0 : index
    %c0_413 = arith.constant 0 : index
    %512 = vector.load %arg13[%c5_411, %c0_412, %c0_413] : memref<14x8x84xf32, #tpu.memory_space<vmem>>, vector<2x8x84xf32>
    %513 = vector.shape_cast %512 : vector<2x8x84xf32> to vector<16x84xf32>
    %c1_414 = arith.constant 1 : index
    %c0_415 = arith.constant 0 : index
    %c0_416 = arith.constant 0 : index
    %514 = vector.load %arg4[%c1_414, %c0_415, %c0_416] : memref<5x84x256xf32, #tpu.memory_space<vmem>>, vector<1x84x256xf32>
    %515 = vector.shape_cast %514 : vector<1x84x256xf32> to vector<84x256xf32>
    %cst_417 = arith.constant dense<0.000000e+00> : vector<16x256xf32>
    %516 = tpu.matmul %513, %515, %cst_417 {dimension_numbers = #tpu.dot_dimension_numbers<[1], [0], [0], [1], [0, 0, 1, 1], [], []>} : vector<16x84xf32>, vector<84x256xf32>, vector<16x256xf32> -> vector<16x256xf32>
    %517 = arith.addf %511, %516 : vector<16x256xf32>
    %c6_418 = arith.constant 6 : index
    %c0_419 = arith.constant 0 : index
    %c0_420 = arith.constant 0 : index
    %518 = vector.load %arg13[%c6_418, %c0_419, %c0_420] : memref<14x8x84xf32, #tpu.memory_space<vmem>>, vector<2x8x84xf32>
    %519 = vector.shape_cast %518 : vector<2x8x84xf32> to vector<16x84xf32>
    %c2_421 = arith.constant 2 : index
    %c0_422 = arith.constant 0 : index
    %c0_423 = arith.constant 0 : index
    %520 = vector.load %arg4[%c2_421, %c0_422, %c0_423] : memref<5x84x256xf32, #tpu.memory_space<vmem>>, vector<1x84x256xf32>
    %521 = vector.shape_cast %520 : vector<1x84x256xf32> to vector<84x256xf32>
    %cst_424 = arith.constant dense<0.000000e+00> : vector<16x256xf32>
    %522 = tpu.matmul %519, %521, %cst_424 {dimension_numbers = #tpu.dot_dimension_numbers<[1], [0], [0], [1], [0, 0, 1, 1], [], []>} : vector<16x84xf32>, vector<84x256xf32>, vector<16x256xf32> -> vector<16x256xf32>
    %523 = arith.addf %517, %522 : vector<16x256xf32>
    %c7_425 = arith.constant 7 : index
    %c0_426 = arith.constant 0 : index
    %c0_427 = arith.constant 0 : index
    %524 = vector.load %arg13[%c7_425, %c0_426, %c0_427] : memref<14x8x84xf32, #tpu.memory_space<vmem>>, vector<2x8x84xf32>
    %525 = vector.shape_cast %524 : vector<2x8x84xf32> to vector<16x84xf32>
    %c3_428 = arith.constant 3 : index
    %c0_429 = arith.constant 0 : index
    %c0_430 = arith.constant 0 : index
    %526 = vector.load %arg4[%c3_428, %c0_429, %c0_430] : memref<5x84x256xf32, #tpu.memory_space<vmem>>, vector<1x84x256xf32>
    %527 = vector.shape_cast %526 : vector<1x84x256xf32> to vector<84x256xf32>
    %cst_431 = arith.constant dense<0.000000e+00> : vector<16x256xf32>
    %528 = tpu.matmul %525, %527, %cst_431 {dimension_numbers = #tpu.dot_dimension_numbers<[1], [0], [0], [1], [0, 0, 1, 1], [], []>} : vector<16x84xf32>, vector<84x256xf32>, vector<16x256xf32> -> vector<16x256xf32>
    %529 = arith.addf %523, %528 : vector<16x256xf32>
    %c8_432 = arith.constant 8 : index
    %c0_433 = arith.constant 0 : index
    %c0_434 = arith.constant 0 : index
    %530 = vector.load %arg13[%c8_432, %c0_433, %c0_434] : memref<14x8x84xf32, #tpu.memory_space<vmem>>, vector<2x8x84xf32>
    %531 = vector.shape_cast %530 : vector<2x8x84xf32> to vector<16x84xf32>
    %c4_435 = arith.constant 4 : index
    %c0_436 = arith.constant 0 : index
    %c0_437 = arith.constant 0 : index
    %532 = vector.load %arg4[%c4_435, %c0_436, %c0_437] : memref<5x84x256xf32, #tpu.memory_space<vmem>>, vector<1x84x256xf32>
    %533 = vector.shape_cast %532 : vector<1x84x256xf32> to vector<84x256xf32>
    %cst_438 = arith.constant dense<0.000000e+00> : vector<16x256xf32>
    %534 = tpu.matmul %531, %533, %cst_438 {dimension_numbers = #tpu.dot_dimension_numbers<[1], [0], [0], [1], [0, 0, 1, 1], [], []>} : vector<16x84xf32>, vector<84x256xf32>, vector<16x256xf32> -> vector<16x256xf32>
    %535 = arith.addf %529, %534 : vector<16x256xf32>
    %536 = vector.extract_strided_slice %535 {offsets = [0, 0], sizes = [8, 256], strides = [1, 1]} : vector<16x256xf32> to vector<8x256xf32>
    %537 = vector.extract_strided_slice %535 {offsets = [8, 0], sizes = [8, 256], strides = [1, 1]} : vector<16x256xf32> to vector<8x256xf32>
    %538 = arith.maximumf %536, %537 : vector<8x256xf32>
    %539 = vector.extract_strided_slice %538 {offsets = [0, 0], sizes = [8, 80], strides = [1, 1]} : vector<8x256xf32> to vector<8x80xf32>
    %540 = vector.extract_strided_slice %538 {offsets = [0, 128], sizes = [8, 80], strides = [1, 1]} : vector<8x256xf32> to vector<8x80xf32>
    %541 = arith.maximumf %539, %540 : vector<8x80xf32>
    %542 = vector.broadcast %421 : vector<1x80xf32> to vector<8x80xf32>
    %543 = arith.addf %541, %542 : vector<8x80xf32>
    %cst_439 = arith.constant 0.000000e+00 : f32
    %544 = vector.broadcast %cst_439 : f32 to vector<8x80xf32>
    %545 = arith.maximumf %543, %544 : vector<8x80xf32>
    %c2_440 = arith.constant 2 : index
    %c0_441 = arith.constant 0 : index
    %c0_442 = arith.constant 0 : index
    %546 = vector.load %arg6[%c2_440, %c0_441, %c0_442] : memref<5x80x120xf32, #tpu.memory_space<vmem>>, vector<1x80x120xf32>
    %547 = vector.shape_cast %546 : vector<1x80x120xf32> to vector<80x120xf32>
    %cst_443 = arith.constant dense<0.000000e+00> : vector<8x120xf32>
    %548 = tpu.matmul %545, %547, %cst_443 {dimension_numbers = #tpu.dot_dimension_numbers<[1], [0], [0], [1], [0, 0, 1, 1], [], []>} : vector<8x80xf32>, vector<80x120xf32>, vector<8x120xf32> -> vector<8x120xf32>
    %549 = arith.addf %506, %548 : vector<8x120xf32>
    %c6_444 = arith.constant 6 : index
    %c0_445 = arith.constant 0 : index
    %c0_446 = arith.constant 0 : index
    %550 = vector.load %arg13[%c6_444, %c0_445, %c0_446] : memref<14x8x84xf32, #tpu.memory_space<vmem>>, vector<2x8x84xf32>
    %551 = vector.shape_cast %550 : vector<2x8x84xf32> to vector<16x84xf32>
    %c0_447 = arith.constant 0 : index
    %c0_448 = arith.constant 0 : index
    %c0_449 = arith.constant 0 : index
    %552 = vector.load %arg4[%c0_447, %c0_448, %c0_449] : memref<5x84x256xf32, #tpu.memory_space<vmem>>, vector<1x84x256xf32>
    %553 = vector.shape_cast %552 : vector<1x84x256xf32> to vector<84x256xf32>
    %cst_450 = arith.constant dense<0.000000e+00> : vector<16x256xf32>
    %554 = tpu.matmul %551, %553, %cst_450 {dimension_numbers = #tpu.dot_dimension_numbers<[1], [0], [0], [1], [0, 0, 1, 1], [], []>} : vector<16x84xf32>, vector<84x256xf32>, vector<16x256xf32> -> vector<16x256xf32>
    %c7_451 = arith.constant 7 : index
    %c0_452 = arith.constant 0 : index
    %c0_453 = arith.constant 0 : index
    %555 = vector.load %arg13[%c7_451, %c0_452, %c0_453] : memref<14x8x84xf32, #tpu.memory_space<vmem>>, vector<2x8x84xf32>
    %556 = vector.shape_cast %555 : vector<2x8x84xf32> to vector<16x84xf32>
    %c1_454 = arith.constant 1 : index
    %c0_455 = arith.constant 0 : index
    %c0_456 = arith.constant 0 : index
    %557 = vector.load %arg4[%c1_454, %c0_455, %c0_456] : memref<5x84x256xf32, #tpu.memory_space<vmem>>, vector<1x84x256xf32>
    %558 = vector.shape_cast %557 : vector<1x84x256xf32> to vector<84x256xf32>
    %cst_457 = arith.constant dense<0.000000e+00> : vector<16x256xf32>
    %559 = tpu.matmul %556, %558, %cst_457 {dimension_numbers = #tpu.dot_dimension_numbers<[1], [0], [0], [1], [0, 0, 1, 1], [], []>} : vector<16x84xf32>, vector<84x256xf32>, vector<16x256xf32> -> vector<16x256xf32>
    %560 = arith.addf %554, %559 : vector<16x256xf32>
    %c8_458 = arith.constant 8 : index
    %c0_459 = arith.constant 0 : index
    %c0_460 = arith.constant 0 : index
    %561 = vector.load %arg13[%c8_458, %c0_459, %c0_460] : memref<14x8x84xf32, #tpu.memory_space<vmem>>, vector<2x8x84xf32>
    %562 = vector.shape_cast %561 : vector<2x8x84xf32> to vector<16x84xf32>
    %c2_461 = arith.constant 2 : index
    %c0_462 = arith.constant 0 : index
    %c0_463 = arith.constant 0 : index
    %563 = vector.load %arg4[%c2_461, %c0_462, %c0_463] : memref<5x84x256xf32, #tpu.memory_space<vmem>>, vector<1x84x256xf32>
    %564 = vector.shape_cast %563 : vector<1x84x256xf32> to vector<84x256xf32>
    %cst_464 = arith.constant dense<0.000000e+00> : vector<16x256xf32>
    %565 = tpu.matmul %562, %564, %cst_464 {dimension_numbers = #tpu.dot_dimension_numbers<[1], [0], [0], [1], [0, 0, 1, 1], [], []>} : vector<16x84xf32>, vector<84x256xf32>, vector<16x256xf32> -> vector<16x256xf32>
    %566 = arith.addf %560, %565 : vector<16x256xf32>
    %c9_465 = arith.constant 9 : index
    %c0_466 = arith.constant 0 : index
    %c0_467 = arith.constant 0 : index
    %567 = vector.load %arg13[%c9_465, %c0_466, %c0_467] : memref<14x8x84xf32, #tpu.memory_space<vmem>>, vector<2x8x84xf32>
    %568 = vector.shape_cast %567 : vector<2x8x84xf32> to vector<16x84xf32>
    %c3_468 = arith.constant 3 : index
    %c0_469 = arith.constant 0 : index
    %c0_470 = arith.constant 0 : index
    %569 = vector.load %arg4[%c3_468, %c0_469, %c0_470] : memref<5x84x256xf32, #tpu.memory_space<vmem>>, vector<1x84x256xf32>
    %570 = vector.shape_cast %569 : vector<1x84x256xf32> to vector<84x256xf32>
    %cst_471 = arith.constant dense<0.000000e+00> : vector<16x256xf32>
    %571 = tpu.matmul %568, %570, %cst_471 {dimension_numbers = #tpu.dot_dimension_numbers<[1], [0], [0], [1], [0, 0, 1, 1], [], []>} : vector<16x84xf32>, vector<84x256xf32>, vector<16x256xf32> -> vector<16x256xf32>
    %572 = arith.addf %566, %571 : vector<16x256xf32>
    %c10_472 = arith.constant 10 : index
    %c0_473 = arith.constant 0 : index
    %c0_474 = arith.constant 0 : index
    %573 = vector.load %arg13[%c10_472, %c0_473, %c0_474] : memref<14x8x84xf32, #tpu.memory_space<vmem>>, vector<2x8x84xf32>
    %574 = vector.shape_cast %573 : vector<2x8x84xf32> to vector<16x84xf32>
    %c4_475 = arith.constant 4 : index
    %c0_476 = arith.constant 0 : index
    %c0_477 = arith.constant 0 : index
    %575 = vector.load %arg4[%c4_475, %c0_476, %c0_477] : memref<5x84x256xf32, #tpu.memory_space<vmem>>, vector<1x84x256xf32>
    %576 = vector.shape_cast %575 : vector<1x84x256xf32> to vector<84x256xf32>
    %cst_478 = arith.constant dense<0.000000e+00> : vector<16x256xf32>
    %577 = tpu.matmul %574, %576, %cst_478 {dimension_numbers = #tpu.dot_dimension_numbers<[1], [0], [0], [1], [0, 0, 1, 1], [], []>} : vector<16x84xf32>, vector<84x256xf32>, vector<16x256xf32> -> vector<16x256xf32>
    %578 = arith.addf %572, %577 : vector<16x256xf32>
    %579 = vector.extract_strided_slice %578 {offsets = [0, 0], sizes = [8, 256], strides = [1, 1]} : vector<16x256xf32> to vector<8x256xf32>
    %580 = vector.extract_strided_slice %578 {offsets = [8, 0], sizes = [8, 256], strides = [1, 1]} : vector<16x256xf32> to vector<8x256xf32>
    %581 = arith.maximumf %579, %580 : vector<8x256xf32>
    %582 = vector.extract_strided_slice %581 {offsets = [0, 0], sizes = [8, 80], strides = [1, 1]} : vector<8x256xf32> to vector<8x80xf32>
    %583 = vector.extract_strided_slice %581 {offsets = [0, 128], sizes = [8, 80], strides = [1, 1]} : vector<8x256xf32> to vector<8x80xf32>
    %584 = arith.maximumf %582, %583 : vector<8x80xf32>
    %585 = vector.broadcast %421 : vector<1x80xf32> to vector<8x80xf32>
    %586 = arith.addf %584, %585 : vector<8x80xf32>
    %cst_479 = arith.constant 0.000000e+00 : f32
    %587 = vector.broadcast %cst_479 : f32 to vector<8x80xf32>
    %588 = arith.maximumf %586, %587 : vector<8x80xf32>
    %c3_480 = arith.constant 3 : index
    %c0_481 = arith.constant 0 : index
    %c0_482 = arith.constant 0 : index
    %589 = vector.load %arg6[%c3_480, %c0_481, %c0_482] : memref<5x80x120xf32, #tpu.memory_space<vmem>>, vector<1x80x120xf32>
    %590 = vector.shape_cast %589 : vector<1x80x120xf32> to vector<80x120xf32>
    %cst_483 = arith.constant dense<0.000000e+00> : vector<8x120xf32>
    %591 = tpu.matmul %588, %590, %cst_483 {dimension_numbers = #tpu.dot_dimension_numbers<[1], [0], [0], [1], [0, 0, 1, 1], [], []>} : vector<8x80xf32>, vector<80x120xf32>, vector<8x120xf32> -> vector<8x120xf32>
    %592 = arith.addf %549, %591 : vector<8x120xf32>
    %c8_484 = arith.constant 8 : index
    %c0_485 = arith.constant 0 : index
    %c0_486 = arith.constant 0 : index
    %593 = vector.load %arg13[%c8_484, %c0_485, %c0_486] : memref<14x8x84xf32, #tpu.memory_space<vmem>>, vector<2x8x84xf32>
    %594 = vector.shape_cast %593 : vector<2x8x84xf32> to vector<16x84xf32>
    %c0_487 = arith.constant 0 : index
    %c0_488 = arith.constant 0 : index
    %c0_489 = arith.constant 0 : index
    %595 = vector.load %arg4[%c0_487, %c0_488, %c0_489] : memref<5x84x256xf32, #tpu.memory_space<vmem>>, vector<1x84x256xf32>
    %596 = vector.shape_cast %595 : vector<1x84x256xf32> to vector<84x256xf32>
    %cst_490 = arith.constant dense<0.000000e+00> : vector<16x256xf32>
    %597 = tpu.matmul %594, %596, %cst_490 {dimension_numbers = #tpu.dot_dimension_numbers<[1], [0], [0], [1], [0, 0, 1, 1], [], []>} : vector<16x84xf32>, vector<84x256xf32>, vector<16x256xf32> -> vector<16x256xf32>
    %c9_491 = arith.constant 9 : index
    %c0_492 = arith.constant 0 : index
    %c0_493 = arith.constant 0 : index
    %598 = vector.load %arg13[%c9_491, %c0_492, %c0_493] : memref<14x8x84xf32, #tpu.memory_space<vmem>>, vector<2x8x84xf32>
    %599 = vector.shape_cast %598 : vector<2x8x84xf32> to vector<16x84xf32>
    %c1_494 = arith.constant 1 : index
    %c0_495 = arith.constant 0 : index
    %c0_496 = arith.constant 0 : index
    %600 = vector.load %arg4[%c1_494, %c0_495, %c0_496] : memref<5x84x256xf32, #tpu.memory_space<vmem>>, vector<1x84x256xf32>
    %601 = vector.shape_cast %600 : vector<1x84x256xf32> to vector<84x256xf32>
    %cst_497 = arith.constant dense<0.000000e+00> : vector<16x256xf32>
    %602 = tpu.matmul %599, %601, %cst_497 {dimension_numbers = #tpu.dot_dimension_numbers<[1], [0], [0], [1], [0, 0, 1, 1], [], []>} : vector<16x84xf32>, vector<84x256xf32>, vector<16x256xf32> -> vector<16x256xf32>
    %603 = arith.addf %597, %602 : vector<16x256xf32>
    %c10_498 = arith.constant 10 : index
    %c0_499 = arith.constant 0 : index
    %c0_500 = arith.constant 0 : index
    %604 = vector.load %arg13[%c10_498, %c0_499, %c0_500] : memref<14x8x84xf32, #tpu.memory_space<vmem>>, vector<2x8x84xf32>
    %605 = vector.shape_cast %604 : vector<2x8x84xf32> to vector<16x84xf32>
    %c2_501 = arith.constant 2 : index
    %c0_502 = arith.constant 0 : index
    %c0_503 = arith.constant 0 : index
    %606 = vector.load %arg4[%c2_501, %c0_502, %c0_503] : memref<5x84x256xf32, #tpu.memory_space<vmem>>, vector<1x84x256xf32>
    %607 = vector.shape_cast %606 : vector<1x84x256xf32> to vector<84x256xf32>
    %cst_504 = arith.constant dense<0.000000e+00> : vector<16x256xf32>
    %608 = tpu.matmul %605, %607, %cst_504 {dimension_numbers = #tpu.dot_dimension_numbers<[1], [0], [0], [1], [0, 0, 1, 1], [], []>} : vector<16x84xf32>, vector<84x256xf32>, vector<16x256xf32> -> vector<16x256xf32>
    %609 = arith.addf %603, %608 : vector<16x256xf32>
    %c11_505 = arith.constant 11 : index
    %c0_506 = arith.constant 0 : index
    %c0_507 = arith.constant 0 : index
    %610 = vector.load %arg13[%c11_505, %c0_506, %c0_507] : memref<14x8x84xf32, #tpu.memory_space<vmem>>, vector<2x8x84xf32>
    %611 = vector.shape_cast %610 : vector<2x8x84xf32> to vector<16x84xf32>
    %c3_508 = arith.constant 3 : index
    %c0_509 = arith.constant 0 : index
    %c0_510 = arith.constant 0 : index
    %612 = vector.load %arg4[%c3_508, %c0_509, %c0_510] : memref<5x84x256xf32, #tpu.memory_space<vmem>>, vector<1x84x256xf32>
    %613 = vector.shape_cast %612 : vector<1x84x256xf32> to vector<84x256xf32>
    %cst_511 = arith.constant dense<0.000000e+00> : vector<16x256xf32>
    %614 = tpu.matmul %611, %613, %cst_511 {dimension_numbers = #tpu.dot_dimension_numbers<[1], [0], [0], [1], [0, 0, 1, 1], [], []>} : vector<16x84xf32>, vector<84x256xf32>, vector<16x256xf32> -> vector<16x256xf32>
    %615 = arith.addf %609, %614 : vector<16x256xf32>
    %c12_512 = arith.constant 12 : index
    %c0_513 = arith.constant 0 : index
    %c0_514 = arith.constant 0 : index
    %616 = vector.load %arg13[%c12_512, %c0_513, %c0_514] : memref<14x8x84xf32, #tpu.memory_space<vmem>>, vector<2x8x84xf32>
    %617 = vector.shape_cast %616 : vector<2x8x84xf32> to vector<16x84xf32>
    %c4_515 = arith.constant 4 : index
    %c0_516 = arith.constant 0 : index
    %c0_517 = arith.constant 0 : index
    %618 = vector.load %arg4[%c4_515, %c0_516, %c0_517] : memref<5x84x256xf32, #tpu.memory_space<vmem>>, vector<1x84x256xf32>
    %619 = vector.shape_cast %618 : vector<1x84x256xf32> to vector<84x256xf32>
    %cst_518 = arith.constant dense<0.000000e+00> : vector<16x256xf32>
    %620 = tpu.matmul %617, %619, %cst_518 {dimension_numbers = #tpu.dot_dimension_numbers<[1], [0], [0], [1], [0, 0, 1, 1], [], []>} : vector<16x84xf32>, vector<84x256xf32>, vector<16x256xf32> -> vector<16x256xf32>
    %621 = arith.addf %615, %620 : vector<16x256xf32>
    %622 = vector.extract_strided_slice %621 {offsets = [0, 0], sizes = [8, 256], strides = [1, 1]} : vector<16x256xf32> to vector<8x256xf32>
    %623 = vector.extract_strided_slice %621 {offsets = [8, 0], sizes = [8, 256], strides = [1, 1]} : vector<16x256xf32> to vector<8x256xf32>
    %624 = arith.maximumf %622, %623 : vector<8x256xf32>
    %625 = vector.extract_strided_slice %624 {offsets = [0, 0], sizes = [8, 80], strides = [1, 1]} : vector<8x256xf32> to vector<8x80xf32>
    %626 = vector.extract_strided_slice %624 {offsets = [0, 128], sizes = [8, 80], strides = [1, 1]} : vector<8x256xf32> to vector<8x80xf32>
    %627 = arith.maximumf %625, %626 : vector<8x80xf32>
    %628 = vector.broadcast %421 : vector<1x80xf32> to vector<8x80xf32>
    %629 = arith.addf %627, %628 : vector<8x80xf32>
    %cst_519 = arith.constant 0.000000e+00 : f32
    %630 = vector.broadcast %cst_519 : f32 to vector<8x80xf32>
    %631 = arith.maximumf %629, %630 : vector<8x80xf32>
    %c4_520 = arith.constant 4 : index
    %c0_521 = arith.constant 0 : index
    %c0_522 = arith.constant 0 : index
    %632 = vector.load %arg6[%c4_520, %c0_521, %c0_522] : memref<5x80x120xf32, #tpu.memory_space<vmem>>, vector<1x80x120xf32>
    %633 = vector.shape_cast %632 : vector<1x80x120xf32> to vector<80x120xf32>
    %cst_523 = arith.constant dense<0.000000e+00> : vector<8x120xf32>
    %634 = tpu.matmul %631, %633, %cst_523 {dimension_numbers = #tpu.dot_dimension_numbers<[1], [0], [0], [1], [0, 0, 1, 1], [], []>} : vector<8x80xf32>, vector<80x120xf32>, vector<8x120xf32> -> vector<8x120xf32>
    %635 = arith.addf %592, %634 : vector<8x120xf32>
    %c0_524 = arith.constant 0 : index
    %c0_525 = arith.constant 0 : index
    %636 = vector.load %arg7[%c0_524, %c0_525] : memref<1x120xf32, #tpu.memory_space<vmem>>, vector<1x120xf32>
    %637 = vector.broadcast %636 : vector<1x120xf32> to vector<8x120xf32>
    %638 = arith.addf %635, %637 : vector<8x120xf32>
    %cst_526 = arith.constant 0.000000e+00 : f32
    %639 = vector.broadcast %cst_526 : f32 to vector<8x120xf32>
    %640 = arith.maximumf %638, %639 : vector<8x120xf32>
    %c0_527 = arith.constant 0 : index
    %c0_528 = arith.constant 0 : index
    %641 = vector.load %arg8[%c0_527, %c0_528] : memref<120x84xf32, #tpu.memory_space<vmem>>, vector<120x84xf32>
    %cst_529 = arith.constant dense<0.000000e+00> : vector<8x84xf32>
    %642 = tpu.matmul %640, %641, %cst_529 {dimension_numbers = #tpu.dot_dimension_numbers<[1], [0], [0], [1], [0, 0, 1, 1], [], []>} : vector<8x120xf32>, vector<120x84xf32>, vector<8x84xf32> -> vector<8x84xf32>
    %c0_530 = arith.constant 0 : index
    %c0_531 = arith.constant 0 : index
    %643 = vector.load %arg9[%c0_530, %c0_531] : memref<1x84xf32, #tpu.memory_space<vmem>>, vector<1x84xf32>
    %644 = vector.broadcast %643 : vector<1x84xf32> to vector<8x84xf32>
    %645 = arith.addf %642, %644 : vector<8x84xf32>
    %cst_532 = arith.constant 0.000000e+00 : f32
    %646 = vector.broadcast %cst_532 : f32 to vector<8x84xf32>
    %647 = arith.maximumf %645, %646 : vector<8x84xf32>
    %c0_533 = arith.constant 0 : index
    %c0_534 = arith.constant 0 : index
    %648 = vector.load %arg10[%c0_533, %c0_534] : memref<84x10xf32, #tpu.memory_space<vmem>>, vector<84x10xf32>
    %cst_535 = arith.constant dense<0.000000e+00> : vector<8x10xf32>
    %649 = tpu.matmul %647, %648, %cst_535 {dimension_numbers = #tpu.dot_dimension_numbers<[1], [0], [0], [1], [0, 0, 1, 1], [], []>} : vector<8x84xf32>, vector<84x10xf32>, vector<8x10xf32> -> vector<8x10xf32>
    %c0_536 = arith.constant 0 : index
    %c0_537 = arith.constant 0 : index
    %650 = vector.load %arg11[%c0_536, %c0_537] : memref<1x10xf32, #tpu.memory_space<vmem>>, vector<1x10xf32>
    %651 = vector.broadcast %650 : vector<1x10xf32> to vector<8x10xf32>
    %652 = arith.addf %649, %651 : vector<8x10xf32>
    %c0_538 = arith.constant 0 : index
    %c0_539 = arith.constant 0 : index
    %653 = vector.load %arg12[%c0_538, %c0_539] : memref<8x10xf32, #tpu.memory_space<vmem>>, vector<8x10xf32>
    tpu.vector_store %arg12[%c0_538, %c0_539], %652 {strides = array<i32>} : memref<8x10xf32, #tpu.memory_space<vmem>>, vector<8x10xf32>,
    return
  }
  func.func @transform_0(%arg0: i32) -> (i32, i32, i32) {
    %c0_i32 = arith.constant 0 : i32
    %c0_i32_0 = arith.constant 0 : i32
    %c0_i32_1 = arith.constant 0 : i32
    return %c0_i32, %arg0, %c0_i32_0 : i32, i32, i32
  }
  func.func @transform_1(%arg0: i32) -> (i32, i32, i32) {
    %c0_i32 = arith.constant 0 : i32
    %c0_i32_0 = arith.constant 0 : i32
    %c0_i32_1 = arith.constant 0 : i32
    %c0_i32_2 = arith.constant 0 : i32
    return %c0_i32, %c0_i32_0, %c0_i32_1 : i32, i32, i32
  }
  func.func @transform_2(%arg0: i32) -> (i32, i32) {
    %c0_i32 = arith.constant 0 : i32
    %c0_i32_0 = arith.constant 0 : i32
    %c0_i32_1 = arith.constant 0 : i32
    return %c0_i32, %c0_i32_0 : i32, i32
  }
  func.func @transform_3(%arg0: i32) -> (i32, i32, i32) {
    %c0_i32 = arith.constant 0 : i32
    %c0_i32_0 = arith.constant 0 : i32
    %c0_i32_1 = arith.constant 0 : i32
    %c0_i32_2 = arith.constant 0 : i32
    return %c0_i32, %c0_i32_0, %c0_i32_1 : i32, i32, i32
  }
  func.func @transform_4(%arg0: i32) -> (i32, i32) {
    %c0_i32 = arith.constant 0 : i32
    %c0_i32_0 = arith.constant 0 : i32
    %c0_i32_1 = arith.constant 0 : i32
    return %c0_i32, %c0_i32_0 : i32, i32
  }
  func.func @transform_5(%arg0: i32) -> (i32, i32, i32) {
    %c0_i32 = arith.constant 0 : i32
    %c0_i32_0 = arith.constant 0 : i32
    %c0_i32_1 = arith.constant 0 : i32
    %c0_i32_2 = arith.constant 0 : i32
    return %c0_i32, %c0_i32_0, %c0_i32_1 : i32, i32, i32
  }
  func.func @transform_6(%arg0: i32) -> (i32, i32) {
    %c0_i32 = arith.constant 0 : i32
    %c0_i32_0 = arith.constant 0 : i32
    %c0_i32_1 = arith.constant 0 : i32
    return %c0_i32, %c0_i32_0 : i32, i32
  }
  func.func @transform_7(%arg0: i32) -> (i32, i32) {
    %c0_i32 = arith.constant 0 : i32
    %c0_i32_0 = arith.constant 0 : i32
    %c0_i32_1 = arith.constant 0 : i32
    return %c0_i32, %c0_i32_0 : i32, i32
  }
  func.func @transform_8(%arg0: i32) -> (i32, i32) {
    %c0_i32 = arith.constant 0 : i32
    %c0_i32_0 = arith.constant 0 : i32
    %c0_i32_1 = arith.constant 0 : i32
    return %c0_i32, %c0_i32_0 : i32, i32
  }
  func.func @transform_9(%arg0: i32) -> (i32, i32) {
    %c0_i32 = arith.constant 0 : i32
    %c0_i32_0 = arith.constant 0 : i32
    %c0_i32_1 = arith.constant 0 : i32
    return %c0_i32, %c0_i32_0 : i32, i32
  }
  func.func @transform_10(%arg0: i32) -> (i32, i32) {
    %c0_i32 = arith.constant 0 : i32
    %c0_i32_0 = arith.constant 0 : i32
    %c0_i32_1 = arith.constant 0 : i32
    return %c0_i32, %c0_i32_0 : i32, i32
  }
  func.func @transform_11(%arg0: i32) -> (i32, i32) {
    %c0_i32 = arith.constant 0 : i32
    %c0_i32_0 = arith.constant 0 : i32
    return %arg0, %c0_i32 : i32, i32
  }
}

</mosaic_0001>

<bundles_post_ra>
// kernel: forward.1
= control target key start
LH: loop header
LB: loop body
LE: loop exit
PB: predicated region body
PF: predicated region fallthrough
CT: control target
= control target key end

     0   :  { %16 = vsyncpa [#allocation4], 0  ;;  %s8325_s17 = smov [#allocation3]   ;;  %s11078_s0 = inlined_call_operand.vmem [shape: f32[30,8,30], index: 0, kind: input, shape index: {}]   ;;  %s11079_s1 = inlined_call_operand.vmem [shape: f32[3,30,256], index: 1, kind: input, shape index: {}]   ;;  %s11080_s2 = inlined_call_operand.vmem [shape: f32[1,84], index: 2, kind: input, shape index: {}]   ;;  %s11081_s3 = inlined_call_operand.hbm [shape: f32[5,84,256], index: 3, kind: input, shape index: {}]   ;;  %s11082_s4 = inlined_call_operand.vmem [shape: f32[1,80], index: 4, kind: input, shape index: {}]   ;;  %s11083_s5 = inlined_call_operand.vmem [shape: f32[5,80,120], index: 5, kind: input, shape index: {}]   ;;  %s11084_s6 = inlined_call_operand.vmem [shape: f32[1,120], index: 6, kind: input, shape index: {}]   ;;  %s11085_s7 = inlined_call_operand.vmem [shape: f32[120,84], index: 7, kind: input, shape index: {}]   ;;  %s11086_s8 = inlined_call_operand.vmem [shape: f32[1,84], index: 8, kind: input, shape index: {}]   ;;  %s11087_s9 = inlined_call_operand.vmem [shape: f32[84,10], index: 9, kind: input, shape index: {}]   ;;  %s11088_s10 = inlined_call_operand.vmem [shape: f32[1,10], index: 10, kind: input, shape index: {}]   ;;  %s11089_s11 = inlined_call_operand.vmem [shape: f32[8,10], index: 11, kind: output, shape index: {}]  }
   0x1   :  { %s28_s18 = sshll.u32 %s8325_s17, 4  ;;  %s29_s18 = int_to_ptr.vmem [resolvable:$true] %s28_s18 }
   0x2   :  { %s8311_s19 = scalar_lea.vmem %s29_s18, 14080  ;;  %p8316_p1 = scmp.lt.s32.totalorder %s29_s18, %s29_s18 }
   0x3   :  { %p8312_p0 = scmp.ne.s32.totalorder %s29_s18, %s8311_s19  ;;  %p8317_p2 = scmp.lt.s32.totalorder %s8311_s19, %s8311_s19 }
   0x5   :  { %p8318_p3 = por %p8317_p2, %p8316_p1 }
   0x7   :  { %p8319_p4 = pnand %p8318_p3, %p8312_p0 }
   0x9   :  { %8322 = shalt.err (!%p8319_p4)
}
   0xa   :  { %s8326_s20 = smov 256   ;;  %s8327_s21 = smov 16  }
   0xb   :  { %34 = dma.hbm_to_vmem [thread:$0]  %s11081_s3, 14080, %s29_s18, [#allocation4], %s8326_s20, %s8326_s20, %s8327_s21  }
   0xc   :  { %8323 = dma.done.wait [#allocation4], 14080  }
   0xd   :  { %8324 = vsyncadd [#allocation4], 4294953216  ;;  %v11090_v0 = vmov 0.0   ;;  %vm82_vm0 = vcmask 1045504   ;;  %v7308_v1 = vld [vmem:[%s11079_s1 + $0x78] sm:$0x3f] }
   0xe   :  { %153 = vmatprep.mubr.f32.mxu0 %v11090_v0  ;;  %242 = vmatprep.mubr.f32.mxu1 %v11090_v0  ;;  %v62_v2 = vld [vmem:[%s11079_s1 + $0x38] sm:$0x3f]  ;;  %v7307_v3 = vld [vmem:[%s11079_s1 + $0x70] sm:$0x3f]  ;;  %v8412_v5 = vld [vmem:[%s11079_s1 + $0x68] sm:$0xff]  ;;  %vm75_vm1 = vcmask 244736  }
   0xf   :  { %7309 = vmatprep.subr.msk.mxu0 %vm82_vm0, %v7308_v1  ;;  %7313 = vmatprep.subr.msk.mxu1 %vm82_vm0, %v62_v2  ;;  %v61_v4 = vld [vmem:[%s11079_s1 + $0x30] sm:$0x3f]  ;;  %v8417_v6 = vld [vmem:[%s11079_s1 + $0x28] sm:$0xff]  ;;  %v8424_v7 = vld [vmem:[%s11079_s1 + $0x60] sm:$0xff]  ;;  %vm371_vm2 = vcmask 687104   ;;  %vm4459_vm3 = vcmask 1043456  }
  0x10   :  { %7310 = vmatpush1.msk.msra.mxu0 %vm82_vm0, %v7307_v3  ;;  %7314 = vmatpush1.msk.msra.mxu1 %vm82_vm0, %v61_v4  ;;  %v8429_v8 = vld [vmem:[%s11079_s1 + $0x20] sm:$0xff]  ;;  %v8434_v9 = vld [vmem:[%s11079_s1 + $0x58] sm:$0xff]  ;;  %v8446_v11 = vld [vmem:[%s11079_s1 + $0x50] sm:$0xff]  ;;  %vm8329_vm4 = vmmov 0   ;;  %vm5436_vm5 = vcmask 654336   ;;  %vm7123_vm6 = vcmask 982016  }
  0x11   :  { %115 = vmatprep.subr.mxu0 %v8412_v5  ;;  %204 = vmatprep.subr.mxu1 %v8417_v6  ;;  %v8441_v10 = vld [vmem:[%s11079_s1 + $0x18] sm:$0xff]  ;;  %v8451_v12 = vld [vmem:[%s11079_s1 + $0x10] sm:$0xff]  ;;  %v8458_v13 = vld [vmem:[%s11079_s1 + $0x48] sm:$0xff]  ;;  %vm7292_vm7 = vcmask 80896  }
  0x12   :  { %116 = vmatpush1.msra.mxu0 %v8424_v7  ;;  %205 = vmatpush1.msra.mxu1 %v8429_v8  ;;  %v8463_v14 = vld [vmem:[%s11079_s1 + $0x8] sm:$0xff]  ;;  %v8470_v15 = vld [vmem:[%s11079_s1 + $0x40] sm:$0xff]  ;;  %v7326_v19 = vld [vmem:[%s11079_s1 + $0xb8] sm:$0x3f] }
  0x13   :  { %117 = vmatprep.subr.mxu0 %v8434_v9  ;;  %206 = vmatprep.subr.mxu1 %v8441_v10  ;;  %v8475_v16 = vld [vmem:[%s11079_s1] sm:$0xff]  ;;  %v7299_v17 = vld [vmem:[%s11078_s0 + $0x8] sm:$0xff]  ;;  %v7343_v20 = vld [vmem:[%s11079_s1 + $0x78] sm:$0x3f] }
  0x14   :  { %118 = vmatpush1.msra.mxu0 %v8446_v11  ;;  %207 = vmatpush1.msra.mxu1 %v8451_v12  ;;  %v53_v18 = vld [vmem:[%s11078_s0] sm:$0xff]  ;;  %v7325_v21 = vld [vmem:[%s11079_s1 + $0xb0] sm:$0x3f]  ;;  %v8506_v23 = vld [vmem:[%s11079_s1 + $0xa8] sm:$0xff] }
  0x15   :  { %119 = vmatprep.subr.mxu0 %v8458_v13  ;;  %208 = vmatprep.subr.mxu1 %v8463_v14  ;;  %v7342_v22 = vld [vmem:[%s11079_s1 + $0x70] sm:$0x3f]  ;;  %v8515_v24 = vld [vmem:[%s11079_s1 + $0xa0] sm:$0xff]  ;;  %v8527_v26 = vld [vmem:[%s11079_s1 + $0x98] sm:$0xff] }
  0x16   :  { %120 = vmatpush1.msra.mxu0 %v8470_v15  ;;  %209 = vmatpush1.msra.mxu1 %v8475_v16  ;;  %v7300_v25 = vld [vmem:[%s11078_s0 + $0x10] sm:$0xff]  ;;  %v8541_v28 = vld [vmem:[%s11079_s1 + $0x88] sm:$0xff]  ;;  %v8548_v29 = vld [vmem:[%s11079_s1 + $0x80] sm:$0xff] }
  0x17   :  { %7311 = vmatmul.mubr.msk.f32.vlgmr.msra.gmra.mxu0 %vm75_vm1, %v7299_v17  ;;  %7315 = vmatmul.mubr.msk.f32.vlgmr.msra.gmra.mxu1 %vm75_vm1, %v53_v18  ;;  %v8534_v27 = vld [vmem:[%s11079_s1 + $0x90] sm:$0xff]  ;;  %v7334_v30 = vld [vmem:[%s11078_s0 + $0x18] sm:$0xff]  ;;  %v7335_v35 = vld [vmem:[%s11078_s0 + $0x20] sm:$0xff] }
  0x18   :  { %7327 = vmatprep.subr.msk.mxu0 %vm82_vm0, %v7326_v19  ;;  %7344 = vmatprep.subr.msk.mxu1 %vm82_vm0, %v7343_v20  ;;  %v382_v31 = vld [vmem:[%s11079_s1 + $0x38] sm:$0x3f]  ;;  %v381_v33 = vld [vmem:[%s11079_s1 + $0x30] sm:$0x3f]  ;;  %v7353_v40 = vld [vmem:[%s11078_s0 + $0x28] sm:$0xff] }
  0x19   :  { %7328 = vmatpush1.msk.msra.mxu0 %vm82_vm0, %v7325_v21  ;;  %7345 = vmatpush1.msk.msra.mxu1 %vm82_vm0, %v7342_v22  ;;  %v7361_v32 = vld [vmem:[%s11079_s1 + $0xb8] sm:$0x3f]  ;;  %v7360_v34 = vld [vmem:[%s11079_s1 + $0xb0] sm:$0x3f]  ;;  %v7403_v51 = vld [vmem:[%s11078_s0 + $0x40] sm:$0xff] }
  0x1a   :  { %305 = vmatprep.subr.mxu0 %v8506_v23  ;;  %432 = vmatprep.subr.mxu1 %v8412_v5  ;;  %v7377_v36 = vld [vmem:[%s11079_s1 + $0x78] sm:$0x3f]  ;;  %v7376_v38 = vld [vmem:[%s11079_s1 + $0x70] sm:$0x3f]  ;;  %v7421_v56 = vld [vmem:[%s11078_s0 + $0x48] sm:$0xff] }
  0x1b   :  { %159 = vmatprep.mubr.f32.mxu0 %v11090_v0  ;;  %248 = vmatprep.mubr.f32.mxu1 %v11090_v0  ;;  %v692_v37 = vld [vmem:[%s11079_s1 + $0x38] sm:$0x3f]  ;;  %v691_v39 = vld [vmem:[%s11079_s1 + $0x30] sm:$0x3f]  ;;  %v7471_v4 = vld [vmem:[%s11078_s0 + $0x60] sm:$0xff] }
  0x1c   :  { %306 = vmatpush1.msra.mxu0 %v8515_v24  ;;  %433 = vmatpush1.msra.mxu1 %v8424_v7  ;;  %v7395_v41 = vld [vmem:[%s11079_s1 + $0xb8] sm:$0x3f]  ;;  %v7394_v43 = vld [vmem:[%s11079_s1 + $0xb0] sm:$0x3f]  ;;  %v7489_v21 = vld [vmem:[%s11078_s0 + $0x68] sm:$0xff] }
  0x1d   :  { %7312 = vmatmul.mubr.msk.f32.gmra.mxu0 %vm75_vm1, %v7300_v25  ;;  %7316 = vmatmul.mubr.msk.f32.gmra.mxu1 %vm75_vm1, %v7299_v17  ;;  %v7411_v42 = vld [vmem:[%s11079_s1 + $0x78] sm:$0x3f]  ;;  %v7410_v44 = vld [vmem:[%s11079_s1 + $0x70] sm:$0x3f] }
  0x1e   :  { %307 = vmatprep.subr.mxu0 %v8527_v26  ;;  %434 = vmatprep.subr.mxu1 %v8434_v9  ;;  %v7369_v45 = vld [vmem:[%s11078_s0 + $0x30] sm:$0xff]  ;;  %v1002_v46 = vld [vmem:[%s11079_s1 + $0x38] sm:$0x3f] }
  0x1f   :  { %308 = vmatpush1.msra.mxu0 %v8534_v27  ;;  %435 = vmatpush1.msra.mxu1 %v8446_v11  ;;  %v7402_v47 = vld [vmem:[%s11078_s0 + $0x38] sm:$0xff]  ;;  %v1001_v48 = vld [vmem:[%s11079_s1 + $0x30] sm:$0x3f] }
  0x20   :  { %309 = vmatprep.subr.mxu0 %v8541_v28  ;;  %436 = vmatprep.subr.mxu1 %v8458_v13  ;;  %v7429_v49 = vld [vmem:[%s11079_s1 + $0xb8] sm:$0x3f]  ;;  %v7428_v50 = vld [vmem:[%s11079_s1 + $0xb0] sm:$0x3f] }
  0x21   :  { %310 = vmatpush1.msra.mxu0 %v8548_v29  ;;  %343 = vmatprep.mubr.f32.mxu0 %v11090_v0  ;;  %v7445_v52 = vld [vmem:[%s11079_s1 + $0x78] sm:$0x3f]  ;;  %v7444_v53 = vld [vmem:[%s11079_s1 + $0x70] sm:$0x3f] }
  0x22   :  { %437 = vmatpush1.msra.mxu1 %v8470_v15  ;;  %470 = vmatprep.mubr.f32.mxu1 %v11090_v0  ;;  %v1312_v54 = vld [vmem:[%s11079_s1 + $0x38] sm:$0x3f]  ;;  %v1311_v55 = vld [vmem:[%s11079_s1 + $0x30] sm:$0x3f] }
  0x23   :  { %7329 = vmatmul.mubr.msk.f32.vlgmr.msra.gmra.mxu0 %vm75_vm1, %v7300_v25  ;;  %7346 = vmatmul.mubr.msk.f32.vlgmr.msra.gmra.mxu1 %vm75_vm1, %v7334_v30  ;;  %v7463_v57 = vld [vmem:[%s11079_s1 + $0xb8] sm:$0x3f]  ;;  %v7462_v58 = vld [vmem:[%s11079_s1 + $0xb0] sm:$0x3f] }
  0x24   :  { %7348 = vmatprep.subr.msk.mxu0 %vm82_vm0, %v382_v31  ;;  %7362 = vmatprep.subr.msk.mxu1 %vm82_vm0, %v7361_v32  ;;  %v7479_v59 = vld [vmem:[%s11079_s1 + $0x78] sm:$0x3f]  ;;  %v7478_v60 = vld [vmem:[%s11079_s1 + $0x70] sm:$0x3f] }
  0x25   :  { %7349 = vmatpush1.msk.msra.mxu0 %vm82_vm0, %v381_v33  ;;  %7363 = vmatpush1.msk.msra.mxu1 %vm82_vm0, %v7360_v34  ;;  %v7437_v61 = vld [vmem:[%s11078_s0 + $0x50] sm:$0xff]  ;;  %v1622_v62 = vld [vmem:[%s11079_s1 + $0x38] sm:$0x3f] }
  0x26   :  { %521 = vmatprep.subr.mxu0 %v8417_v6  ;;  %621 = vmatprep.subr.mxu1 %v8506_v23  ;;  %v1621_v63 = vld [vmem:[%s11079_s1 + $0x30] sm:$0x3f]  ;;  %v7470_v1 = vld [vmem:[%s11078_s0 + $0x58] sm:$0xff] }
  0x27   :  { %349 = vmatprep.mubr.f32.mxu0 %v11090_v0  ;;  %476 = vmatprep.mubr.f32.mxu1 %v11090_v0  ;;  %v7497_v2 = vld [vmem:[%s11079_s1 + $0xb8] sm:$0x3f]  ;;  %v7496_v3 = vld [vmem:[%s11079_s1 + $0xb0] sm:$0x3f] }
  0x28   :  { %522 = vmatpush1.msra.mxu0 %v8429_v8  ;;  %622 = vmatpush1.msra.mxu1 %v8515_v24  ;;  %v7513_v17 = vld [vmem:[%s11079_s1 + $0x78] sm:$0x3f]  ;;  %v7512_v18 = vld [vmem:[%s11079_s1 + $0x70] sm:$0x3f] }
  0x29   :  { %7330 = vmatmul.mubr.msk.f32.gmra.mxu0 %vm75_vm1, %v7334_v30  ;;  %7347 = vmatmul.mubr.msk.f32.gmra.mxu1 %vm75_vm1, %v7335_v35  ;;  %v1932_v19 = vld [vmem:[%s11079_s1 + $0x38] sm:$0x3f]  ;;  %v1931_v20 = vld [vmem:[%s11079_s1 + $0x30] sm:$0x3f] }
  0x2a   :  { %523 = vmatprep.subr.mxu0 %v8441_v10  ;;  %623 = vmatprep.subr.mxu1 %v8527_v26  ;;  %v7531_v22 = vld [vmem:[%s11079_s1 + $0xb8] sm:$0x3f]  ;;  %v7546_v31 = vld [vmem:[%s11079_s1 + $0x70] sm:$0x3f] }
  0x2b   :  { %524 = vmatpush1.msra.mxu0 %v8451_v12  ;;  %624 = vmatpush1.msra.mxu1 %v8534_v27  ;;  %v7505_v32 = vld [vmem:[%s11078_s0 + $0x70] sm:$0xff]  ;;  %v2242_v33 = vld [vmem:[%s11079_s1 + $0x38] sm:$0x3f] }
  0x2c   :  { %525 = vmatprep.subr.mxu0 %v8463_v14  ;;  %625 = vmatprep.subr.mxu1 %v8541_v28  ;;  %v9036_v34 = vld [vmem:[%s11079_s1 + $0x10] sm:$0xff] }
  0x2d   :  { %526 = vmatpush1.msra.mxu0 %v8475_v16  ;;  %559 = vmatprep.mubr.f32.mxu0 %v11090_v0 }
  0x2e   :  { %626 = vmatpush1.msra.mxu1 %v8548_v29  ;;  %659 = vmatprep.mubr.f32.mxu1 %v11090_v0 }
  0x2f   :  { %7350 = vmatmul.mubr.msk.f32.vlgmr.msra.gmra.mxu0 %vm75_vm1, %v7300_v25  ;;  %7364 = vmatmul.mubr.msk.f32.vlgmr.msra.gmra.mxu1 %vm75_vm1, %v7335_v35  ;;  %v7530_v25 = vld [vmem:[%s11079_s1 + $0xb0] sm:$0x3f] }
  0x30   :  { %7378 = vmatprep.subr.msk.mxu0 %vm82_vm0, %v7377_v36  ;;  %7382 = vmatprep.subr.msk.mxu1 %vm82_vm0, %v692_v37  ;;  %v9048_v36 = vld [vmem:[%s11079_s1 + $0x8] sm:$0xff]  ;;  %v9055_v37 = vld [vmem:[%s11079_s1] sm:$0xff] }
  0x31   :  { %7379 = vmatpush1.msk.msra.mxu0 %vm82_vm0, %v7376_v38  ;;  %7383 = vmatpush1.msk.msra.mxu1 %vm82_vm0, %v691_v39  ;;  %v7599_v38 = vld [vmem:[%s11079_s1 + $0xb8] sm:$0x3f]  ;;  %v7598_v39 = vld [vmem:[%s11079_s1 + $0xb0] sm:$0x3f] }
  0x32   :  { %742 = vmatprep.subr.mxu0 %v8412_v5  ;;  %831 = vmatprep.subr.mxu1 %v8417_v6 }
  0x33   :  { %565 = vmatprep.mubr.f32.mxu0 %v11090_v0  ;;  %665 = vmatprep.mubr.f32.mxu1 %v11090_v0 }
  0x34   :  { %743 = vmatpush1.msra.mxu0 %v8424_v7  ;;  %832 = vmatpush1.msra.mxu1 %v8429_v8 }
  0x35   :  { %7351 = vmatmul.mubr.msk.f32.gmra.mxu0 %vm75_vm1, %v7334_v30  ;;  %7365 = vmatmul.mubr.msk.f32.gmra.mxu1 %vm75_vm1, %v7353_v40  ;;  %v7547_v30 = vld [vmem:[%s11079_s1 + $0x78] sm:$0x3f] }
  0x36   :  { %744 = vmatprep.subr.mxu0 %v8434_v9  ;;  %833 = vmatprep.subr.mxu1 %v8441_v10 }
  0x37   :  { %745 = vmatpush1.msra.mxu0 %v8446_v11  ;;  %834 = vmatpush1.msra.mxu1 %v8451_v12 }
  0x38   :  { %746 = vmatprep.subr.mxu0 %v8458_v13  ;;  %835 = vmatprep.subr.mxu1 %v8463_v14 }
  0x39   :  { %747 = vmatpush1.msra.mxu0 %v8470_v15  ;;  %780 = vmatprep.mubr.f32.mxu0 %v11090_v0 }
  0x3a   :  { %836 = vmatpush1.msra.mxu1 %v8475_v16  ;;  %869 = vmatprep.mubr.f32.mxu1 %v11090_v0 }
  0x3b   :  { %7380 = vmatmul.mubr.msk.f32.vlgmr.msra.gmra.mxu0 %vm75_vm1, %v7353_v40  ;;  %7384 = vmatmul.mubr.msk.f32.vlgmr.msra.gmra.mxu1 %vm75_vm1, %v7335_v35  ;;  %v9041_v35 = vld [vmem:[%s11079_s1 + $0x40] sm:$0xff] }
  0x3c   :  { %7396 = vmatprep.subr.msk.mxu0 %vm82_vm0, %v7395_v41  ;;  %7412 = vmatprep.subr.msk.mxu1 %vm82_vm0, %v7411_v42  ;;  %v9075_v41 = vld [vmem:[%s11079_s1 + $0xa8] sm:$0xff]  ;;  %v7614_v42 = vld [vmem:[%s11079_s1 + $0x70] sm:$0x3f] }
  0x3d   :  { %7397 = vmatpush1.msk.msra.mxu0 %vm82_vm0, %v7394_v43  ;;  %7413 = vmatpush1.msk.msra.mxu1 %vm82_vm0, %v7410_v44  ;;  %v9087_v43 = vld [vmem:[%s11079_s1 + $0xa0] sm:$0xff]  ;;  %v7573_v44 = vld [vmem:[%s11078_s0 + $0x90] sm:$0xff] }
  0x3e   :  { %931 = vmatprep.subr.mxu0 %v8506_v23  ;;  %786 = vmatprep.mubr.f32.mxu0 %v11090_v0 }
  0x3f   :  { %875 = vmatprep.mubr.f32.mxu1 %v11090_v0  ;;  %932 = vmatpush1.msra.mxu0 %v8515_v24 }
  0x40   :  { %1052 = vmatprep.subr.mxu1 %v8412_v5  ;;  %7381 = vmatmul.mubr.msk.f32.gmra.mxu0 %vm75_vm1, %v7369_v45 }
  0x41   :  { %7385 = vmatmul.mubr.msk.f32.gmra.mxu1 %vm75_vm1, %v7353_v40  ;;  %933 = vmatprep.subr.mxu0 %v8527_v26  ;;  %v7615_v40 = vld [vmem:[%s11079_s1 + $0x78] sm:$0x3f] }
  0x42   :  { %1053 = vmatpush1.msra.mxu1 %v8424_v7  ;;  %934 = vmatpush1.msra.mxu0 %v8534_v27 }
  0x43   :  { %1054 = vmatprep.subr.mxu1 %v8434_v9  ;;  %935 = vmatprep.subr.mxu0 %v8541_v28 }
  0x44   :  { %1055 = vmatpush1.msra.mxu1 %v8446_v11  ;;  %936 = vmatpush1.msra.mxu0 %v8548_v29 }
  0x45   :  { %969 = vmatprep.mubr.f32.mxu0 %v11090_v0  ;;  %1056 = vmatprep.subr.mxu1 %v8458_v13 }
  0x46   :  { %7398 = vmatmul.mubr.msk.f32.vlgmr.msra.gmra.mxu0 %vm75_vm1, %v7369_v45  ;;  %1057 = vmatpush1.msra.mxu1 %v8470_v15 }
  0x47   :  { %1090 = vmatprep.mubr.f32.mxu1 %v11090_v0  ;;  %7416 = vmatprep.subr.msk.mxu0 %vm82_vm0, %v1002_v46  ;;  %v9107_v46 = vld [vmem:[%s11079_s1 + $0x90] sm:$0xff] }
  0x48   :  { %7414 = vmatmul.mubr.msk.f32.vlgmr.msra.gmra.mxu1 %vm75_vm1, %v7402_v47  ;;  %7417 = vmatpush1.msk.msra.mxu0 %vm82_vm0, %v1001_v48  ;;  %v9121_v48 = vld [vmem:[%s11079_s1 + $0x80] sm:$0xff] }
  0x49   :  { %7430 = vmatprep.subr.msk.mxu1 %vm82_vm0, %v7429_v49  ;;  %1141 = vmatprep.subr.mxu0 %v8417_v6  ;;  %v2862_v49 = vld [vmem:[%s11079_s1 + $0x38] sm:$0x3f] }
  0x4a   :  { %7431 = vmatpush1.msk.msra.mxu1 %vm82_vm0, %v7428_v50  ;;  %975 = vmatprep.mubr.f32.mxu0 %v11090_v0  ;;  %v2861_v50 = vld [vmem:[%s11079_s1 + $0x30] sm:$0x3f] }
  0x4b   :  { %1142 = vmatpush1.msra.mxu0 %v8429_v8  ;;  %1241 = vmatprep.subr.mxu1 %v8506_v23 }
  0x4c   :  { %7399 = vmatmul.mubr.msk.f32.gmra.mxu0 %vm75_vm1, %v7402_v47  ;;  %1096 = vmatprep.mubr.f32.mxu1 %v11090_v0 }
  0x4d   :  { %1143 = vmatprep.subr.mxu0 %v8441_v10  ;;  %1242 = vmatpush1.msra.mxu1 %v8515_v24 }
  0x4e   :  { %7415 = vmatmul.mubr.msk.f32.gmra.mxu1 %vm75_vm1, %v7403_v51  ;;  %1144 = vmatpush1.msra.mxu0 %v8451_v12 }
  0x4f   :  { %1243 = vmatprep.subr.mxu1 %v8527_v26  ;;  %1145 = vmatprep.subr.mxu0 %v8463_v14 }
  0x50   :  { %1244 = vmatpush1.msra.mxu1 %v8534_v27  ;;  %1146 = vmatpush1.msra.mxu0 %v8475_v16 }
  0x51   :  { %1179 = vmatprep.mubr.f32.mxu0 %v11090_v0  ;;  %1245 = vmatprep.subr.mxu1 %v8541_v28 }
  0x52   :  { %7418 = vmatmul.mubr.msk.f32.vlgmr.msra.gmra.mxu0 %vm75_vm1, %v7369_v45  ;;  %1246 = vmatpush1.msra.mxu1 %v8548_v29  ;;  %v9098_v45 = vld [vmem:[%s11079_s1 + $0x98] sm:$0xff] }
  0x53   :  { %1279 = vmatprep.mubr.f32.mxu1 %v11090_v0  ;;  %7446 = vmatprep.subr.msk.mxu0 %vm82_vm0, %v7445_v52  ;;  %v7606_v52 = vld [vmem:[%s11078_s0 + $0x98] sm:$0xff] }
  0x54   :  { %7432 = vmatmul.mubr.msk.f32.vlgmr.msra.gmra.mxu1 %vm75_vm1, %v7403_v51  ;;  %7447 = vmatpush1.msk.msra.mxu0 %vm82_vm0, %v7444_v53  ;;  %v7632_v53 = vld [vmem:[%s11079_s1 + $0xb0] sm:$0x3f] }
  0x55   :  { %1362 = vmatprep.subr.mxu0 %v8412_v5  ;;  %7450 = vmatprep.subr.msk.mxu1 %vm82_vm0, %v1312_v54  ;;  %v7607_v54 = vld [vmem:[%s11078_s0 + $0xa0] sm:$0xff] }
  0x56   :  { %1185 = vmatprep.mubr.f32.mxu0 %v11090_v0  ;;  %1363 = vmatpush1.msra.mxu0 %v8424_v7 }
  0x57   :  { %7451 = vmatpush1.msk.msra.mxu1 %vm82_vm0, %v1311_v55  ;;  %7419 = vmatmul.mubr.msk.f32.gmra.mxu0 %vm75_vm1, %v7402_v47  ;;  %v9114_v47 = vld [vmem:[%s11079_s1 + $0x88] sm:$0xff]  ;;  %v7649_v55 = vld [vmem:[%s11079_s1 + $0x78] sm:$0x3f] }
  0x58   :  { %1285 = vmatprep.mubr.f32.mxu1 %v11090_v0  ;;  %1364 = vmatprep.subr.mxu0 %v8434_v9 }
  0x59   :  { %1451 = vmatprep.subr.mxu1 %v8417_v6  ;;  %7433 = vmatmul.mubr.msk.f32.gmra.mxu1 %vm75_vm1, %v7421_v56 }
  0x5a   :  { %1365 = vmatpush1.msra.mxu0 %v8446_v11  ;;  %1452 = vmatpush1.msra.mxu1 %v8429_v8 }
  0x5b   :  { %1366 = vmatprep.subr.mxu0 %v8458_v13  ;;  %1453 = vmatprep.subr.mxu1 %v8441_v10 }
  0x5c   :  { %1367 = vmatpush1.msra.mxu0 %v8470_v15  ;;  %1400 = vmatprep.mubr.f32.mxu0 %v11090_v0 }
  0x5d   :  { %1454 = vmatpush1.msra.mxu1 %v8451_v12  ;;  %7448 = vmatmul.mubr.msk.f32.vlgmr.msra.gmra.mxu0 %vm75_vm1, %v7421_v56 }
  0x5e   :  { %1455 = vmatprep.subr.mxu1 %v8463_v14  ;;  %7464 = vmatprep.subr.msk.mxu0 %vm82_vm0, %v7463_v57  ;;  %v3172_v57 = vld [vmem:[%s11079_s1 + $0x38] sm:$0x3f] }
  0x5f   :  { %1456 = vmatpush1.msra.mxu1 %v8475_v16  ;;  %1489 = vmatprep.mubr.f32.mxu1 %v11090_v0 }
  0x60   :  { %7465 = vmatpush1.msk.msra.mxu0 %vm82_vm0, %v7462_v58  ;;  %7452 = vmatmul.mubr.msk.f32.vlgmr.msra.gmra.mxu1 %vm75_vm1, %v7403_v51  ;;  %v7633_v51 = vld [vmem:[%s11079_s1 + $0xb8] sm:$0x3f]  ;;  %v3171_v58 = vld [vmem:[%s11079_s1 + $0x30] sm:$0x3f] }
  0x61   :  { %1551 = vmatprep.subr.mxu0 %v8506_v23  ;;  %7480 = vmatprep.subr.msk.mxu1 %vm82_vm0, %v7479_v59  ;;  %v7625_v59 = vld [vmem:[%s11078_s0 + $0xa8] sm:$0xff] }
  0x62   :  { %1406 = vmatprep.mubr.f32.mxu0 %v11090_v0  ;;  %1552 = vmatpush1.msra.mxu0 %v8515_v24 }
  0x63   :  { %7481 = vmatpush1.msk.msra.mxu1 %vm82_vm0, %v7478_v60  ;;  %7449 = vmatmul.mubr.msk.f32.gmra.mxu0 %vm75_vm1, %v7437_v61  ;;  %v7667_v60 = vld [vmem:[%s11079_s1 + $0xb8] sm:$0x3f] }
  0x64   :  { %1553 = vmatprep.subr.mxu0 %v8527_v26  ;;  %1672 = vmatprep.subr.mxu1 %v8412_v5 }
  0x65   :  { %1495 = vmatprep.mubr.f32.mxu1 %v11090_v0  ;;  %1554 = vmatpush1.msra.mxu0 %v8534_v27 }
  0x66   :  { %1673 = vmatpush1.msra.mxu1 %v8424_v7  ;;  %1555 = vmatprep.subr.mxu0 %v8541_v28 }
  0x67   :  { %7453 = vmatmul.mubr.msk.f32.gmra.mxu1 %vm75_vm1, %v7421_v56  ;;  %1674 = vmatprep.subr.mxu1 %v8434_v9  ;;  %v7648_v56 = vld [vmem:[%s11079_s1 + $0x70] sm:$0x3f] }
  0x68   :  { %1556 = vmatpush1.msra.mxu0 %v8548_v29  ;;  %1589 = vmatprep.mubr.f32.mxu0 %v11090_v0 }
  0x69   :  { %1675 = vmatpush1.msra.mxu1 %v8446_v11  ;;  %7466 = vmatmul.mubr.msk.f32.vlgmr.msra.gmra.mxu0 %vm75_vm1, %v7437_v61 }
  0x6a   :  { %1676 = vmatprep.subr.mxu1 %v8458_v13  ;;  %7484 = vmatprep.subr.msk.mxu0 %vm82_vm0, %v1622_v62  ;;  %v7683_v62 = vld [vmem:[%s11079_s1 + $0x78] sm:$0x3f] }
  0x6b   :  { %1677 = vmatpush1.msra.mxu1 %v8470_v15  ;;  %1710 = vmatprep.mubr.f32.mxu1 %v11090_v0 }
  0x6c   :  { %7485 = vmatpush1.msk.msra.mxu0 %vm82_vm0, %v1621_v63  ;;  %7482 = vmatmul.mubr.msk.f32.vlgmr.msra.gmra.mxu1 %vm75_vm1, %v7470_v1  ;;  %v7682_v63 = vld [vmem:[%s11079_s1 + $0x70] sm:$0x3f] }
  0x6d   :  { %1761 = vmatprep.subr.mxu0 %v8417_v6  ;;  %7498 = vmatprep.subr.msk.mxu1 %vm82_vm0, %v7497_v2  ;;  %v3482_v2 = vld [vmem:[%s11079_s1 + $0x38] sm:$0x3f] }
  0x6e   :  { %1595 = vmatprep.mubr.f32.mxu0 %v11090_v0  ;;  %1762 = vmatpush1.msra.mxu0 %v8429_v8 }
  0x6f   :  { %7499 = vmatpush1.msk.msra.mxu1 %vm82_vm0, %v7496_v3  ;;  %7467 = vmatmul.mubr.msk.f32.gmra.mxu0 %vm75_vm1, %v7470_v1  ;;  %v3481_v3 = vld [vmem:[%s11079_s1 + $0x30] sm:$0x3f] }
  0x70   :  { %1763 = vmatprep.subr.mxu0 %v8441_v10  ;;  %1861 = vmatprep.subr.mxu1 %v8506_v23 }
  0x71   :  { %1716 = vmatprep.mubr.f32.mxu1 %v11090_v0  ;;  %1764 = vmatpush1.msra.mxu0 %v8451_v12 }
  0x72   :  { %1862 = vmatpush1.msra.mxu1 %v8515_v24  ;;  %1765 = vmatprep.subr.mxu0 %v8463_v14 }
  0x73   :  { %7483 = vmatmul.mubr.msk.f32.gmra.mxu1 %vm75_vm1, %v7471_v4  ;;  %1863 = vmatprep.subr.mxu1 %v8527_v26 }
  0x74   :  { %1766 = vmatpush1.msra.mxu0 %v8475_v16  ;;  %1799 = vmatprep.mubr.f32.mxu0 %v11090_v0 }
  0x75   :  { %1864 = vmatpush1.msra.mxu1 %v8534_v27  ;;  %7486 = vmatmul.mubr.msk.f32.vlgmr.msra.gmra.mxu0 %vm75_vm1, %v7437_v61  ;;  %v7666_v61 = vld [vmem:[%s11079_s1 + $0xb0] sm:$0x3f] }
  0x76   :  { %1865 = vmatprep.subr.mxu1 %v8541_v28  ;;  %1899 = vmatprep.mubr.f32.mxu1 %v11090_v0 }
  0x77   :  { %1866 = vmatpush1.msra.mxu1 %v8548_v29  ;;  %1805 = vmatprep.mubr.f32.mxu0 %v11090_v0 }
  0x78   :  { %7500 = vmatmul.mubr.msk.f32.vlgmr.msra.gmra.mxu1 %vm75_vm1, %v7471_v4  ;;  %7514 = vmatprep.subr.msk.mxu0 %vm82_vm0, %v7513_v17  ;;  %v7674_v17 = vld [vmem:[%s11078_s0 + $0xb8] sm:$0xff] }
  0x79   :  { %7487 = vmatmul.mubr.msk.f32.gmra.mxu0 %vm75_vm1, %v7470_v1  ;;  %1905 = vmatprep.mubr.f32.mxu1 %v11090_v0  ;;  %v7641_v1 = vld [vmem:[%s11078_s0 + $0xb0] sm:$0xff] }
  0x7a   :  { %7515 = vmatpush1.msk.msra.mxu0 %vm82_vm0, %v7512_v18  ;;  %7518 = vmatprep.subr.msk.mxu1 %vm82_vm0, %v1932_v19  ;;  %v7700_v18 = vld [vmem:[%s11079_s1 + $0xb0] sm:$0x3f] }
  0x7b   :  { %1982 = vmatprep.subr.mxu0 %v8412_v5  ;;  %7519 = vmatpush1.msk.msra.mxu1 %vm82_vm0, %v1931_v20 }
  0x7c   :  { %7501 = vmatmul.mubr.msk.f32.gmra.mxu1 %vm75_vm1, %v7489_v21  ;;  %1983 = vmatpush1.msra.mxu0 %v8424_v7 }
  0x7d   :  { %1984 = vmatprep.subr.mxu0 %v8434_v9  ;;  %2071 = vmatprep.subr.mxu1 %v8417_v6 }
  0x7e   :  { %1985 = vmatpush1.msra.mxu0 %v8446_v11  ;;  %2072 = vmatpush1.msra.mxu1 %v8429_v8 }
  0x7f   :  { %1986 = vmatprep.subr.mxu0 %v8458_v13  ;;  %2073 = vmatprep.subr.mxu1 %v8441_v10 }
  0x80   :  { %1987 = vmatpush1.msra.mxu0 %v8470_v15  ;;  %2020 = vmatprep.mubr.f32.mxu0 %v11090_v0 }
  0x81   :  { %2074 = vmatpush1.msra.mxu1 %v8451_v12  ;;  %7516 = vmatmul.mubr.msk.f32.vlgmr.msra.gmra.mxu0 %vm75_vm1, %v7489_v21 }
  0x82   :  { %2075 = vmatprep.subr.mxu1 %v8463_v14  ;;  %7532 = vmatprep.subr.msk.mxu0 %vm82_vm0, %v7531_v22 }
  0x83   :  { %2076 = vmatpush1.msra.mxu1 %v8475_v16  ;;  %2109 = vmatprep.mubr.f32.mxu1 %v11090_v0 }
  0x84   :  { %7533 = vmatpush1.msk.msra.mxu0 %vm82_vm0, %v7530_v25  ;;  %7520 = vmatmul.mubr.msk.f32.vlgmr.msra.gmra.mxu1 %vm75_vm1, %v7471_v4  ;;  %v7701_v4 = vld [vmem:[%s11079_s1 + $0xb8] sm:$0x3f]  ;;  %v9283_v25 = vld [vmem:[%s11078_s0 + $0xc0] sm:$0xff] }
  0x85   :  { %2171 = vmatprep.subr.mxu0 %v8506_v23  ;;  %7548 = vmatprep.subr.msk.mxu1 %vm82_vm0, %v7547_v30 }
  0x86   :  { %2026 = vmatprep.mubr.f32.mxu0 %v11090_v0  ;;  %2172 = vmatpush1.msra.mxu0 %v8515_v24 }
  0x87   :  { %7549 = vmatpush1.msk.msra.mxu1 %vm82_vm0, %v7546_v31  ;;  %7517 = vmatmul.mubr.msk.f32.gmra.mxu0 %vm75_vm1, %v7505_v32 }
  0x88   :  { %2173 = vmatprep.subr.mxu0 %v8527_v26  ;;  %2292 = vmatprep.subr.mxu1 %v8412_v5  ;;  %v2241_v5 = vld [vmem:[%s11079_s1 + $0x30] sm:$0x3f] }
  0x89   :  { %2115 = vmatprep.mubr.f32.mxu1 %v11090_v0  ;;  %2174 = vmatpush1.msra.mxu0 %v8534_v27 }
  0x8a   :  { %2293 = vmatpush1.msra.mxu1 %v8424_v7  ;;  %2175 = vmatprep.subr.mxu0 %v8541_v28  ;;  %v7538_v7 = vld [vmem:[%s11078_s0 + $0x78] sm:$0xff] }
  0x8b   :  { %7521 = vmatmul.mubr.msk.f32.gmra.mxu1 %vm75_vm1, %v7489_v21  ;;  %2294 = vmatprep.subr.mxu1 %v8434_v9  ;;  %v7565_v9 = vld [vmem:[%s11079_s1 + $0xb8] sm:$0x3f] }
  0x8c   :  { %2176 = vmatpush1.msra.mxu0 %v8548_v29  ;;  %2209 = vmatprep.mubr.f32.mxu0 %v11090_v0 }
  0x8d   :  { %2295 = vmatpush1.msra.mxu1 %v8446_v11  ;;  %7534 = vmatmul.mubr.msk.f32.vlgmr.msra.gmra.mxu0 %vm75_vm1, %v7505_v32  ;;  %v7564_v11 = vld [vmem:[%s11079_s1 + $0xb0] sm:$0x3f] }
  0x8e   :  { %2296 = vmatprep.subr.mxu1 %v8458_v13  ;;  %7552 = vmatprep.subr.msk.mxu0 %vm82_vm0, %v2242_v33  ;;  %v8948_v13 = vld [vmem:[%s11078_s0 + $0x80] sm:$0xff] }
  0x8f   :  { %2297 = vmatpush1.msra.mxu1 %v8470_v15  ;;  %2330 = vmatprep.mubr.f32.mxu1 %v11090_v0  ;;  %v7557_v15 = vld [vmem:[%s11078_s0 + $0x88] sm:$0xff] }
  0x90   :  { %7553 = vmatpush1.msk.msra.mxu0 %vm82_vm0, %v2241_v5  ;;  %7550 = vmatmul.mubr.msk.f32.vlgmr.msra.gmra.mxu1 %vm75_vm1, %v7538_v7  ;;  %v7717_v5 = vld [vmem:[%s11079_s1 + $0x78] sm:$0x3f] }
  0x91   :  { %2381 = vmatprep.subr.mxu0 %v8417_v6  ;;  %7566 = vmatprep.subr.msk.mxu1 %vm82_vm0, %v7565_v9  ;;  %v7581_v6 = vld [vmem:[%s11079_s1 + $0x78] sm:$0x3f] }
  0x92   :  { %2215 = vmatprep.mubr.f32.mxu0 %v11090_v0  ;;  %2382 = vmatpush1.msra.mxu0 %v8429_v8  ;;  %v7580_v8 = vld [vmem:[%s11079_s1 + $0x70] sm:$0x3f]  ;;  %v3792_v9 = vld [vmem:[%s11079_s1 + $0x38] sm:$0x3f] }
  0x93   :  { %7567 = vmatpush1.msk.msra.mxu1 %vm82_vm0, %v7564_v11  ;;  %7535 = vmatmul.mubr.msk.f32.gmra.mxu0 %vm75_vm1, %v7538_v7  ;;  %v3791_v11 = vld [vmem:[%s11079_s1 + $0x30] sm:$0x3f] }
  0x94   :  { %2383 = vmatprep.subr.mxu0 %v8441_v10  ;;  %2481 = vmatprep.subr.mxu1 %v8506_v23  ;;  %v2552_v10 = vld [vmem:[%s11079_s1 + $0x38] sm:$0x3f]  ;;  %v9000_v23 = vld [vmem:[%s11079_s1 + $0x28] sm:$0xff] }
  0x95   :  { %2336 = vmatprep.mubr.f32.mxu1 %v11090_v0  ;;  %2384 = vmatpush1.msra.mxu0 %v8451_v12  ;;  %v8980_v12 = vld [vmem:[%s11079_s1 + $0x68] sm:$0xff] }
  0x96   :  { %2482 = vmatpush1.msra.mxu1 %v8515_v24  ;;  %2385 = vmatprep.subr.mxu0 %v8463_v14  ;;  %v2551_v14 = vld [vmem:[%s11079_s1 + $0x30] sm:$0x3f]  ;;  %v9005_v24 = vld [vmem:[%s11079_s1 + $0x58] sm:$0xff] }
  0x97   :  { %7551 = vmatmul.mubr.msk.f32.gmra.mxu1 %vm75_vm1, %v8948_v13  ;;  %2483 = vmatprep.subr.mxu1 %v8527_v26  ;;  %v9012_v26 = vld [vmem:[%s11079_s1 + $0x20] sm:$0xff] }
  0x98   :  { %2386 = vmatpush1.msra.mxu0 %v8475_v16  ;;  %2419 = vmatprep.mubr.f32.mxu0 %v11090_v0  ;;  %v8993_v16 = vld [vmem:[%s11079_s1 + $0x60] sm:$0xff] }
  0x99   :  { %2484 = vmatpush1.msra.mxu1 %v8534_v27  ;;  %7554 = vmatmul.mubr.msk.f32.vlgmr.msra.gmra.mxu0 %vm75_vm1, %v7505_v32  ;;  %v9017_v27 = vld [vmem:[%s11079_s1 + $0x50] sm:$0xff] }
  0x9a   :  { %2485 = vmatprep.subr.mxu1 %v8541_v28  ;;  %2519 = vmatprep.mubr.f32.mxu1 %v11090_v0  ;;  %v9024_v28 = vld [vmem:[%s11079_s1 + $0x18] sm:$0xff] }
  0x9b   :  { %2486 = vmatpush1.msra.mxu1 %v8548_v29  ;;  %2425 = vmatprep.mubr.f32.mxu0 %v11090_v0  ;;  %v9029_v29 = vld [vmem:[%s11079_s1 + $0x48] sm:$0xff] }
  0x9c   :  { %7568 = vmatmul.mubr.msk.f32.vlgmr.msra.gmra.mxu1 %vm75_vm1, %v8948_v13  ;;  %7582 = vmatprep.subr.msk.mxu0 %vm82_vm0, %v7581_v6 }
  0x9d   :  { %7555 = vmatmul.mubr.msk.f32.gmra.mxu0 %vm75_vm1, %v7538_v7  ;;  %2525 = vmatprep.mubr.f32.mxu1 %v11090_v0  ;;  %v7716_v7 = vld [vmem:[%s11079_s1 + $0x70] sm:$0x3f] }
  0x9e   :  { %7583 = vmatpush1.msk.msra.mxu0 %vm82_vm0, %v7580_v8  ;;  %7586 = vmatprep.subr.msk.mxu1 %vm82_vm0, %v2552_v10 }
  0x9f   :  { %2602 = vmatprep.subr.mxu0 %v8980_v12  ;;  %7587 = vmatpush1.msk.msra.mxu1 %vm82_vm0, %v2551_v14  ;;  %v9330_v14 = vld [vmem:[%s11078_s0 + $0xc8] sm:$0xff] }
  0xa0   :  { %7569 = vmatmul.mubr.msk.f32.gmra.mxu1 %vm75_vm1, %v7557_v15  ;;  %2603 = vmatpush1.msra.mxu0 %v8993_v16 }
  0xa1   :  { %2691 = vmatprep.subr.mxu1 %v9000_v23  ;;  %2604 = vmatprep.subr.mxu0 %v9005_v24 }
  0xa2   :  { %2692 = vmatpush1.msra.mxu1 %v9012_v26  ;;  %2605 = vmatpush1.msra.mxu0 %v9017_v27 }
  0xa3   :  { %2693 = vmatprep.subr.mxu1 %v9024_v28  ;;  %2606 = vmatprep.subr.mxu0 %v9029_v29 }
  0xa4   :  { %2694 = vmatpush1.msra.mxu1 %v9036_v34  ;;  %2607 = vmatpush1.msra.mxu0 %v9041_v35 }
  0xa5   :  { %2640 = vmatprep.mubr.f32.mxu0 %v11090_v0  ;;  %2695 = vmatprep.subr.mxu1 %v9048_v36 }
  0xa6   :  { %7584 = vmatmul.mubr.msk.f32.vlgmr.msra.gmra.mxu0 %vm75_vm1, %v7557_v15  ;;  %2696 = vmatpush1.msra.mxu1 %v9055_v37 }
  0xa7   :  { %7600 = vmatprep.subr.msk.mxu0 %vm82_vm0, %v7599_v38  ;;  %2729 = vmatprep.mubr.f32.mxu1 %v11090_v0 }
  0xa8   :  { %7601 = vmatpush1.msk.msra.mxu0 %vm82_vm0, %v7598_v39  ;;  %7616 = vmatprep.subr.msk.mxu1 %vm82_vm0, %v7615_v40 }
  0xa9   :  { %7588 = vmatmul.mubr.msk.f32.vlgmr.msra.gmra.mxu1 %vm75_vm1, %v8948_v13  ;;  %2791 = vmatprep.subr.mxu0 %v9075_v41 }
  0xaa   :  { %7617 = vmatpush1.msk.msra.mxu1 %vm82_vm0, %v7614_v42  ;;  %2646 = vmatprep.mubr.f32.mxu0 %v11090_v0 }
  0xab   :  { %2792 = vmatpush1.msra.mxu0 %v9087_v43  ;;  %2912 = vmatprep.subr.mxu1 %v8980_v12 }
  0xac   :  { %7585 = vmatmul.mubr.msk.f32.gmra.mxu0 %vm75_vm1, %v7573_v44  ;;  %2793 = vmatprep.subr.mxu0 %v9098_v45 }
  0xad   :  { %2913 = vmatpush1.msra.mxu1 %v8993_v16  ;;  %2735 = vmatprep.mubr.f32.mxu1 %v11090_v0 }
  0xae   :  { %2794 = vmatpush1.msra.mxu0 %v9107_v46  ;;  %2914 = vmatprep.subr.mxu1 %v9005_v24 }
  0xaf   :  { %7589 = vmatmul.mubr.msk.f32.gmra.mxu1 %vm75_vm1, %v7557_v15  ;;  %2795 = vmatprep.subr.mxu0 %v9114_v47 }
  0xb0   :  { %2915 = vmatpush1.msra.mxu1 %v9017_v27  ;;  %2796 = vmatpush1.msra.mxu0 %v9121_v48 }
  0xb1   :  { %2829 = vmatprep.mubr.f32.mxu0 %v11090_v0  ;;  %2916 = vmatprep.subr.mxu1 %v9029_v29 }
  0xb2   :  { %7602 = vmatmul.mubr.msk.f32.vlgmr.msra.gmra.mxu0 %vm75_vm1, %v7573_v44  ;;  %2917 = vmatpush1.msra.mxu1 %v9041_v35 }
  0xb3   :  { %7620 = vmatprep.subr.msk.mxu0 %vm82_vm0, %v2862_v49  ;;  %2950 = vmatprep.mubr.f32.mxu1 %v11090_v0 }
  0xb4   :  { %7621 = vmatpush1.msk.msra.mxu0 %vm82_vm0, %v2861_v50  ;;  %7634 = vmatprep.subr.msk.mxu1 %vm82_vm0, %v7633_v51 }
  0xb5   :  { %7618 = vmatmul.mubr.msk.f32.vlgmr.msra.gmra.mxu1 %vm75_vm1, %v7606_v52  ;;  %3001 = vmatprep.subr.mxu0 %v9000_v23 }
  0xb6   :  { %7635 = vmatpush1.msk.msra.mxu1 %vm82_vm0, %v7632_v53  ;;  %2835 = vmatprep.mubr.f32.mxu0 %v11090_v0 }
  0xb7   :  { %3002 = vmatpush1.msra.mxu0 %v9012_v26  ;;  %3101 = vmatprep.subr.mxu1 %v9075_v41 }
  0xb8   :  { %7603 = vmatmul.mubr.msk.f32.gmra.mxu0 %vm75_vm1, %v7606_v52  ;;  %3003 = vmatprep.subr.mxu0 %v9024_v28 }
  0xb9   :  { %3102 = vmatpush1.msra.mxu1 %v9087_v43  ;;  %2956 = vmatprep.mubr.f32.mxu1 %v11090_v0 }
  0xba   :  { %3004 = vmatpush1.msra.mxu0 %v9036_v34  ;;  %3103 = vmatprep.subr.mxu1 %v9098_v45 }
  0xbb   :  { %7619 = vmatmul.mubr.msk.f32.gmra.mxu1 %vm75_vm1, %v7607_v54  ;;  %3005 = vmatprep.subr.mxu0 %v9048_v36 }
  0xbc   :  { %3104 = vmatpush1.msra.mxu1 %v9107_v46  ;;  %3006 = vmatpush1.msra.mxu0 %v9055_v37 }
  0xbd   :  { %3039 = vmatprep.mubr.f32.mxu0 %v11090_v0  ;;  %3105 = vmatprep.subr.mxu1 %v9114_v47 }
  0xbe   :  { %7622 = vmatmul.mubr.msk.f32.vlgmr.msra.gmra.mxu0 %vm75_vm1, %v7573_v44  ;;  %3106 = vmatpush1.msra.mxu1 %v9121_v48 }
  0xbf   :  { %7650 = vmatprep.subr.msk.mxu0 %vm82_vm0, %v7649_v55  ;;  %3139 = vmatprep.mubr.f32.mxu1 %v11090_v0 }
  0xc0   :  { %7651 = vmatpush1.msk.msra.mxu0 %vm82_vm0, %v7648_v56  ;;  %7654 = vmatprep.subr.msk.mxu1 %vm82_vm0, %v3172_v57  ;;  %v7734_v56 = vld [vmem:[%s11079_s1 + $0xb0] sm:$0x3f]  ;;  %v7751_v57 = vld [vmem:[%s11079_s1 + $0x78] sm:$0x3f] }
  0xc1   :  { %7636 = vmatmul.mubr.msk.f32.vlgmr.msra.gmra.mxu1 %vm75_vm1, %v7607_v54  ;;  %3222 = vmatprep.subr.mxu0 %v8980_v12 }
  0xc2   :  { %7655 = vmatpush1.msk.msra.mxu1 %vm82_vm0, %v3171_v58  ;;  %3045 = vmatprep.mubr.f32.mxu0 %v11090_v0 }
  0xc3   :  { %3223 = vmatpush1.msra.mxu0 %v8993_v16  ;;  %3311 = vmatprep.subr.mxu1 %v9000_v23 }
  0xc4   :  { %7623 = vmatmul.mubr.msk.f32.gmra.mxu0 %vm75_vm1, %v7606_v52  ;;  %3224 = vmatprep.subr.mxu0 %v9005_v24  ;;  %v7735_v52 = vld [vmem:[%s11079_s1 + $0xb8] sm:$0x3f] }
  0xc5   :  { %3312 = vmatpush1.msra.mxu1 %v9012_v26  ;;  %3145 = vmatprep.mubr.f32.mxu1 %v11090_v0 }
  0xc6   :  { %3225 = vmatpush1.msra.mxu0 %v9017_v27  ;;  %3313 = vmatprep.subr.mxu1 %v9024_v28 }
  0xc7   :  { %7637 = vmatmul.mubr.msk.f32.gmra.mxu1 %vm75_vm1, %v7625_v59  ;;  %3226 = vmatprep.subr.mxu0 %v9029_v29 }
  0xc8   :  { %3314 = vmatpush1.msra.mxu1 %v9036_v34  ;;  %3227 = vmatpush1.msra.mxu0 %v9041_v35 }
  0xc9   :  { %3260 = vmatprep.mubr.f32.mxu0 %v11090_v0  ;;  %3315 = vmatprep.subr.mxu1 %v9048_v36 }
  0xca   :  { %7652 = vmatmul.mubr.msk.f32.vlgmr.msra.gmra.mxu0 %vm75_vm1, %v7625_v59  ;;  %3316 = vmatpush1.msra.mxu1 %v9055_v37 }
  0xcb   :  { %7668 = vmatprep.subr.msk.mxu0 %vm82_vm0, %v7667_v60  ;;  %3349 = vmatprep.mubr.f32.mxu1 %v11090_v0  ;;  %v7750_v60 = vld [vmem:[%s11079_s1 + $0x70] sm:$0x3f] }
  0xcc   :  { %7669 = vmatpush1.msk.msra.mxu0 %vm82_vm0, %v7666_v61  ;;  %7684 = vmatprep.subr.msk.mxu1 %vm82_vm0, %v7683_v62  ;;  %v9363_v61 = vld [vmem:[%s11080_s2] ss:$0 sm:$0xff] }
  0xcd   :  { %7656 = vmatmul.mubr.msk.f32.vlgmr.msra.gmra.mxu1 %vm75_vm1, %v7607_v54  ;;  %3411 = vmatprep.subr.mxu0 %v9075_v41 }
  0xce   :  { %7685 = vmatpush1.msk.msra.mxu1 %vm82_vm0, %v7682_v63  ;;  %3266 = vmatprep.mubr.f32.mxu0 %v11090_v0 }
  0xcf   :  { %3412 = vmatpush1.msra.mxu0 %v9087_v43  ;;  %3532 = vmatprep.subr.mxu1 %v8980_v12 }
  0xd0   :  { %7653 = vmatmul.mubr.msk.f32.gmra.mxu0 %vm75_vm1, %v7641_v1  ;;  %3413 = vmatprep.subr.mxu0 %v9098_v45 }
  0xd1   :  { %3533 = vmatpush1.msra.mxu1 %v8993_v16  ;;  %3355 = vmatprep.mubr.f32.mxu1 %v11090_v0 }
  0xd2   :  { %3414 = vmatpush1.msra.mxu0 %v9107_v46  ;;  %3534 = vmatprep.subr.mxu1 %v9005_v24 }
  0xd3   :  { %7657 = vmatmul.mubr.msk.f32.gmra.mxu1 %vm75_vm1, %v7625_v59  ;;  %3415 = vmatprep.subr.mxu0 %v9114_v47 }
  0xd4   :  { %3535 = vmatpush1.msra.mxu1 %v9017_v27  ;;  %3416 = vmatpush1.msra.mxu0 %v9121_v48 }
  0xd5   :  { %3449 = vmatprep.mubr.f32.mxu0 %v11090_v0  ;;  %3536 = vmatprep.subr.mxu1 %v9029_v29 }
  0xd6   :  { %7670 = vmatmul.mubr.msk.f32.vlgmr.msra.gmra.mxu0 %vm75_vm1, %v7641_v1  ;;  %3537 = vmatpush1.msra.mxu1 %v9041_v35 }
  0xd7   :  { %7688 = vmatprep.subr.msk.mxu0 %vm82_vm0, %v3482_v2  ;;  %3570 = vmatprep.mubr.f32.mxu1 %v11090_v0  ;;  %v155_v19 = vpop.f32.mrf.mxu0  ;;  %v244_v20 = vpop.f32.mrf.mxu1  ;;  %v9373_v2 = vld [vmem:[%s11078_s0 + $0xd0] sm:$0xff] }
  0xd8   :  { %7689 = vmatpush1.msk.msra.mxu0 %vm82_vm0, %v3481_v3  ;;  %7702 = vmatprep.subr.msk.mxu1 %vm82_vm0, %v7701_v4  ;;  %v245_v38 = vadd.f32 %v244_v20, %v155_v19 }
  0xd9   :  { %7686 = vmatmul.mubr.msk.f32.vlgmr.msra.gmra.mxu1 %vm75_vm1, %v7674_v17  ;;  %3621 = vmatprep.subr.mxu0 %v9000_v23  ;;  %v157_v21 = vpop.f32.mrf.mxu0  ;;  %v246_v22 = vpop.f32.mrf.mxu1 }
  0xda   :  { %7703 = vmatpush1.msk.msra.mxu1 %vm82_vm0, %v7700_v18  ;;  %3455 = vmatprep.mubr.f32.mxu0 %v11090_v0  ;;  %v247_v42 = vadd.f32 %v246_v22, %v157_v21 }
  0xdb   :  { %3622 = vmatpush1.msra.mxu0 %v9012_v26  ;;  %3721 = vmatprep.subr.mxu1 %v9075_v41 }
  0xdc   :  { %7671 = vmatmul.mubr.msk.f32.gmra.mxu0 %vm75_vm1, %v7674_v17  ;;  %3623 = vmatprep.subr.mxu0 %v9024_v28 }
  0xdd   :  { %3722 = vmatpush1.msra.mxu1 %v9087_v43  ;;  %3576 = vmatprep.mubr.f32.mxu1 %v11090_v0  ;;  %v161_v30 = vpop.f32.mrf.mxu0  ;;  %v250_v31 = vpop.f32.mrf.mxu1 }
  0xde   :  { %3624 = vmatpush1.msra.mxu0 %v9036_v34  ;;  %3723 = vmatprep.subr.mxu1 %v9098_v45  ;;  %v251_v15 = vadd.f32 %v250_v31, %v161_v30 }
  0xdf   :  { %7687 = vmatmul.mubr.msk.f32.gmra.mxu1 %vm75_vm1, %v9283_v25  ;;  %3625 = vmatprep.subr.mxu0 %v9048_v36  ;;  %v163_v32 = vpop.f32.mrf.mxu0  ;;  %v252_v33 = vpop.f32.mrf.mxu1 }
  0xe0   :  { %3724 = vmatpush1.msra.mxu1 %v9107_v46  ;;  %3626 = vmatpush1.msra.mxu0 %v9055_v37  ;;  %v253_v44 = vadd.f32 %v252_v33, %v163_v32  ;;  %v4101_v32 = vld [vmem:[%s11079_s1 + $0x30] sm:$0x3f]  ;;  %v7742_v33 = vld [vmem:[%s11078_s0 + $0xd8] sm:$0xff] }
  0xe1   :  { %3659 = vmatprep.mubr.f32.mxu0 %v11090_v0  ;;  %3725 = vmatprep.subr.mxu1 %v9114_v47 }
  0xe2   :  { %7690 = vmatmul.mubr.msk.f32.vlgmr.msra.gmra.mxu0 %vm75_vm1, %v7641_v1  ;;  %3726 = vmatpush1.msra.mxu1 %v9121_v48 }
  0xe3   :  { %7718 = vmatprep.subr.msk.mxu0 %vm82_vm0, %v7717_v5  ;;  %3759 = vmatprep.mubr.f32.mxu1 %v11090_v0  ;;  %v345_v13 = vpop.f32.mrf.mxu0  ;;  %v9312_v6 = vpop.f32.mrf.mxu1 }
  0xe4   :  { %7719 = vmatpush1.msk.msra.mxu0 %vm82_vm0, %v7716_v7  ;;  %7722 = vmatprep.subr.msk.mxu1 %vm82_vm0, %v3792_v9  ;;  %v356_v53 = vadd.f32 %v345_v13, %v245_v38  ;;  %v7768_v9 = vld [vmem:[%s11079_s1 + $0xb0] sm:$0x3f] }
  0xe5   :  { %7704 = vmatmul.mubr.msk.f32.vlgmr.msra.gmra.mxu1 %vm75_vm1, %v9283_v25  ;;  %3842 = vmatprep.subr.mxu0 %v8980_v12  ;;  %v347_v8 = vpop.f32.mrf.mxu0  ;;  %v9319_v10 = vpop.f32.mrf.mxu1 }
  0xe6   :  { %7723 = vmatpush1.msk.msra.mxu1 %vm82_vm0, %v3791_v11  ;;  %3665 = vmatprep.mubr.f32.mxu0 %v11090_v0  ;;  %v357_v54 = vadd.f32 %v347_v8, %v247_v42  ;;  %v7761_v42 = vld [vmem:[%s11078_s0 + $0xe8] sm:$0xff] }
  0xe7   :  { %3843 = vmatpush1.msra.mxu0 %v8993_v16  ;;  %3931 = vmatprep.subr.mxu1 %v9000_v23 }
  0xe8   :  { %7691 = vmatmul.mubr.msk.f32.gmra.mxu0 %vm75_vm1, %v7674_v17  ;;  %3844 = vmatprep.subr.mxu0 %v9005_v24 }
  0xe9   :  { %3932 = vmatpush1.msra.mxu1 %v9012_v26  ;;  %3765 = vmatprep.mubr.f32.mxu1 %v11090_v0  ;;  %v351_v39 = vpop.f32.mrf.mxu0  ;;  %v478_v40 = vpop.f32.mrf.mxu1 }
  0xea   :  { %3845 = vmatpush1.msra.mxu0 %v9017_v27  ;;  %3933 = vmatprep.subr.mxu1 %v9024_v28  ;;  %v358_v49 = vadd.f32 %v351_v39, %v251_v15 }
  0xeb   :  { %7705 = vmatmul.mubr.msk.f32.gmra.mxu1 %vm75_vm1, %v9330_v14  ;;  %3846 = vmatprep.subr.mxu0 %v9029_v29  ;;  %v353_v50 = vpop.f32.mrf.mxu0  ;;  %v480_v51 = vpop.f32.mrf.mxu1 }
  0xec   :  { %3934 = vmatpush1.msra.mxu1 %v9036_v34  ;;  %3847 = vmatpush1.msra.mxu0 %v9041_v35  ;;  %v359_v55 = vadd.f32 %v353_v50, %v253_v44  ;;  %v360_v58 = vmax.f32 %v356_v53, %v358_v49  ;;  %v9480_v44 = vld [vmem:[#allocation3 + $0x80] sm:$0xff]  ;;  %v9482_v49 = vld [vmem:[#allocation3 + $0x150] sm:$0xf] }
  0xed   :  { %3880 = vmatprep.mubr.f32.mxu0 %v11090_v0  ;;  %3935 = vmatprep.subr.mxu1 %v9048_v36 }
  0xee   :  { %7720 = vmatmul.mubr.msk.f32.vlgmr.msra.gmra.mxu0 %vm75_vm1, %v9330_v14  ;;  %3936 = vmatpush1.msra.mxu1 %v9055_v37  ;;  %v361_v59 = vmax.f32 %v357_v54, %v359_v55  ;;  %v9495_v54 = vld [vmem:[#allocation3 + $0x70] sm:$0xff]  ;;  %v9497_v55 = vld [vmem:[#allocation3 + $0x140] sm:$0xff] }
  0xef   :  { %7736 = vmatprep.subr.msk.mxu0 %vm82_vm0, %v7735_v52  ;;  %3969 = vmatprep.mubr.f32.mxu1 %v11090_v0  ;;  %v561_v62 = vpop.f32.mrf.mxu0  ;;  %v661_v63 = vpop.f32.mrf.mxu1  ;;  %v9491_v52 = vld [vmem:[#allocation3 + $0x148] sm:$0xff] }
  0xf0   :  { %7737 = vmatpush1.msk.msra.mxu0 %vm82_vm0, %v7734_v56  ;;  %7752 = vmatprep.subr.msk.mxu1 %vm82_vm0, %v7751_v57  ;;  %v362_v1 = vmax.f32 %v360_v58, %v361_v59  ;;  %v9502_v58 = vld [vmem:[#allocation3 + $0x68] sm:$0xff]  ;;  %v9506_v59 = vld [vmem:[#allocation3 + $0x138] sm:$0xff] }
  0xf1   :  { %7724 = vmatmul.mubr.msk.f32.vlgmr.msra.gmra.mxu1 %vm75_vm1, %v9283_v25  ;;  %4031 = vmatprep.subr.mxu0 %v9075_v41  ;;  %v563_v3 = vpop.f32.mrf.mxu0  ;;  %v663_v4 = vpop.f32.mrf.mxu1 }
  0xf2   :  { %7753 = vmatpush1.msk.msra.mxu1 %vm82_vm0, %v7750_v60  ;;  %3886 = vmatprep.mubr.f32.mxu0 %v11090_v0  ;;  %v369_v17 = vadd.f32 %v9363_v61, %v362_v1  ;;  %v564_v21 = vadd.f32 %v563_v3, %v9319_v10  ;;  %v9511_v1 = vld [vmem:[#allocation3 + $0x60] sm:$0xff] }
  0xf3   :  { %4032 = vmatpush1.msra.mxu0 %v9087_v43  ;;  %4152 = vmatprep.subr.mxu1 %v8980_v12  ;;  %v562_v12 = vadd.f32 %v561_v62, %v9312_v6  ;;  %11283 = vst [vmem:[#allocation6_spill] sm:$0xff] %v9511_v1 }
  0xf4   :  { %7721 = vmatmul.mubr.msk.f32.gmra.mxu0 %vm75_vm1, %v9373_v2  ;;  %4033 = vmatprep.subr.mxu0 %v9098_v45  ;;  %v370_v18 = vmax.f32 %v369_v17, 0.0  ;;  %v673_v7 = vadd.f32 %v663_v4, %v564_v21  ;;  %v9517_v17 = vld [vmem:[#allocation3 + $0x58] sm:$0xff]  ;;  %v9523_v21 = vld [vmem:[#allocation3 + $0x50] sm:$0xff] }
  0xf5   :  { %4153 = vmatpush1.msra.mxu1 %v8993_v16  ;;  %3975 = vmatprep.mubr.f32.mxu1 %v11090_v0  ;;  %v567_v19 = vpop.f32.mrf.mxu0  ;;  %v667_v20 = vpop.f32.mrf.mxu1  ;;  %v672_v5 = vadd.f32 %v661_v63, %v562_v12  ;;  %11284 = vst [vmem:[#allocation7_spill] sm:$0xff] %v9517_v17  ;;  %11285 = vst [vmem:[#allocation8_spill] sm:$0xff] %v9523_v21 }
  0xf6   :  { %4034 = vmatpush1.msra.mxu0 %v9107_v46  ;;  %4154 = vmatprep.subr.mxu1 %v9005_v24  ;;  %372 = vst.msk [vmem:[#allocation2] sm:$0xff] %vm371_vm2, %v370_v18  ;;  %v568_v22 = vadd.f32 %v567_v19, %v478_v40  ;;  %v4102_v24 = vld [vmem:[%s11079_s1 + $0x38] sm:$0x3f] }
  0xf7   :  { %7725 = vmatmul.mubr.msk.f32.gmra.mxu1 %vm75_vm1, %v9330_v14  ;;  %4035 = vmatprep.subr.mxu0 %v9114_v47  ;;  %v569_v16 = vpop.f32.mrf.mxu0  ;;  %v669_v25 = vpop.f32.mrf.mxu1  ;;  %v9473_v40 = vld [vmem:[#allocation3 + $0x88] sm:$0xff] }
  0xf8   :  { %4155 = vmatpush1.msra.mxu1 %v9017_v27  ;;  %4036 = vmatpush1.msra.mxu0 %v9121_v48  ;;  %v674_v30 = vadd.f32 %v667_v20, %v568_v22  ;;  %v570_v31 = vadd.f32 %v569_v16, %v480_v51  ;;  %v7769_v27 = vld [vmem:[%s11079_s1 + $0xb8] sm:$0x3f]  ;;  %v9487_v51 = vld [vmem:[#allocation3 + $0x78] sm:$0xff]  ;;  %v9526_v22 = vld [vmem:[#allocation3 + $0x120] sm:$0xff] }
  0xf9   :  { %4069 = vmatprep.mubr.f32.mxu0 %v11090_v0  ;;  %4156 = vmatprep.subr.mxu1 %v9029_v29  ;;  %v9520_v18 = vld [vmem:[#allocation3 + $0x128] sm:$0xff] }
  0xfa   :  { %7738 = vmatmul.mubr.msk.f32.vlgmr.msra.gmra.mxu0 %vm75_vm1, %v9373_v2  ;;  %4157 = vmatpush1.msra.mxu1 %v9041_v35  ;;  %v675_v29 = vadd.f32 %v669_v25, %v570_v31  ;;  %v676_v35 = vmax.f32 %v672_v5, %v674_v30  ;;  %v9529_v25 = vld [vmem:[#allocation3 + $0x48] sm:$0xff]  ;;  %v9541_v5 = vld [vmem:[#allocation3 + $0x38] sm:$0xff] }
  0xfb   :  { %7756 = vmatprep.subr.msk.mxu0 %vm82_vm0, %v4102_v24  ;;  %4190 = vmatprep.mubr.f32.mxu1 %v11090_v0  ;;  %v9417_v11 = vpop.f32.mrf.mxu0  ;;  %v9419_v13 = vpop.f32.mrf.mxu1  ;;  %11286 = vst [vmem:[#allocation9_spill] sm:$0xff] %v9529_v25  ;;  %v9532_v24 = vld [vmem:[#allocation3 + $0x118] sm:$0xff]  ;;  %11288 = vst [vmem:[#allocation11_spill] sm:$0xff] %v9541_v5 }
  0xfc   :  { %7757 = vmatpush1.msk.msra.mxu0 %vm82_vm0, %v4101_v32  ;;  %7770 = vmatprep.subr.msk.mxu1 %vm82_vm0, %v7769_v27  ;;  %v677_v6 = vmax.f32 %v673_v7, %v675_v29  ;;  %v872_v56 = vadd.f32 %v9419_v13, %v9417_v11  ;;  %v9535_v32 = vld [vmem:[#allocation3 + $0x40] sm:$0xff]  ;;  %v9538_v27 = vld [vmem:[#allocation3 + $0x110] sm:$0xff]  ;;  %v9544_v7 = vld [vmem:[#allocation3 + $0x108] sm:$0xff] }
  0xfd   :  { %7754 = vmatmul.mubr.msk.f32.vlgmr.msra.gmra.mxu1 %vm75_vm1, %v7742_v33  ;;  %4241 = vmatprep.subr.mxu0 %v9000_v23  ;;  %v9425_v8 = vpop.f32.mrf.mxu0  ;;  %v9427_v10 = vpop.f32.mrf.mxu1  ;;  %v7743_v23 = vld [vmem:[%s11078_s0 + $0xe0] sm:$0xff]  ;;  %11287 = vst [vmem:[#allocation10_spill] sm:$0xff] %v9535_v32  ;;  %v9550_v11 = vld [vmem:[#allocation3 + $0x100] sm:$0xff] }
  0xfe   :  { %7771 = vmatpush1.msk.msra.mxu1 %vm82_vm0, %v7768_v9  ;;  %4075 = vmatprep.mubr.f32.mxu0 %v11090_v0  ;;  %v678_v14 = vmax.f32 %v676_v35, %v677_v6  ;;  %v874_v60 = vadd.f32 %v9427_v10, %v9425_v8  ;;  %v9547_v9 = vld [vmem:[#allocation3 + $0x30] sm:$0xff]  ;;  %v9553_v6 = vld [vmem:[#allocation3 + $0x28] sm:$0xff]  ;;  %v9556_v8 = vld [vmem:[#allocation3 + $0xf8] sm:$0xff] }
  0xff   :  { %4242 = vmatpush1.msra.mxu0 %v9012_v26  ;;  %4341 = vmatprep.subr.mxu1 %v9075_v41  ;;  %11289 = vst [vmem:[#allocation12_spill] sm:$0xff] %v9547_v9  ;;  %11290 = vst [vmem:[#allocation13_spill] sm:$0xff] %v9553_v6 }
 0x100   :  { %7739 = vmatmul.mubr.msk.f32.gmra.mxu0 %vm75_vm1, %v7742_v33  ;;  %4243 = vmatprep.subr.mxu0 %v9024_v28  ;;  %v679_v15 = vadd.f32 %v9363_v61, %v678_v14  ;;  %v788_v38 = vpop.f32.mrf.mxu0  ;;  %v9447_v28 = vld [vmem:[#allocation3 + $0xa8] sm:$0xf]  ;;  %v9560_v14 = vld [vmem:[#allocation3 + $0x20] sm:$0xff] }
 0x101   :  { %4342 = vmatpush1.msra.mxu1 %v9087_v43  ;;  %4196 = vmatprep.mubr.f32.mxu1 %v11090_v0  ;;  %v877_v39 = vpop.f32.mrf.mxu1  ;;  %11291 = vst [vmem:[#allocation14_spill] sm:$0xff] %v9560_v14 }
 0x102   :  { %4244 = vmatpush1.msra.mxu0 %v9036_v34  ;;  %4343 = vmatprep.subr.mxu1 %v9098_v45  ;;  %v680_v26 = vmax.f32 %v679_v15, 0.0  ;;  %v790_v41 = vpop.f32.mrf.mxu0  ;;  %v9455_v34 = vld [vmem:[#allocation3 + $0xa0] sm:$0xf]  ;;  %v9464_v45 = vld [vmem:[#allocation3 + $0x90] sm:$0xff]  ;;  %v878_v53 = vadd.f32 %v877_v39, %v788_v38  ;;  %v9564_v15 = vld [vmem:[#allocation3 + $0x18] sm:$0xff] }
 0x103   :  { %7755 = vmatmul.mubr.msk.f32.gmra.mxu1 %vm75_vm1, %v7743_v23  ;;  %4245 = vmatprep.subr.mxu0 %v9048_v36  ;;  %v879_v43 = vpop.f32.mrf.mxu1  ;;  %11292 = vst [vmem:[#allocation15_spill] sm:$0xff] %v9564_v15  ;;  %v9567_v38 = vld [vmem:[#allocation3 + $0xf0] sm:$0xff] }
 0x104   :  { %4344 = vmatpush1.msra.mxu1 %v9107_v46  ;;  %4246 = vmatpush1.msra.mxu0 %v9055_v37  ;;  %682 = vst.msk [vmem:[#allocation2 + $0x8] sm:$0xff] %vm371_vm2, %v680_v26  ;;  %v9460_v37 = vld [vmem:[#allocation3 + $0x98] sm:$0xff]  ;;  %v880_v62 = vadd.f32 %v879_v43, %v790_v41  ;;  %v9570_v41 = vld [vmem:[#allocation3 + $0x10] sm:$0xff]  ;;  %v9573_v43 = vld [vmem:[#allocation3 + $0xe8] sm:$0xff] }
 0x105   :  { %4279 = vmatprep.mubr.f32.mxu0 %v11090_v0  ;;  %4345 = vmatprep.subr.mxu1 %v9114_v47  ;;  %v9466_v46 = vld [vmem:[#allocation3 + $0x158] sm:$0xf]  ;;  %11293 = vst [vmem:[#allocation16_spill] sm:$0xff] %v9570_v41 }
 0x106   :  { %7758 = vmatmul.mubr.msk.f32.vlgmr.msra.gmra.mxu0 %vm75_vm1, %v9373_v2  ;;  %4346 = vmatpush1.msra.mxu1 %v9121_v48  ;;  %v971_v36 = vpop.f32.mrf.mxu0  ;;  %v9514_v2 = vld [vmem:[#allocation3 + $0x130] sm:$0xff] }
 0x107   :  { %4379 = vmatprep.mubr.f32.mxu1 %v11090_v0  ;;  %7778 = vmatprep.subr.msk.mxu1 %vm4459_vm3, %v9447_v28  ;;  %v982_v19 = vadd.f32 %v971_v36, %v872_v56  ;;  %v9581_v56 = vld [vmem:[#allocation3 + $0xe0] sm:$0xff] }
 0x108   :  { %7772 = vmatmul.mubr.msk.f32.vlgmr.msra.gmra.mxu1 %vm75_vm1, %v7743_v23  ;;  %4285 = vmatprep.mubr.f32.mxu0 %v11090_v0  ;;  %v9468_v47 = vpop.f32.mrf.mxu1  ;;  %v973_v48 = vpop.f32.mrf.mxu0 }
 0x109   :  { %7779 = vmatpush1.msk.msra.mxu1 %vm4459_vm3, %v9455_v34  ;;  %4385 = vmatprep.mubr.f32.mxu1 %v11090_v0  ;;  %v983_v20 = vadd.f32 %v973_v48, %v874_v60 }
 0x10a   :  { %4567 = vmatprep.subr.mxu1 %v9460_v37  ;;  %7759 = vmatmul.mubr.msk.f32.gmra.mxu0 %vm75_vm1, %v7742_v33  ;;  %v9484_v50 = vpop.f32.mrf.mxu1 }
 0x10b   :  { %4568 = vmatpush1.msra.mxu1 %v9464_v45  ;;  %7774 = vmatprep.subr.msk.mxu0 %vm4459_vm3, %v9466_v46 }
 0x10c   :  { %4569 = vmatprep.subr.mxu1 %v9473_v40  ;;  %7773 = vmatmul.mubr.msk.f32.gmra.mxu1 %vm75_vm1, %v7761_v42  ;;  %v977_v57 = vpop.f32.mrf.mxu0 }
 0x10d   :  { %4570 = vmatpush1.msra.mxu1 %v9480_v44  ;;  %7775 = vmatpush1.msk.msra.mxu0 %vm4459_vm3, %v9482_v49  ;;  %v984_v63 = vadd.f32 %v977_v57, %v878_v53  ;;  %v9578_v53 = vld [vmem:[#allocation3 + $0x8] sm:$0xff] }
 0x10e   :  { %4571 = vmatprep.subr.mxu1 %v9487_v51  ;;  %4478 = vmatprep.subr.mxu0 %v9491_v52  ;;  %v1098_v3 = vpop.f32.mrf.mxu1  ;;  %v979_v4 = vpop.f32.mrf.mxu0  ;;  %11294 = vst [vmem:[#allocation17_spill] sm:$0xff] %v9578_v53 }
 0x10f   :  { %4572 = vmatpush1.msra.mxu1 %v9495_v54  ;;  %4479 = vmatpush1.msra.mxu0 %v9497_v55  ;;  %v985_v12 = vadd.f32 %v979_v4, %v880_v62  ;;  %v986_v30 = vmax.f32 %v982_v19, %v984_v63  ;;  %v9585_v62 = vld [vmem:[#allocation3] sm:$0xff]  ;;  %v9592_v4 = vld [vmem:[#allocation3 + $0xd0] sm:$0xff] }
 0x110   :  { %4573 = vmatprep.subr.mxu1 %v9502_v58  ;;  %4480 = vmatprep.subr.mxu0 %v9506_v59  ;;  %v1100_v16 = vpop.f32.mrf.mxu1  ;;  %11295 = vst [vmem:[#allocation18_spill] sm:$0xff] %v9585_v62 }
 0x111   :  { %4574 = vmatpush1.msra.mxu1 %v9511_v1  ;;  %4481 = vmatpush1.msra.mxu0 %v9514_v2  ;;  %v987_v31 = vmax.f32 %v983_v20, %v985_v12  ;;  %v9596_v20 = vld [vmem:[#allocation3 + $0xc8] sm:$0xff]  ;;  %v9730_v1 = vld [vmem:[#allocation3 + $0x240] sm:$0xff] }
 0x112   :  { %4575 = vmatprep.subr.mxu1 %v9517_v17  ;;  %4482 = vmatprep.subr.mxu0 %v9520_v18  ;;  %v1181_v33 = vpop.f32.mrf.mxu0  ;;  %v9716_v17 = vld [vmem:[#allocation3 + $0x250] sm:$0xff]  ;;  %11320 = vst [vmem:[#allocation42_spill] sm:$0xff] %v9730_v1 }
 0x113   :  { %4576 = vmatpush1.msra.mxu1 %v9523_v21  ;;  %4483 = vmatpush1.msra.mxu0 %v9526_v22  ;;  %v988_v29 = vmax.f32 %v986_v30, %v987_v31  ;;  %v1182_v36 = vadd.f32 %v1181_v33, %v9468_v47  ;;  %v9588_v47 = vld [vmem:[#allocation3 + $0xd8] sm:$0xff]  ;;  %11318 = vst [vmem:[#allocation40_spill] sm:$0xff] %v9716_v17 }
 0x114   :  { %4577 = vmatprep.subr.mxu1 %v9529_v25  ;;  %4484 = vmatprep.subr.mxu0 %v9532_v24  ;;  %v1281_v13 = vpop.f32.mrf.mxu1  ;;  %v1183_v35 = vpop.f32.mrf.mxu0  ;;  %v9700_v25 = vld [vmem:[#allocation3 + $0x1a0] sm:$0xff]  ;;  %v9702_v21 = vld [vmem:[#allocation3 + $0x258] sm:$0xff] }
 0x115   :  { %4578 = vmatpush1.msra.mxu1 %v9535_v32  ;;  %4485 = vmatpush1.msra.mxu0 %v9538_v27  ;;  %v989_v10 = vadd.f32 %v9363_v61, %v988_v29  ;;  %v1184_v48 = vadd.f32 %v1183_v35, %v9484_v50  ;;  %v1292_v12 = vadd.f32 %v1281_v13, %v1182_v36  ;;  %v9606_v29 = vld [vmem:[#allocation3 + $0xb8] sm:$0xff]  ;;  %v9618_v36 = vld [vmem:[#allocation3 + $0x208] sm:$0xf] }
 0x116   :  { %4579 = vmatprep.subr.mxu1 %v9541_v5  ;;  %4486 = vmatprep.subr.mxu0 %v9544_v7  ;;  %v1283_v23 = vpop.f32.mrf.mxu1  ;;  %v9608_v35 = vld [vmem:[#allocation3 + $0x2b8] sm:$0xf]  ;;  %v9696_v32 = vld [vmem:[#allocation3 + $0x1a8] sm:$0xff]  ;;  %11314 = vst [vmem:[#allocation37_spill] sm:$0xff] %v9700_v25  ;;  %11315 = vst [vmem:[#allocation38_spill] sm:$0xff] %v9702_v21 }
 0x117   :  { %4580 = vmatpush1.msra.mxu1 %v9547_v9  ;;  %4487 = vmatpush1.msra.mxu0 %v9550_v11  ;;  %v990_v39 = vmax.f32 %v989_v10, 0.0  ;;  %v1187_v26 = vpop.f32.mrf.mxu0  ;;  %v1293_v30 = vadd.f32 %v1283_v23, %v1184_v48  ;;  %11296 = vst [vmem:[#allocation19_spill] sm:$0xff] %v9608_v35  ;;  %v9611_v23 = vld [vmem:[#allocation3 + $0xb0] sm:$0xff]  ;;  %11313 = vst [vmem:[#allocation36_spill] sm:$0xff] %v9696_v32 }
 0x118   :  { %4581 = vmatprep.subr.mxu1 %v9553_v6  ;;  %4488 = vmatprep.subr.mxu0 %v9556_v8  ;;  %v1188_v42 = vadd.f32 %v1187_v26, %v1098_v3  ;;  %v4404_v3 = vld [vmem:[#allocation2] sm:$0xff]  ;;  %v9684_v6 = vld [vmem:[#allocation3 + $0x1b8] sm:$0xff] }
 0x119   :  { %4582 = vmatpush1.msra.mxu1 %v9560_v14  ;;  %4619 = vmatprep.mubr.f32.mxu1 %v11090_v0  ;;  %992 = vst.msk [vmem:[#allocation2 + $0x10] sm:$0xff] %vm371_vm2, %v990_v39  ;;  %v1287_v57 = vpop.f32.mrf.mxu1  ;;  %v1189_v60 = vpop.f32.mrf.mxu0  ;;  %v4428_v39 = vld [vmem:[#allocation2 + $0x8] sm:$0xff]  ;;  %11309 = vst [vmem:[#allocation32_spill] sm:$0xff] %v9684_v6  ;;  %v9690_v9 = vld [vmem:[#allocation3 + $0x1b0] sm:$0xff] }
 0x11a   :  { %4583 = vmatprep.subr.mxu1 %v9564_v15  ;;  %4489 = vmatpush1.msra.mxu0 %v9567_v38  ;;  %v1294_v50 = vadd.f32 %v1287_v57, %v1188_v42  ;;  %v1190_v63 = vadd.f32 %v1189_v60, %v1100_v16  ;;  %v9600_v16 = vld [vmem:[#allocation3 + $0xc0] sm:$0xff]  ;;  %v9627_v60 = vld [vmem:[#allocation3 + $0x2b0] sm:$0xf]  ;;  %11311 = vst [vmem:[#allocation34_spill] sm:$0xff] %v9690_v9 }
 0x11b   :  { %4584 = vmatpush1.msra.mxu1 %v9570_v41  ;;  %4490 = vmatprep.subr.mxu0 %v9573_v43  ;;  %v1289_v19 = vpop.f32.mrf.mxu1  ;;  %v9623_v57 = vld [vmem:[#allocation3 + $0x200] sm:$0xf]  ;;  %11297 = vst [vmem:[#allocation20_spill] sm:$0xff] %v9627_v60 }
 0x11c   :  { %4585 = vmatprep.subr.mxu1 %v9578_v53  ;;  %4491 = vmatpush1.msra.mxu0 %v9581_v56  ;;  %v1295_v31 = vadd.f32 %v1289_v19, %v1190_v63  ;;  %v1296_v10 = vmax.f32 %v1292_v12, %v1294_v50  ;;  %v9631_v50 = vld [vmem:[#allocation3 + $0x1f8] sm:$0xff]  ;;  %v9633_v63 = vld [vmem:[#allocation3 + $0x2a8] sm:$0xff]  ;;  %v9639_v19 = vld [vmem:[#allocation3 + $0x1f0] sm:$0xff] }
 0x11d   :  { %4586 = vmatpush1.msra.mxu1 %v9585_v62  ;;  %4492 = vmatprep.subr.mxu0 %v9588_v47  ;;  %v9602_v33 = vpop.f32.mrf.mxu0  ;;  %11298 = vst [vmem:[#allocation21_spill] sm:$0xff] %v9633_v63  ;;  %v9641_v12 = vld [vmem:[#allocation3 + $0x2a0] sm:$0xff] }
 0x11e   :  { %7780 = vmatmul.mubr.msk.f32.vlgmr.msra.gmra.mxu1 %vm371_vm2, %v4404_v3  ;;  %4493 = vmatpush1.msra.mxu0 %v9592_v4  ;;  %v1297_v13 = vmax.f32 %v1293_v30, %v1295_v31  ;;  %11299 = vst [vmem:[#allocation22_spill] sm:$0xff] %v9641_v12  ;;  %v9668_v62 = vld [vmem:[#allocation3 + $0x280] sm:$0xff] }
 0x11f   :  { %4494 = vmatprep.subr.mxu0 %v9596_v20  ;;  %4530 = vmatprep.mubr.f32.mxu0 %v11090_v0  ;;  %v9614_v26 = vpop.f32.mrf.mxu0  ;;  %11304 = vst [vmem:[#allocation27_spill] sm:$0xff] %v9668_v62  ;;  %v9678_v41 = vld [vmem:[#allocation3 + $0x1c0] sm:$0xff] }
 0x120   :  { %4495 = vmatpush1.msra.mxu0 %v9600_v16  ;;  %4625 = vmatprep.mubr.f32.mxu1 %v11090_v0  ;;  %v1298_v48 = vmax.f32 %v1296_v10, %v1297_v13  ;;  %v9620_v42 = vpop.f32.mrf.mxu1  ;;  %v9647_v10 = vld [vmem:[#allocation3 + $0x1e8] sm:$0xff]  ;;  %v9655_v0 = vld [vmem:[#allocation3 + $0x290] sm:$0xff]  ;;  %11307 = vst [vmem:[#allocation30_spill] sm:$0xff] %v9678_v41 }
 0x121   :  { %4496 = vmatprep.subr.mxu0 %v9606_v29  ;;  %7786 = vmatprep.subr.msk.mxu1 %vm4459_vm3, %v9608_v35  ;;  %11301 = vst [vmem:[#allocation24_spill] sm:$0xff] %v9655_v0 }
 0x122   :  { %4497 = vmatpush1.msra.mxu0 %v9611_v23  ;;  %7781 = vmatmul.mubr.msk.f32.gmra.mxu1 %vm371_vm2, %v4428_v39  ;;  %v1299_v3 = vadd.f32 %v9363_v61, %v1298_v48  ;;  %v1493_v31 = vpop.f32.mrf.mxu1  ;;  %v9649_v48 = vld [vmem:[#allocation3 + $0x298] sm:$0xff] }
 0x123   :  { %7782 = vmatprep.subr.msk.mxu0 %vm4459_vm3, %v9618_v36  ;;  %7776 = vmatmul.mubr.msk.f32.vlgmr.msra.gmra.mxu0 %vm371_vm2, %v4428_v39  ;;  %v1408_v30 = vpop.f32.mrf.mxu0  ;;  %11300 = vst [vmem:[#allocation23_spill] sm:$0xff] %v9649_v48  ;;  %v9653_v39 = vld [vmem:[#allocation3 + $0x1e0] sm:$0xff] }
 0x124   :  { %7783 = vmatpush1.msk.msra.mxu0 %vm4459_vm3, %v9623_v57  ;;  %7787 = vmatpush1.msk.msra.mxu1 %vm4459_vm3, %v9627_v60  ;;  %v1300_v13 = vmax.f32 %v1299_v3, 0.0  ;;  %v9660_v60 = vld [vmem:[#allocation3 + $0x1d8] sm:$0xff]  ;;  %v9662_v3 = vld [vmem:[#allocation3 + $0x288] sm:$0xff] }
 0x125   :  { %4681 = vmatprep.subr.mxu0 %v9631_v50  ;;  %4799 = vmatprep.subr.mxu1 %v9633_v63  ;;  %v1410_v35 = vpop.f32.mrf.mxu0  ;;  %11302 = vst [vmem:[#allocation25_spill] sm:$0xff] %v9662_v3  ;;  %v9666_v63 = vld [vmem:[#allocation3 + $0x1d0] sm:$0xff] }
 0x126   :  { %4682 = vmatpush1.msra.mxu0 %v9639_v19  ;;  %1302 = vst.msk [vmem:[#allocation2 + $0x18] sm:$0xff] %vm371_vm2, %v1300_v13  ;;  %4800 = vmatpush1.msra.mxu1 %v9641_v12  ;;  %11303 = vst [vmem:[#allocation26_spill] sm:$0xff] %v9666_v63  ;;  %v9672_v13 = vld [vmem:[#allocation3 + $0x1c8] sm:$0xff]  ;;  %v9674_v12 = vld [vmem:[#allocation3 + $0x278] sm:$0xff] }
 0x127   :  { %4683 = vmatprep.subr.mxu0 %v9647_v10  ;;  %4801 = vmatprep.subr.mxu1 %v9649_v48  ;;  %v1497_v53 = vpop.f32.mrf.mxu1  ;;  %11305 = vst [vmem:[#allocation28_spill] sm:$0xff] %v9672_v13  ;;  %11306 = vst [vmem:[#allocation29_spill] sm:$0xff] %v9674_v12  ;;  %v9680_v48 = vld [vmem:[#allocation3 + $0x270] sm:$0xff] }
 0x128   :  { %4684 = vmatpush1.msra.mxu0 %v9653_v39  ;;  %4802 = vmatpush1.msra.mxu1 %v9655_v0  ;;  %11308 = vst [vmem:[#allocation31_spill] sm:$0xff] %v9680_v48  ;;  %v9686_v0 = vld [vmem:[#allocation3 + $0x268] sm:$0xff] }
 0x129   :  { %4685 = vmatprep.subr.mxu0 %v9660_v60  ;;  %4803 = vmatprep.subr.mxu1 %v9662_v3  ;;  %v1499_v15 = vpop.f32.mrf.mxu1  ;;  %v1591_v14 = vpop.f32.mrf.mxu0  ;;  %11310 = vst [vmem:[#allocation33_spill] sm:$0xff] %v9686_v0  ;;  %v9692_v3 = vld [vmem:[#allocation3 + $0x260] sm:$0xff] }
 0x12a   :  { %4686 = vmatpush1.msra.mxu0 %v9666_v63  ;;  %4804 = vmatpush1.msra.mxu1 %v9668_v62  ;;  %11312 = vst [vmem:[#allocation35_spill] sm:$0xff] %v9692_v3 }
 0x12b   :  { %4687 = vmatprep.subr.mxu0 %v9672_v13  ;;  %4805 = vmatprep.subr.mxu1 %v9674_v12  ;;  %v1593_v5 = vpop.f32.mrf.mxu0  ;;  %v1498_v12 = vadd.f32 %v1497_v53, %v1408_v30  ;;  %v9706_v13 = vld [vmem:[#allocation3 + $0x198] sm:$0xff]  ;;  %v1494_v53 = vadd.f32 %v1493_v31, %v9614_v26  ;;  %v1500_v30 = vadd.f32 %v1499_v15, %v1410_v35 }
 0x12c   :  { %4688 = vmatpush1.msra.mxu0 %v9678_v41  ;;  %4806 = vmatpush1.msra.mxu1 %v9680_v48  ;;  %v1712_v62 = vpop.f32.mrf.mxu1  ;;  %11316 = vst [vmem:[#allocation39_spill] sm:$0xff] %v9706_v13  ;;  %v9708_v41 = vld [vmem:[#allocation2 + $0x10] sm:$0xff]  ;;  %v1492_v48 = vadd.f32 %v9620_v42, %v9602_v33  ;;  %v9723_v33 = vld [vmem:[#allocation3 + $0x248] sm:$0xff]  ;;  %v9734_v35 = vld [vmem:[#allocation3 + $0x178] sm:$0xff] }
 0x12d   :  { %4689 = vmatprep.subr.mxu0 %v9684_v6  ;;  %4807 = vmatprep.subr.mxu1 %v9686_v0  ;;  %v11317_v6 = vmov 0.0   ;;  %v9714_v0 = vld [vmem:[#allocation3 + $0x190] sm:$0xff]  ;;  %11319 = vst [vmem:[#allocation41_spill] sm:$0xff] %v9723_v33  ;;  %v1603_v15 = vadd.f32 %v1593_v5, %v1494_v53  ;;  %v9748_v53 = vld [vmem:[#allocation3 + $0x228] sm:$0xff] }
 0x12e   :  { %4690 = vmatpush1.msra.mxu0 %v9690_v9  ;;  %4808 = vmatpush1.msra.mxu1 %v9692_v3  ;;  %v1714_v9 = vpop.f32.mrf.mxu1  ;;  %v9721_v3 = vld [vmem:[#allocation3 + $0x188] sm:$0xff]  ;;  %v1602_v31 = vadd.f32 %v1591_v14, %v1492_v48  ;;  %11325 = vst [vmem:[#allocation47_spill] sm:$0xff] %v9748_v53 }
 0x12f   :  { %4691 = vmatprep.subr.mxu0 %v9696_v32  ;;  %4536 = vmatprep.mubr.f32.mxu0 %v11317_v6  ;;  %v1597_v63 = vpop.f32.mrf.mxu0  ;;  %v9728_v32 = vld [vmem:[#allocation3 + $0x180] sm:$0xff]  ;;  %v9746_v48 = vld [vmem:[#allocation3 + $0x168] sm:$0xff] }
 0x130   :  { %4692 = vmatpush1.msra.mxu0 %v9700_v25  ;;  %4809 = vmatprep.subr.mxu1 %v9702_v21  ;;  %v1604_v42 = vadd.f32 %v1597_v63, %v1498_v12  ;;  %v9736_v21 = vld [vmem:[#allocation3 + $0x238] sm:$0xff]  ;;  %v9740_v12 = vld [vmem:[#allocation3 + $0x170] sm:$0xff]  ;;  %11324 = vst [vmem:[#allocation46_spill] sm:$0xff] %v9746_v48 }
 0x131   :  { %4693 = vmatprep.subr.mxu0 %v9706_v13  ;;  %7777 = vmatmul.mubr.msk.f32.gmra.mxu0 %vm371_vm2, %v9708_v41  ;;  %v1599_v26 = vpop.f32.mrf.mxu0  ;;  %11321 = vst [vmem:[#allocation43_spill] sm:$0xff] %v9736_v21  ;;  %11322 = vst [vmem:[#allocation44_spill] sm:$0xff] %v9740_v12  ;;  %v9742_v13 = vld [vmem:[#allocation3 + $0x230] sm:$0xff] }
 0x132   :  { %4694 = vmatpush1.msra.mxu0 %v9714_v0  ;;  %4810 = vmatpush1.msra.mxu1 %v9716_v17  ;;  %v1605_v63 = vadd.f32 %v1599_v26, %v1500_v30  ;;  %11323 = vst [vmem:[#allocation45_spill] sm:$0xff] %v9742_v13  ;;  %v1606_v14 = vmax.f32 %v1602_v31, %v1604_v42  ;;  %v9752_v30 = vld [vmem:[#allocation3 + $0x160] sm:$0xff]  ;;  %v9760_v31 = vld [vmem:[#allocation3 + $0x218] sm:$0xff] }
 0x133   :  { %4695 = vmatprep.subr.mxu0 %v9721_v3  ;;  %4811 = vmatprep.subr.mxu1 %v9723_v33  ;;  %v1718_v25 = vpop.f32.mrf.mxu1  ;;  %11326 = vst [vmem:[#allocation48_spill] sm:$0xff] %v9752_v30  ;;  %11328 = vst [vmem:[#allocation50_spill] sm:$0xff] %v9760_v31 }
 0x134   :  { %4696 = vmatpush1.msra.mxu0 %v9728_v32  ;;  %4812 = vmatpush1.msra.mxu1 %v9730_v1  ;;  %v1607_v5 = vmax.f32 %v1603_v15, %v1605_v63  ;;  %v9756_v1 = vld [vmem:[#allocation3 + $0x220] sm:$0xff]  ;;  %v9762_v15 = vld [vmem:[#allocation3 + $0x368] sm:$0xf] }
 0x135   :  { %4697 = vmatprep.subr.mxu0 %v9734_v35  ;;  %4813 = vmatprep.subr.mxu1 %v9736_v21  ;;  %v1720_v26 = vpop.f32.mrf.mxu1  ;;  %v1801_v33 = vpop.f32.mrf.mxu0  ;;  %11327 = vst [vmem:[#allocation49_spill] sm:$0xff] %v9756_v1 }
 0x136   :  { %4698 = vmatpush1.msra.mxu0 %v9740_v12  ;;  %4814 = vmatpush1.msra.mxu1 %v9742_v13  ;;  %v1608_v17 = vmax.f32 %v1606_v14, %v1607_v5  ;;  %v1802_v42 = vadd.f32 %v1801_v33, %v1712_v62  ;;  %v9767_v13 = vld [vmem:[#allocation3 + $0x210] sm:$0xff]  ;;  %v9769_v14 = vld [vmem:[#allocation3 + $0x360] sm:$0xf]  ;;  %v9774_v33 = vld [vmem:[#allocation3 + $0x358] sm:$0xff] }
 0x137   :  { %4699 = vmatprep.subr.mxu0 %v9746_v48  ;;  %4815 = vmatprep.subr.mxu1 %v9748_v53  ;;  %v1803_v63 = vpop.f32.mrf.mxu0  ;;  %11329 = vst [vmem:[#allocation51_spill] sm:$0xff] %v9767_v13  ;;  %v9782_v12 = vld [vmem:[#allocation2 + $0x18] sm:$0xff] }
 0x138   :  { %v1609_v21 = vadd.f32 %v9363_v61, %v1608_v17  ;;  %4700 = vmatpush1.msra.mxu0 %v9752_v30  ;;  %4733 = vmatprep.mubr.f32.mxu0 %v11317_v6  ;;  %v1901_v5 = vpop.f32.mrf.mxu1  ;;  %v1804_v62 = vadd.f32 %v1803_v63, %v1714_v9  ;;  %v9784_v9 = vld [vmem:[#allocation3 + $0x350] sm:$0xff] }
 0x139   :  { %4816 = vmatpush1.msra.mxu1 %v9756_v1  ;;  %7784 = vmatmul.mubr.msk.f32.vlgmr.msra.gmra.mxu0 %vm371_vm2, %v9708_v41  ;;  %v1807_v53 = vpop.f32.mrf.mxu0  ;;  %v1912_v1 = vadd.f32 %v1901_v5, %v1802_v42  ;;  %v9792_v42 = vld [vmem:[#allocation3 + $0x348] sm:$0xff] }
 0x13a   :  { %v1610_v48 = vmax.f32 %v1609_v21, 0.0  ;;  %4817 = vmatprep.subr.mxu1 %v9760_v31  ;;  %7790 = vmatprep.subr.msk.mxu0 %vm4459_vm3, %v9762_v15  ;;  %v1808_v17 = vadd.f32 %v1807_v53, %v1718_v25  ;;  %v1903_v30 = vpop.f32.mrf.mxu1  ;;  %v9866_v31 = vld [vmem:[#allocation3 + $0x2c8] sm:$0xff] }
 0x13b   :  { %4818 = vmatpush1.msra.mxu1 %v9767_v13  ;;  %7791 = vmatpush1.msk.msra.mxu0 %vm4459_vm3, %v9769_v14  ;;  %v1809_v63 = vpop.f32.mrf.mxu0  ;;  %v1913_v53 = vadd.f32 %v1903_v30, %v1804_v62  ;;  %v9807_v62 = vld [vmem:[#allocation3 + $0x330] sm:$0xff] }
 0x13c   :  { %1612 = vst.msk [vmem:[#allocation2 + $0x20] sm:$0xff] %vm371_vm2, %v1610_v48  ;;  %4851 = vmatprep.mubr.f32.mxu1 %v11317_v6  ;;  %4917 = vmatprep.subr.mxu0 %v9774_v33  ;;  %v1810_v21 = vadd.f32 %v1809_v63, %v1720_v26  ;;  %v1907_v25 = vpop.f32.mrf.mxu1  ;;  %v9797_v48 = vld [vmem:[#allocation3 + $0x340] sm:$0xff]  ;;  %v9803_v26 = vld [vmem:[#allocation3 + $0x338] sm:$0xff]  ;;  %v9811_v63 = vld [vmem:[#allocation3 + $0x328] sm:$0xff] }
 0x13d   :  { %7795 = vmatprep.subr.msk.mxu1 %vm4459_vm3, %v9466_v46  ;;  %4739 = vmatprep.mubr.f32.mxu0 %v11317_v6  ;;  %v1914_v5 = vadd.f32 %v1907_v25, %v1808_v17 }
 0x13e   :  { %7788 = vmatmul.mubr.msk.f32.vlgmr.msra.gmra.mxu1 %vm371_vm2, %v9782_v12  ;;  %4918 = vmatpush1.msra.mxu0 %v9784_v9  ;;  %v1909_v13 = vpop.f32.mrf.mxu1 }
 0x13f   :  { %7796 = vmatpush1.msk.msra.mxu1 %vm4459_vm3, %v9482_v49  ;;  %7785 = vmatmul.mubr.msk.f32.gmra.mxu0 %vm371_vm2, %v9782_v12  ;;  %v1916_v46 = vmax.f32 %v1912_v1, %v1914_v5  ;;  %v1915_v30 = vadd.f32 %v1909_v13, %v1810_v21  ;;  %v9815_v1 = vld [vmem:[#allocation3 + $0x320] sm:$0xff]  ;;  %v9819_v13 = vld [vmem:[#allocation3 + $0x318] sm:$0xff] }
 0x140   :  { %4919 = vmatprep.subr.mxu0 %v9792_v42  ;;  %5019 = vmatprep.subr.mxu1 %v9491_v52 }
 0x141   :  { %4920 = vmatpush1.msra.mxu0 %v9797_v48  ;;  %5020 = vmatpush1.msra.mxu1 %v9497_v55  ;;  %v1917_v17 = vmax.f32 %v1913_v53, %v1915_v30  ;;  %v2022_v49 = vpop.f32.mrf.mxu0  ;;  %v9823_v55 = vld [vmem:[#allocation3 + $0x310] sm:$0xff] }
 0x142   :  { %4921 = vmatprep.subr.mxu0 %v9803_v26  ;;  %5021 = vmatprep.subr.mxu1 %v9506_v59  ;;  %v9828_v59 = vld [vmem:[#allocation3 + $0x308] sm:$0xff] }
 0x143   :  { %4922 = vmatpush1.msra.mxu0 %v9807_v62  ;;  %5022 = vmatpush1.msra.mxu1 %v9514_v2  ;;  %v1918_v52 = vmax.f32 %v1916_v46, %v1917_v17  ;;  %v2024_v21 = vpop.f32.mrf.mxu0  ;;  %v9832_v2 = vld [vmem:[#allocation3 + $0x300] sm:$0xff] }
 0x144   :  { %4923 = vmatprep.subr.mxu0 %v9811_v63  ;;  %5023 = vmatprep.subr.mxu1 %v9520_v18  ;;  %v2111_v25 = vpop.f32.mrf.mxu1  ;;  %11330 = vst [vmem:[#allocation52_spill] sm:$0xff] %v9832_v2  ;;  %v9836_v18 = vld [vmem:[#allocation3 + $0x2f8] sm:$0xff] }
 0x145   :  { %v1919_v53 = vadd.f32 %v9363_v61, %v1918_v52  ;;  %4924 = vmatpush1.msra.mxu0 %v9815_v1  ;;  %5024 = vmatpush1.msra.mxu1 %v9526_v22  ;;  %11331 = vst [vmem:[#allocation53_spill] sm:$0xff] %v9836_v18  ;;  %v9840_v22 = vld [vmem:[#allocation3 + $0x2f0] sm:$0xff] }
 0x146   :  { %4925 = vmatprep.subr.mxu0 %v9819_v13  ;;  %5025 = vmatprep.subr.mxu1 %v9532_v24  ;;  %v2113_v30 = vpop.f32.mrf.mxu1  ;;  %11332 = vst [vmem:[#allocation54_spill] sm:$0xff] %v9840_v22  ;;  %v9845_v24 = vld [vmem:[#allocation3 + $0x2e8] sm:$0xff] }
 0x147   :  { %v1920_v5 = vmax.f32 %v1919_v53, 0.0  ;;  %4926 = vmatpush1.msra.mxu0 %v9823_v55  ;;  %5026 = vmatpush1.msra.mxu1 %v9538_v27  ;;  %v2028_v46 = vpop.f32.mrf.mxu0  ;;  %11333 = vst [vmem:[#allocation55_spill] sm:$0xff] %v9845_v24  ;;  %v9849_v27 = vld [vmem:[#allocation2 + $0x20] sm:$0xff] }
 0x148   :  { %4927 = vmatprep.subr.mxu0 %v9828_v59  ;;  %5027 = vmatprep.subr.mxu1 %v9544_v7  ;;  %v9853_v7 = vld [vmem:[#allocation3 + $0x2e0] sm:$0xff] }
 0x149   :  { %1922 = vst.msk [vmem:[#allocation2 + $0x28] sm:$0xff] %vm371_vm2, %v1920_v5  ;;  %4928 = vmatpush1.msra.mxu0 %v9832_v2  ;;  %5028 = vmatpush1.msra.mxu1 %v9550_v11  ;;  %v2030_v17 = vpop.f32.mrf.mxu0  ;;  %v9857_v11 = vld [vmem:[#allocation3 + $0x2d8] sm:$0xff] }
 0x14a   :  { %4929 = vmatprep.subr.mxu0 %v9836_v18  ;;  %5029 = vmatprep.subr.mxu1 %v9556_v8  ;;  %v9862_v8 = vld [vmem:[#allocation3 + $0x2d0] sm:$0xff] }
 0x14b   :  { %4930 = vmatpush1.msra.mxu0 %v9840_v22  ;;  %5030 = vmatpush1.msra.mxu1 %v9567_v38  ;;  %v2117_v52 = vpop.f32.mrf.mxu1  ;;  %v2112_v38 = vadd.f32 %v2111_v25, %v2022_v49  ;;  %v2114_v22 = vadd.f32 %v2113_v30, %v2024_v21 }
 0x14c   :  { %4857 = vmatprep.mubr.f32.mxu1 %v11317_v6  ;;  %4931 = vmatprep.subr.mxu0 %v9845_v24  ;;  %v9870_v24 = vld [vmem:[#allocation3 + $0x2c0] sm:$0xff]  ;;  %v2118_v18 = vadd.f32 %v2117_v52, %v2028_v46 }
 0x14d   :  { %5031 = vmatprep.subr.mxu1 %v9573_v43  ;;  %7789 = vmatmul.mubr.msk.f32.gmra.mxu1 %vm371_vm2, %v9849_v27  ;;  %v2119_v53 = vpop.f32.mrf.mxu1  ;;  %v2211_v5 = vpop.f32.mrf.mxu0 }
 0x14e   :  { %4932 = vmatpush1.msra.mxu0 %v9853_v7  ;;  %5032 = vmatpush1.msra.mxu1 %v9581_v56  ;;  %v2120_v56 = vadd.f32 %v2119_v53, %v2030_v17  ;;  %v11335_v17 = vld [vmem:[#allocation26_spill] sm:$0xff] }
 0x14f   :  { %4933 = vmatprep.subr.mxu0 %v9857_v11  ;;  %5033 = vmatprep.subr.mxu1 %v9588_v47  ;;  %v2213_v43 = vpop.f32.mrf.mxu0  ;;  %v2222_v47 = vadd.f32 %v2211_v5, %v2112_v38  ;;  %v11338_v38 = vld [vmem:[#allocation8_spill] sm:$0xff] }
 0x150   :  { %4934 = vmatpush1.msra.mxu0 %v9862_v8  ;;  %5034 = vmatpush1.msra.mxu1 %v9592_v4  ;;  %v2332_v2 = vpop.f32.mrf.mxu1  ;;  %v2223_v21 = vadd.f32 %v2213_v43, %v2114_v22  ;;  %v11340_v43 = vld [vmem:[#allocation9_spill] sm:$0xff] }
 0x151   :  { %4935 = vmatprep.subr.mxu0 %v9866_v31  ;;  %5035 = vmatprep.subr.mxu1 %v9596_v20 }
 0x152   :  { %4936 = vmatpush1.msra.mxu0 %v9870_v24  ;;  %4969 = vmatprep.mubr.f32.mxu0 %v11317_v6  ;;  %v2334_v4 = vpop.f32.mrf.mxu1 }
 0x153   :  { %5036 = vmatpush1.msra.mxu1 %v9600_v16  ;;  %7792 = vmatmul.mubr.msk.f32.vlgmr.msra.gmra.mxu0 %vm371_vm2, %v9849_v27  ;;  %v2217_v49 = vpop.f32.mrf.mxu0 }
 0x154   :  { %5037 = vmatprep.subr.mxu1 %v9606_v29  ;;  %7799 = vmatprep.subr.msk.mxu0 %vm4459_vm3, %v9447_v28  ;;  %v2224_v20 = vadd.f32 %v2217_v49, %v2118_v18  ;;  %v9893_v28 = vld [vmem:[#allocation2 + $0x28] sm:$0xff] }
 0x155   :  { %5038 = vmatpush1.msra.mxu1 %v9611_v23  ;;  %5071 = vmatprep.mubr.f32.mxu1 %v11317_v6  ;;  %v2219_v25 = vpop.f32.mrf.mxu0 }
 0x156   :  { %7800 = vmatpush1.msk.msra.mxu0 %vm4459_vm3, %v9455_v34  ;;  %7797 = vmatmul.mubr.msk.f32.vlgmr.msra.gmra.mxu1 %vm371_vm2, %v9782_v12  ;;  %v2226_v16 = vmax.f32 %v2222_v47, %v2224_v20  ;;  %v2225_v46 = vadd.f32 %v2219_v25, %v2120_v56  ;;  %v11341_v56 = vld [vmem:[#allocation32_spill] sm:$0xff]  ;;  %v11344_v20 = vld [vmem:[#allocation11_spill] sm:$0xff] }
 0x157   :  { %5096 = vmatprep.subr.mxu0 %v9460_v37  ;;  %7803 = vmatprep.subr.msk.mxu1 %vm4459_vm3, %v9618_v36  ;;  %v2338_v29 = vpop.f32.mrf.mxu1  ;;  %v11345_v25 = vld [vmem:[#allocation36_spill] sm:$0xff] }
 0x158   :  { %5097 = vmatpush1.msra.mxu0 %v9464_v45  ;;  %7804 = vmatpush1.msk.msra.mxu1 %vm4459_vm3, %v9623_v57  ;;  %v2227_v23 = vmax.f32 %v2223_v21, %v2225_v46  ;;  %v11343_v21 = vld [vmem:[#allocation34_spill] sm:$0xff]  ;;  %v11346_v46 = vld [vmem:[#allocation12_spill] sm:$0xff] }
 0x159   :  { %4975 = vmatprep.mubr.f32.mxu0 %v11317_v6  ;;  %5098 = vmatprep.subr.mxu0 %v9473_v40  ;;  %v2340_v34 = vpop.f32.mrf.mxu1  ;;  %v2421_v18 = vpop.f32.mrf.mxu0 }
 0x15a   :  { %5173 = vmatprep.subr.mxu1 %v9631_v50  ;;  %7793 = vmatmul.mubr.msk.f32.gmra.mxu0 %vm371_vm2, %v9893_v28  ;;  %v2228_v37 = vmax.f32 %v2226_v16, %v2227_v23  ;;  %v2422_v45 = vadd.f32 %v2421_v18, %v2332_v2  ;;  %v11349_v18 = vld [vmem:[#allocation39_spill] sm:$0xff] }
 0x15b   :  { %5077 = vmatprep.mubr.f32.mxu1 %v11317_v6  ;;  %5099 = vmatpush1.msra.mxu0 %v9480_v44  ;;  %v2423_v36 = vpop.f32.mrf.mxu0 }
 0x15c   :  { %5174 = vmatpush1.msra.mxu1 %v9639_v19  ;;  %5100 = vmatprep.subr.mxu0 %v9487_v51  ;;  %v2229_v40 = vadd.f32 %v9363_v61, %v2228_v37  ;;  %v2521_v57 = vpop.f32.mrf.mxu1  ;;  %v2424_v50 = vadd.f32 %v2423_v36, %v2334_v4  ;;  %v11334_v19 = vld [vmem:[#allocation6_spill] sm:$0xff] }
 0x15d   :  { %7798 = vmatmul.mubr.msk.f32.gmra.mxu1 %vm371_vm2, %v9849_v27  ;;  %5175 = vmatprep.subr.mxu1 %v9647_v10  ;;  %v2427_v30 = vpop.f32.mrf.mxu0  ;;  %v2532_v61 = vadd.f32 %v2521_v57, %v2422_v45  ;;  %v11342_v4 = vld [vmem:[#allocation10_spill] sm:$0xff] }
 0x15e   :  { %5101 = vmatpush1.msra.mxu0 %v9495_v54  ;;  %5176 = vmatpush1.msra.mxu1 %v9653_v39  ;;  %v2230_v44 = vmax.f32 %v2229_v40, 0.0  ;;  %v2428_v2 = vadd.f32 %v2427_v30, %v2338_v29  ;;  %v2523_v22 = vpop.f32.mrf.mxu1  ;;  %v11336_v54 = vld [vmem:[#allocation7_spill] sm:$0xff]  ;;  %v11337_v39 = vld [vmem:[#allocation28_spill] sm:$0xff]  ;;  %v11347_v29 = vld [vmem:[#allocation37_spill] sm:$0xff] }
 0x15f   :  { %5102 = vmatprep.subr.mxu0 %v9502_v58  ;;  %5177 = vmatprep.subr.mxu1 %v9660_v60  ;;  %v2429_v51 = vpop.f32.mrf.mxu0  ;;  %v2533_v53 = vadd.f32 %v2523_v22, %v2424_v50  ;;  %v11339_v58 = vld [vmem:[#allocation30_spill] sm:$0xff]  ;;  %v11351_v40 = vld [vmem:[#allocation15_spill] sm:$0xff]  ;;  %v11353_v22 = vld [vmem:[#allocation17_spill] sm:$0xff] }
 0x160   :  { %5103 = vmatpush1.msra.mxu0 %v11334_v19  ;;  %5178 = vmatpush1.msra.mxu1 %v11335_v17  ;;  %2232 = vst.msk [vmem:[#allocation2 + $0x30] sm:$0xff] %vm371_vm2, %v2230_v44  ;;  %v2430_v10 = vadd.f32 %v2429_v51, %v2340_v34  ;;  %v2527_v52 = vpop.f32.mrf.mxu1  ;;  %v11348_v34 = vld [vmem:[#allocation13_spill] sm:$0xff]  ;;  %v11350_v45 = vld [vmem:[#allocation14_spill] sm:$0xff]  ;;  %v11352_v44 = vld [vmem:[#allocation16_spill] sm:$0xff] }
 0x161   :  { %5104 = vmatprep.subr.mxu0 %v11336_v54  ;;  %5179 = vmatprep.subr.mxu1 %v11337_v39  ;;  %v2534_v5 = vadd.f32 %v2527_v52, %v2428_v2  ;;  %v9939_v57 = vld [vmem:[%s11080_s2] ss:$0 sm:$0xff]  ;;  %v11355_v51 = vld [vmem:[#allocation44_spill] sm:$0xff]  ;;  %v11360_v54 = vld [vmem:[#allocation21_spill] sm:$0xff] }
 0x162   :  { %5105 = vmatpush1.msra.mxu0 %v11338_v38  ;;  %5180 = vmatpush1.msra.mxu1 %v11339_v58  ;;  %v2529_v60 = vpop.f32.mrf.mxu1  ;;  %v11356_v19 = vld [vmem:[#allocation46_spill] sm:$0xff]  ;;  %v11359_v52 = vld [vmem:[#allocation20_spill] sm:$0xff]  ;;  %v11362_v38 = vld [vmem:[#allocation23_spill] sm:$0xff] }
 0x163   :  { %5106 = vmatprep.subr.mxu0 %v11340_v43  ;;  %5181 = vmatprep.subr.mxu1 %v11341_v56  ;;  %v2536_v47 = vmax.f32 %v2532_v61, %v2534_v5  ;;  %v2535_v49 = vadd.f32 %v2529_v60, %v2430_v10  ;;  %v11354_v61 = vld [vmem:[#allocation18_spill] sm:$0xff] }
 0x164   :  { %5107 = vmatpush1.msra.mxu0 %v11342_v4  ;;  %5182 = vmatpush1.msra.mxu1 %v11343_v21  ;;  %v11361_v39 = vld [vmem:[#allocation22_spill] sm:$0xff]  ;;  %v11366_v21 = vld [vmem:[#allocation29_spill] sm:$0xff] }
 0x165   :  { %5108 = vmatprep.subr.mxu0 %v11344_v20  ;;  %5183 = vmatprep.subr.mxu1 %v11345_v25  ;;  %v2537_v16 = vmax.f32 %v2533_v53, %v2535_v49  ;;  %v11365_v49 = vld [vmem:[#allocation27_spill] sm:$0xff] }
 0x166   :  { %5109 = vmatpush1.msra.mxu0 %v11346_v46  ;;  %5184 = vmatpush1.msra.mxu1 %v11347_v29  ;;  %v2642_v23 = vpop.f32.mrf.mxu0  ;;  %v11367_v25 = vld [vmem:[#allocation31_spill] sm:$0xff] }
 0x167   :  { %5110 = vmatprep.subr.mxu0 %v11348_v34  ;;  %5185 = vmatprep.subr.mxu1 %v11349_v18  ;;  %v2538_v37 = vmax.f32 %v2536_v47, %v2537_v16  ;;  %v11364_v47 = vld [vmem:[#allocation25_spill] sm:$0xff]  ;;  %v11370_v34 = vld [vmem:[#allocation38_spill] sm:$0xff] }
 0x168   :  { %5111 = vmatpush1.msra.mxu0 %v11350_v45  ;;  %5186 = vmatpush1.msra.mxu1 %v9714_v0  ;;  %v2644_v36 = vpop.f32.mrf.mxu0  ;;  %v11372_v45 = vld [vmem:[#allocation41_spill] sm:$0xff] }
 0x169   :  { %5112 = vmatprep.subr.mxu0 %v11351_v40  ;;  %5187 = vmatprep.subr.mxu1 %v9721_v3  ;;  %v2539_v50 = vadd.f32 %v9939_v57, %v2538_v37  ;;  %v2731_v30 = vpop.f32.mrf.mxu1  ;;  %v11371_v37 = vld [vmem:[#allocation40_spill] sm:$0xff] }
 0x16a   :  { %5113 = vmatpush1.msra.mxu0 %v11352_v44  ;;  %5188 = vmatpush1.msra.mxu1 %v9728_v32  ;;  %v11357_v32 = vld [vmem:[#allocation19_spill] sm:$0xff]  ;;  %v2732_v5 = vadd.f32 %v2731_v30, %v2642_v23  ;;  %v11374_v40 = vld [vmem:[#allocation52_spill] sm:$0xff] }
 0x16b   :  { %v2540_v2 = vmax.f32 %v2539_v50, 0.0  ;;  %5114 = vmatprep.subr.mxu0 %v11353_v22  ;;  %5189 = vmatprep.subr.mxu1 %v9734_v35  ;;  %v2733_v0 = vpop.f32.mrf.mxu1  ;;  %v11358_v35 = vld [vmem:[#allocation48_spill] sm:$0xff]  ;;  %v11375_v50 = vld [vmem:[#allocation43_spill] sm:$0xff] }
 0x16c   :  { %5115 = vmatpush1.msra.mxu0 %v11354_v61  ;;  %5148 = vmatprep.mubr.f32.mxu0 %v11317_v6  ;;  %v2648_v3 = vpop.f32.mrf.mxu0  ;;  %v2734_v60 = vadd.f32 %v2733_v0, %v2644_v36  ;;  %v11373_v36 = vld [vmem:[#allocation42_spill] sm:$0xff]  ;;  %v11379_v0 = vld [vmem:[#allocation47_spill] sm:$0xff] }
 0x16d   :  { %2542 = vst.msk [vmem:[#allocation2 + $0x38] sm:$0xff] %vm371_vm2, %v2540_v2  ;;  %5190 = vmatpush1.msra.mxu1 %v11355_v51  ;;  %7801 = vmatmul.mubr.msk.f32.vlgmr.msra.gmra.mxu0 %vm371_vm2, %v9708_v41  ;;  %v11377_v2 = vld [vmem:[#allocation45_spill] sm:$0xff] }
 0x16e   :  { %5191 = vmatprep.subr.mxu1 %v11356_v19  ;;  %7807 = vmatprep.subr.msk.mxu0 %vm4459_vm3, %v11357_v32  ;;  %v2650_v17 = vpop.f32.mrf.mxu0  ;;  %v11381_v51 = vld [vmem:[#allocation49_spill] sm:$0xff] }
 0x16f   :  { %5192 = vmatpush1.msra.mxu1 %v11358_v35  ;;  %5225 = vmatprep.mubr.f32.mxu1 %v11317_v6  ;;  %v2737_v10 = vpop.f32.mrf.mxu1 }
 0x170   :  { %7808 = vmatpush1.msk.msra.mxu0 %vm4459_vm3, %v11359_v52  ;;  %7805 = vmatmul.mubr.msk.f32.vlgmr.msra.gmra.mxu1 %vm371_vm2, %v9849_v27  ;;  %v2738_v43 = vadd.f32 %v2737_v10, %v2648_v3  ;;  %v11383_v10 = vld [vmem:[#allocation51_spill] sm:$0xff] }
 0x171   :  { %5262 = vmatprep.subr.mxu0 %v11360_v54  ;;  %7811 = vmatprep.subr.msk.mxu1 %vm4459_vm3, %v9762_v15  ;;  %v2739_v41 = vpop.f32.mrf.mxu1  ;;  %v11363_v15 = vld [vmem:[#allocation24_spill] sm:$0xff] }
 0x172   :  { %5154 = vmatprep.mubr.f32.mxu0 %v11317_v6  ;;  %5263 = vmatpush1.msra.mxu0 %v11361_v39  ;;  %v2831_v53 = vpop.f32.mrf.mxu0 }
 0x173   :  { %7812 = vmatpush1.msk.msra.mxu1 %vm4459_vm3, %v9769_v14  ;;  %7802 = vmatmul.mubr.msk.f32.gmra.mxu0 %vm371_vm2, %v9782_v12  ;;  %v2740_v12 = vadd.f32 %v2739_v41, %v2650_v17  ;;  %v2842_v14 = vadd.f32 %v2831_v53, %v2732_v5  ;;  %v11382_v17 = vld [vmem:[#allocation50_spill] sm:$0xff]  ;;  %v10017_v53 = vld [vmem:[#allocation2 + $0x30] sm:$0xff] }
 0x174   :  { %5264 = vmatprep.subr.mxu0 %v11362_v38  ;;  %5351 = vmatprep.subr.mxu1 %v9774_v33  ;;  %v2833_v58 = vpop.f32.mrf.mxu0 }
 0x175   :  { %5231 = vmatprep.mubr.f32.mxu1 %v11317_v6  ;;  %5265 = vmatpush1.msra.mxu0 %v11363_v15  ;;  %v2952_v56 = vpop.f32.mrf.mxu1  ;;  %v10027_v15 = vld [vmem:[#allocation2 + $0x38] sm:$0xff] }
 0x176   :  { %5352 = vmatpush1.msra.mxu1 %v9784_v9  ;;  %5266 = vmatprep.subr.mxu0 %v11364_v47  ;;  %v2843_v9 = vadd.f32 %v2833_v58, %v2734_v60 }
 0x177   :  { %7806 = vmatmul.mubr.msk.f32.gmra.mxu1 %vm371_vm2, %v9893_v28  ;;  %5353 = vmatprep.subr.mxu1 %v9792_v42  ;;  %v2954_v33 = vpop.f32.mrf.mxu1  ;;  %v11368_v42 = vld [vmem:[#allocation33_spill] sm:$0xff] }
 0x178   :  { %5267 = vmatpush1.msra.mxu0 %v11365_v49  ;;  %5354 = vmatpush1.msra.mxu1 %v9797_v48  ;;  %v2837_v4 = vpop.f32.mrf.mxu0  ;;  %v11369_v48 = vld [vmem:[#allocation35_spill] sm:$0xff] }
 0x179   :  { %5268 = vmatprep.subr.mxu0 %v11366_v21  ;;  %5355 = vmatprep.subr.mxu1 %v9803_v26  ;;  %v2844_v20 = vadd.f32 %v2837_v4, %v2738_v43  ;;  %v5005_v21 = vld [vmem:[%s11083_s5 + $0x40] sm:$0xff] }
 0x17a   :  { %5269 = vmatpush1.msra.mxu0 %v11367_v25  ;;  %5356 = vmatpush1.msra.mxu1 %v9807_v62  ;;  %v2839_v16 = vpop.f32.mrf.mxu0  ;;  %v5004_v25 = vld [vmem:[%s11083_s5 + $0x38] sm:$0xff] }
 0x17b   :  { %5270 = vmatprep.subr.mxu0 %v11368_v42  ;;  %5357 = vmatprep.subr.mxu1 %v9811_v63  ;;  %v2846_v46 = vmax.f32 %v2842_v14, %v2844_v20  ;;  %v2845_v29 = vadd.f32 %v2839_v16, %v2740_v12  ;;  %v2958_v23 = vpop.f32.mrf.mxu1  ;;  %v5006_v14 = vld [vmem:[%s11083_s5 + $0x48] sm:$0xff] }
 0x17c   :  { %5271 = vmatpush1.msra.mxu0 %v11369_v48  ;;  %5358 = vmatpush1.msra.mxu1 %v9815_v1 }
 0x17d   :  { %5272 = vmatprep.subr.mxu0 %v11370_v34  ;;  %5359 = vmatprep.subr.mxu1 %v9819_v13  ;;  %v2847_v26 = vmax.f32 %v2843_v9, %v2845_v29  ;;  %v2960_v18 = vpop.f32.mrf.mxu1  ;;  %v11376_v13 = vld [vmem:[#allocation53_spill] sm:$0xff] }
 0x17e   :  { %5273 = vmatpush1.msra.mxu0 %v11371_v37  ;;  %5360 = vmatpush1.msra.mxu1 %v9823_v55  ;;  %v3041_v62 = vpop.f32.mrf.mxu0  ;;  %v11378_v55 = vld [vmem:[#allocation54_spill] sm:$0xff] }
 0x17f   :  { %5274 = vmatprep.subr.mxu0 %v11372_v45  ;;  %5361 = vmatprep.subr.mxu1 %v9828_v59  ;;  %v2848_v63 = vmax.f32 %v2846_v46, %v2847_v26  ;;  %v3042_v22 = vadd.f32 %v3041_v62, %v2952_v56  ;;  %v11380_v59 = vld [vmem:[#allocation55_spill] sm:$0xff]  ;;  %v5003_v46 = vld [vmem:[%s11083_s5 + $0x30] sm:$0xff] }
 0x180   :  { %5275 = vmatpush1.msra.mxu0 %v11373_v36  ;;  %5362 = vmatpush1.msra.mxu1 %v11374_v40  ;;  %v3043_v1 = vpop.f32.mrf.mxu0 }
 0x181   :  { %5276 = vmatprep.subr.mxu0 %v11375_v50  ;;  %5363 = vmatprep.subr.mxu1 %v11376_v13  ;;  %v2849_v30 = vadd.f32 %v9939_v57, %v2848_v63  ;;  %v3141_v44 = vpop.f32.mrf.mxu1  ;;  %v3044_v19 = vadd.f32 %v3043_v1, %v2954_v33  ;;  %v5002_v63 = vld [vmem:[%s11083_s5 + $0x28] sm:$0xff] }
 0x182   :  { %5277 = vmatpush1.msra.mxu0 %v11377_v2  ;;  %5364 = vmatpush1.msra.mxu1 %v11378_v55  ;;  %v3152_v52 = vadd.f32 %v3141_v44, %v3042_v22  ;;  %v5001_v55 = vld [vmem:[%s11083_s5 + $0x20] sm:$0xff] }
 0x183   :  { %5278 = vmatprep.subr.mxu0 %v11379_v0  ;;  %5365 = vmatprep.subr.mxu1 %v11380_v59  ;;  %v2850_v61 = vmax.f32 %v2849_v30, 0.0  ;;  %v3143_v3 = vpop.f32.mrf.mxu1 }
 0x184   :  { %5279 = vmatpush1.msra.mxu0 %v11381_v51  ;;  %5366 = vmatpush1.msra.mxu1 %v9853_v7  ;;  %v3047_v32 = vpop.f32.mrf.mxu0 }
 0x185   :  { %5280 = vmatprep.subr.mxu0 %v11382_v17  ;;  %5367 = vmatprep.subr.mxu1 %v9857_v11  ;;  %2852 = vst.msk [vmem:[#allocation2 + $0x40] sm:$0xff] %vm371_vm2, %v2850_v61  ;;  %v3048_v35 = vadd.f32 %v3047_v32, %v2958_v23  ;;  %v3153_v11 = vadd.f32 %v3143_v3, %v3044_v19  ;;  %v5000_v61 = vld [vmem:[%s11083_s5 + $0x18] sm:$0xff]  ;;  %v4999_v3 = vld [vmem:[%s11083_s5 + $0x10] sm:$0xff]  ;;  %v4998_v17 = vld [vmem:[%s11083_s5 + $0x8] sm:$0xff] }
 0x186   :  { %5281 = vmatpush1.msra.mxu0 %v11383_v10  ;;  %5314 = vmatprep.mubr.f32.mxu0 %v11317_v6  ;;  %v3049_v54 = vpop.f32.mrf.mxu0 }
 0x187   :  { %5368 = vmatpush1.msra.mxu1 %v9862_v8  ;;  %7809 = vmatmul.mubr.msk.f32.vlgmr.msra.gmra.mxu0 %vm371_vm2, %v9893_v28  ;;  %v3050_v7 = vadd.f32 %v3049_v54, %v2960_v18  ;;  %v3147_v41 = vpop.f32.mrf.mxu1  ;;  %v4997_v54 = vld [vmem:[%s11083_s5] sm:$0xff] }
 0x188   :  { %5369 = vmatprep.subr.mxu1 %v9866_v31  ;;  %5403 = vmatprep.mubr.f32.mxu1 %v11317_v6  ;;  %v3154_v39 = vadd.f32 %v3147_v41, %v3048_v35 }
 0x189   :  { %5370 = vmatpush1.msra.mxu1 %v9870_v24  ;;  %5320 = vmatprep.mubr.f32.mxu0 %v11317_v6  ;;  %v3149_v5 = vpop.f32.mrf.mxu1 }
 0x18a   :  { %7813 = vmatmul.mubr.msk.f32.vlgmr.msra.gmra.mxu1 %vm371_vm2, %v10017_v53  ;;  %v3156_v8 = vmax.f32 %v3152_v52, %v3154_v39  ;;  %v3155_v38 = vadd.f32 %v3149_v5, %v3050_v7  ;;  %v3262_v58 = vpop.f32.mrf.mxu0  ;;  %8032 = vmatprep.subr.mxu1 %v11317_v6 }
 0x18b   :  { %7810 = vmatmul.mubr.msk.f32.gmra.mxu0 %vm371_vm2, %v10017_v53  ;;  %5409 = vmatprep.mubr.f32.mxu1 %v11317_v6 }
 0x18c   :  { %v3157_v31 = vmax.f32 %v3153_v11, %v3155_v38  ;;  %v3264_v24 = vpop.f32.mrf.mxu0  ;;  %8009 = vmatprep.subr.mxu0 %v11317_v6  ;;  %8033 = vmatpush3.msra.mxu1 %v5006_v14 }
 0x18d   :  { %v3351_v60 = vpop.f32.mrf.mxu1  ;;  %8034 = vmatprep.subr.mxu1 %v11317_v6  ;;  %8029 = vmatprep.mubr.msk.f32.mxu0 %vm8329_vm4, %v11317_v6 }
 0x18e   :  { %7814 = vmatmul.mubr.msk.f32.gmra.mxu1 %vm371_vm2, %v10027_v15  ;;  %v3158_v43 = vmax.f32 %v3156_v8, %v3157_v31  ;;  %v3352_v16 = vadd.f32 %v3351_v60, %v3262_v58  ;;  %v10078_v58 = vld [vmem:[#allocation3 + $0xa8] sm:$0xf] }
 0x18f   :  { %v3353_v56 = vpop.f32.mrf.mxu1  ;;  %8035 = vmatpush3.msra.mxu1 %v5005_v21  ;;  %8052 = vmatprep.mubr.msk.f32.mxu1 %vm8329_vm4, %v11317_v6 }
 0x190   :  { %v3159_v47 = vadd.f32 %v9939_v57, %v3158_v43  ;;  %v3268_v12 = vpop.f32.mrf.mxu0  ;;  %8036 = vmatprep.subr.mxu1 %v11317_v6  ;;  %v3354_v29 = vadd.f32 %v3353_v56, %v3264_v24 }
 0x191   :  { %8037 = vmatpush3.msra.mxu1 %v5004_v25 }
 0x192   :  { %v3160_v33 = vmax.f32 %v3159_v47, 0.0  ;;  %v3270_v49 = vpop.f32.mrf.mxu0  ;;  %8038 = vmatprep.subr.mxu1 %v11317_v6 }
 0x193   :  { %v3357_v4 = vpop.f32.mrf.mxu1  ;;  %8039 = vmatpush3.msra.mxu1 %v5003_v46 }
 0x194   :  { %3162 = vst.msk [vmem:[#allocation2 + $0x48] sm:$0xff] %vm371_vm2, %v3160_v33  ;;  %v3358_v23 = vadd.f32 %v3357_v4, %v3268_v12  ;;  %8040 = vmatprep.subr.mxu1 %v11317_v6 }
 0x195   :  { %v3359_v9 = vpop.f32.mrf.mxu1  ;;  %8041 = vmatpush3.msra.mxu1 %v5002_v63 }
 0x196   :  { %v3451_v20 = vpop.f32.mrf.mxu0  ;;  %v3360_v34 = vadd.f32 %v3359_v9, %v3270_v49  ;;  %8042 = vmatprep.subr.mxu1 %v11317_v6 }
 0x197   :  { %v3462_v26 = vadd.f32 %v3451_v20, %v3352_v16  ;;  %8043 = vmatpush3.msra.mxu1 %v5001_v55 }
 0x198   :  { %v3453_v42 = vpop.f32.mrf.mxu0  ;;  %8044 = vmatprep.subr.mxu1 %v11317_v6 }
 0x199   :  { %v3572_v48 = vpop.f32.mrf.mxu1  ;;  %v3463_v62 = vadd.f32 %v3453_v42, %v3354_v29  ;;  %8045 = vmatpush3.msra.mxu1 %v5000_v61 }
 0x19a   :  { %8046 = vmatprep.subr.mxu1 %v11317_v6 }
 0x19b   :  { %v3574_v18 = vpop.f32.mrf.mxu1  ;;  %8047 = vmatpush3.msra.mxu1 %v4999_v3 }
 0x19c   :  { %v3457_v37 = vpop.f32.mrf.mxu0  ;;  %8048 = vmatprep.subr.mxu1 %v11317_v6 }
 0x19d   :  { %v3464_v45 = vadd.f32 %v3457_v37, %v3358_v23  ;;  %8049 = vmatpush3.msra.mxu1 %v4998_v17  ;;  %v7824_v37 = vld [vmem:[%s11083_s5 + $0x98] sm:$0xff] }
 0x19e   :  { %v3459_v36 = vpop.f32.mrf.mxu0  ;;  %8050 = vmatprep.subr.mxu1 %v11317_v6  ;;  %8010 = vmatpush3.msra.mxu0 %v7824_v37 }
 0x19f   :  { %v3466_v40 = vmax.f32 %v3462_v26, %v3464_v45  ;;  %v3465_v1 = vadd.f32 %v3459_v36, %v3360_v34  ;;  %v3578_v50 = vpop.f32.mrf.mxu1  ;;  %8051 = vmatpush3.msra.mxu1 %v4997_v54  ;;  %8011 = vmatprep.subr.mxu0 %v11317_v6  ;;  %v7821_v54 = vld [vmem:[%s11083_s5 + $0x80] sm:$0xff] }
 0x1a0   :  { %7831 = vmatprep.subr.msk.mxu1 %vm4459_vm3, %v10078_v58 }
 0x1a1   :  { %v3467_v13 = vmax.f32 %v3463_v62, %v3465_v1  ;;  %v3580_v30 = vpop.f32.mrf.mxu1 }
 0x1a2   :  { %v3661_v44 = vpop.f32.mrf.mxu0 }
 0x1a3   :  { %v3468_v2 = vmax.f32 %v3466_v40, %v3467_v13  ;;  %v3662_v51 = vadd.f32 %v3661_v44, %v3572_v48 }
 0x1a4   :  { %v3663_v22 = vpop.f32.mrf.mxu0 }
 0x1a5   :  { %v3469_v0 = vadd.f32 %v9939_v57, %v3468_v2  ;;  %v3761_v59 = vpop.f32.mrf.mxu1  ;;  %v3664_v35 = vadd.f32 %v3663_v22, %v3574_v18 }
 0x1a6   :  { %v3772_v7 = vadd.f32 %v3761_v59, %v3662_v51 }
 0x1a7   :  { %v3470_v19 = vmax.f32 %v3469_v0, 0.0  ;;  %v3763_v32 = vpop.f32.mrf.mxu1  ;;  %v7823_v0 = vld [vmem:[%s11083_s5 + $0x90] sm:$0xff] }
 0x1a8   :  { %v3667_v10 = vpop.f32.mrf.mxu0  ;;  %v3773_v5 = vadd.f32 %v3763_v32, %v3664_v35  ;;  %8012 = vmatpush3.msra.mxu0 %v7823_v0 }
 0x1a9   :  { %3472 = vst.msk [vmem:[#allocation2 + $0x50] sm:$0xff] %vm371_vm2, %v3470_v19  ;;  %v3668_v52 = vadd.f32 %v3667_v10, %v3578_v50  ;;  %8013 = vmatprep.subr.mxu0 %v11317_v6  ;;  %v7822_v19 = vld [vmem:[%s11083_s5 + $0x88] sm:$0xff] }
 0x1aa   :  { %v3669_v41 = vpop.f32.mrf.mxu0  ;;  %8014 = vmatpush3.msra.mxu0 %v7822_v19 }
 0x1ab   :  { %v3670_v11 = vadd.f32 %v3669_v41, %v3580_v30  ;;  %v3767_v39 = vpop.f32.mrf.mxu1  ;;  %8015 = vmatprep.subr.mxu0 %v11317_v6 }
 0x1ac   :  { %v3774_v8 = vadd.f32 %v3767_v39, %v3668_v52  ;;  %8016 = vmatpush3.msra.mxu0 %v7821_v54 }
 0x1ad   :  { %v3769_v38 = vpop.f32.mrf.mxu1  ;;  %8017 = vmatprep.subr.mxu0 %v11317_v6 }
 0x1ae   :  { %v3776_v31 = vmax.f32 %v3772_v7, %v3774_v8  ;;  %v3775_v24 = vadd.f32 %v3769_v38, %v3670_v11  ;;  %v3882_v60 = vpop.f32.mrf.mxu0 }
 0x1b0   :  { %v3777_v43 = vmax.f32 %v3773_v5, %v3775_v24  ;;  %v3884_v56 = vpop.f32.mrf.mxu0  ;;  %v7820_v5 = vld [vmem:[%s11083_s5 + $0x78] sm:$0xff] }
 0x1b1   :  { %v3971_v47 = vpop.f32.mrf.mxu1  ;;  %8018 = vmatpush3.msra.mxu0 %v7820_v5  ;;  %v10149_v5 = vld [vmem:[#allocation3 + $0x88] sm:$0xff] }
 0x1b2   :  { %v3778_v12 = vmax.f32 %v3776_v31, %v3777_v43  ;;  %v3972_v16 = vadd.f32 %v3971_v47, %v3882_v60  ;;  %8019 = vmatprep.subr.mxu0 %v11317_v6  ;;  %v7819_v31 = vld [vmem:[%s11083_s5 + $0x70] sm:$0xff]  ;;  %v7818_v60 = vld [vmem:[%s11083_s5 + $0x68] sm:$0xff] }
 0x1b3   :  { %v3973_v14 = vpop.f32.mrf.mxu1  ;;  %8020 = vmatpush3.msra.mxu0 %v7819_v31 }
 0x1b4   :  { %v3779_v33 = vadd.f32 %v9939_v57, %v3778_v12  ;;  %v3888_v49 = vpop.f32.mrf.mxu0  ;;  %v3974_v46 = vadd.f32 %v3973_v14, %v3884_v56  ;;  %8021 = vmatprep.subr.mxu0 %v11317_v6  ;;  %v7817_v56 = vld [vmem:[%s11083_s5 + $0x60] sm:$0xff]  ;;  %v7816_v12 = vld [vmem:[%s11083_s5 + $0x58] sm:$0xff] }
 0x1b5   :  { %8022 = vmatpush3.msra.mxu0 %v7818_v60  ;;  %v10163_v60 = vld [vmem:[#allocation3 + $0x68] sm:$0xff] }
 0x1b6   :  { %v3780_v4 = vmax.f32 %v3779_v33, 0.0  ;;  %v3890_v21 = vpop.f32.mrf.mxu0  ;;  %8023 = vmatprep.subr.mxu0 %v11317_v6  ;;  %v7815_v33 = vld [vmem:[%s11083_s5 + $0x50] sm:$0xff] }
 0x1b7   :  { %v3977_v9 = vpop.f32.mrf.mxu1  ;;  %8024 = vmatpush3.msra.mxu0 %v7817_v56  ;;  %v10169_v56 = vld [vmem:[#allocation3 + $0x58] sm:$0xff] }
 0x1b8   :  { %3782 = vst.msk [vmem:[#allocation2 + $0x58] sm:$0xff] %vm371_vm2, %v3780_v4  ;;  %v3978_v29 = vadd.f32 %v3977_v9, %v3888_v49  ;;  %8025 = vmatprep.subr.mxu0 %v11317_v6  ;;  %v10127_v49 = vld [vmem:[#allocation3 + $0x158] sm:$0xf] }
 0x1b9   :  { %v3979_v20 = vpop.f32.mrf.mxu1  ;;  %8026 = vmatpush3.msra.mxu0 %v7816_v12  ;;  %v10172_v12 = vld [vmem:[#allocation3 + $0x50] sm:$0xff] }
 0x1ba   :  { %v4071_v25 = vpop.f32.mrf.mxu0  ;;  %v3980_v48 = vadd.f32 %v3979_v20, %v3890_v21  ;;  %8027 = vmatprep.subr.mxu0 %v11317_v6 }
 0x1bb   :  { %v4082_v34 = vadd.f32 %v4071_v25, %v3972_v16  ;;  %8028 = vmatpush3.msra.mxu0 %v7815_v33  ;;  %v10178_v33 = vld [vmem:[#allocation3 + $0x40] sm:$0xff] }
 0x1bc   :  { %v4073_v42 = vpop.f32.mrf.mxu0  ;;  %7827 = vmatprep.subr.msk.mxu0 %vm4459_vm3, %v10127_v49 }
 0x1bd   :  { %v4192_v23 = vpop.f32.mrf.mxu1  ;;  %v4083_v62 = vadd.f32 %v4073_v42, %v3974_v46 }
 0x1bf   :  { %v4194_v26 = vpop.f32.mrf.mxu1 }
 0x1c0   :  { %v4077_v18 = vpop.f32.mrf.mxu0 }
 0x1c1   :  { %v4084_v45 = vadd.f32 %v4077_v18, %v3978_v29 }
 0x1c2   :  { %v4079_v63 = vpop.f32.mrf.mxu0 }
 0x1c3   :  { %v4086_v36 = vmax.f32 %v4082_v34, %v4084_v45  ;;  %v4085_v40 = vadd.f32 %v4079_v63, %v3980_v48  ;;  %v4198_v1 = vpop.f32.mrf.mxu1 }
 0x1c5   :  { %v4087_v50 = vmax.f32 %v4083_v62, %v4085_v40  ;;  %v4200_v13 = vpop.f32.mrf.mxu1 }
 0x1c6   :  { %v4281_v30 = vpop.f32.mrf.mxu0 }
 0x1c7   :  { %v4088_v44 = vmax.f32 %v4086_v36, %v4087_v50  ;;  %v4282_v2 = vadd.f32 %v4281_v30, %v4192_v23 }
 0x1c8   :  { %v4283_v55 = vpop.f32.mrf.mxu0  ;;  %v4381_v22 = vpop.f32.mrf.mxu1 }
 0x1c9   :  { %v4089_v59 = vadd.f32 %v9939_v57, %v4088_v44  ;;  %v4284_v61 = vadd.f32 %v4283_v55, %v4194_v26  ;;  %v4392_v17 = vadd.f32 %v4381_v22, %v4282_v2 }
 0x1ca   :  { %v4287_v3 = vpop.f32.mrf.mxu0  ;;  %v4383_v51 = vpop.f32.mrf.mxu1 }
 0x1cb   :  { %v4090_v32 = vmax.f32 %v4089_v59, 0.0  ;;  %v4288_v35 = vadd.f32 %v4287_v3, %v4198_v1  ;;  %v4393_v7 = vadd.f32 %v4383_v51, %v4284_v61 }
 0x1cc   :  { %v4289_v10 = vpop.f32.mrf.mxu0  ;;  %v4387_v52 = vpop.f32.mrf.mxu1 }
 0x1cd   :  { %4092 = vst.msk [vmem:[#allocation2 + $0x60] sm:$0xff] %vm371_vm2, %v4090_v32  ;;  %v4290_v41 = vadd.f32 %v4289_v10, %v4200_v13  ;;  %v4394_v11 = vadd.f32 %v4387_v52, %v4288_v35  ;;  %v10134_v10 = vld [vmem:[%s11082_s4] ss:$0 sm:$0xff] }
 0x1ce   :  { %v4389_v39 = vpop.f32.mrf.mxu1 }
 0x1cf   :  { %v4396_v8 = vmax.f32 %v4392_v17, %v4394_v11  ;;  %v4395_v38 = vadd.f32 %v4389_v39, %v4290_v41  ;;  %v10138_v41 = vld [vmem:[#allocation3 + $0xa0] sm:$0xf]  ;;  %v10143_v11 = vld [vmem:[#allocation3 + $0x98] sm:$0xff]  ;;  %v10146_v39 = vld [vmem:[#allocation3 + $0x90] sm:$0xff] }
 0x1d1   :  { %v4397_v24 = vmax.f32 %v4393_v7, %v4395_v38  ;;  %v10155_v38 = vld [vmem:[#allocation3 + $0x78] sm:$0xff] }
 0x1d3   :  { %v4398_v43 = vmax.f32 %v4396_v8, %v4397_v24  ;;  %v10152_v8 = vld [vmem:[#allocation3 + $0x80] sm:$0xff]  ;;  %v10160_v24 = vld [vmem:[#allocation3 + $0x70] sm:$0xff] }
 0x1d5   :  { %v4399_v47 = vadd.f32 %v9939_v57, %v4398_v43  ;;  %v10166_v43 = vld [vmem:[#allocation3 + $0x60] sm:$0xff] }
 0x1d7   :  { %v4400_v14 = vmax.f32 %v4399_v47, 0.0 }
 0x1d9   :  { %4402 = vst.msk [vmem:[#allocation2 + $0x68] sm:$0xff] %vm371_vm2, %v4400_v14  ;;  %v10175_v14 = vld [vmem:[#allocation3 + $0x48] sm:$0xff] }
 0x1de   :  { %v4621_v9 = vpop.f32.mrf.mxu1 }
 0x1e0   :  { %v4623_v16 = vpop.f32.mrf.mxu1 }
 0x1e2   :  { %v4627_v42 = vpop.f32.mrf.mxu1 }
 0x1e3   :  { %v4532_v57 = vpop.f32.mrf.mxu0 }
 0x1e4   :  { %v4629_v29 = vpop.f32.mrf.mxu1  ;;  %v4622_v62 = vadd.f32 %v4621_v9, %v4532_v57  ;;  %v10181_v57 = vld [vmem:[#allocation3 + $0x38] sm:$0xff]  ;;  %v10187_v9 = vld [vmem:[#allocation3 + $0x28] sm:$0xff] }
 0x1e5   :  { %v4534_v4 = vpop.f32.mrf.mxu0  ;;  %11384 = vst [vmem:[#allocation6_spill] sm:$0xff] %v10181_v57  ;;  %11386 = vst [vmem:[#allocation7_spill] sm:$0xff] %v10187_v9 }
 0x1e6   :  { %v4624_v45 = vadd.f32 %v4623_v16, %v4534_v4  ;;  %v10193_v16 = vld [vmem:[#allocation3 + $0x18] sm:$0xff] }
 0x1e7   :  { %11388 = vst [vmem:[#allocation8_spill] sm:$0xff] %v10193_v16 }
 0x1f1   :  { %v4538_v21 = vpop.f32.mrf.mxu0 }
 0x1f2   :  { %v4628_v63 = vadd.f32 %v4627_v42, %v4538_v21  ;;  %v10184_v21 = vld [vmem:[#allocation3 + $0x30] sm:$0xff] }
 0x1f3   :  { %v4540_v20 = vpop.f32.mrf.mxu0  ;;  %11385 = vst [vmem:[#allocation26_spill] sm:$0xff] %v10184_v21 }
 0x1f4   :  { %v4630_v40 = vadd.f32 %v4629_v29, %v4540_v20  ;;  %v10190_v20 = vld [vmem:[#allocation3 + $0x20] sm:$0xff]  ;;  %v10199_v29 = vld [vmem:[#allocation3 + $0x8] sm:$0xff] }
 0x1f5   :  { %11387 = vst [vmem:[#allocation28_spill] sm:$0xff] %v10190_v20  ;;  %11390 = vst [vmem:[#allocation9_spill] sm:$0xff] %v10199_v29 }
 0x1f9   :  { %v4735_v25 = vpop.f32.mrf.mxu0 }
 0x1fa   :  { %v4746_v1 = vadd.f32 %v4735_v25, %v4622_v62 }
 0x1fb   :  { %v4737_v46 = vpop.f32.mrf.mxu0 }
 0x1fc   :  { %v4747_v50 = vadd.f32 %v4737_v46, %v4624_v45  ;;  %v10196_v46 = vld [vmem:[#allocation3 + $0x10] sm:$0xff]  ;;  %v10219_v45 = vld [vmem:[#allocation3 + $0x2a0] sm:$0xff] }
 0x1fd   :  { %11389 = vst [vmem:[#allocation30_spill] sm:$0xff] %v10196_v46  ;;  %11395 = vst [vmem:[#allocation36_spill] sm:$0xff] %v10219_v45 }
 0x1fe   :  { %v4853_v48 = vpop.f32.mrf.mxu1 }
 0x1ff   :  { %v4741_v23 = vpop.f32.mrf.mxu0  ;;  %v4864_v22 = vadd.f32 %v4853_v48, %v4746_v1  ;;  %v10202_v48 = vld [vmem:[#allocation3] sm:$0xff] }
 0x200   :  { %v4855_v26 = vpop.f32.mrf.mxu1  ;;  %v4748_v13 = vadd.f32 %v4741_v23, %v4628_v63  ;;  %11391 = vst [vmem:[#allocation32_spill] sm:$0xff] %v10202_v48  ;;  %v10224_v63 = vld [vmem:[#allocation3 + $0x298] sm:$0xff] }
 0x201   :  { %v4743_v34 = vpop.f32.mrf.mxu0  ;;  %v4865_v0 = vadd.f32 %v4855_v26, %v4747_v50  ;;  %v10207_v26 = vld [vmem:[#allocation3 + $0x2b8] sm:$0xf]  ;;  %11396 = vst [vmem:[#allocation12_spill] sm:$0xff] %v10224_v63  ;;  %v10234_v50 = vld [vmem:[#allocation3 + $0x280] sm:$0xff] }
 0x202   :  { %v4749_v44 = vadd.f32 %v4743_v34, %v4630_v40  ;;  %11392 = vst [vmem:[#allocation10_spill] sm:$0xff] %v10207_v26  ;;  %v10231_v40 = vld [vmem:[#allocation3 + $0x288] sm:$0xff]  ;;  %11399 = vst [vmem:[#allocation39_spill] sm:$0xff] %v10234_v50 }
 0x203   :  { %11398 = vst [vmem:[#allocation13_spill] sm:$0xff] %v10231_v40 }
 0x20d   :  { %v4859_v37 = vpop.f32.mrf.mxu1 }
 0x20e   :  { %v4866_v2 = vadd.f32 %v4859_v37, %v4748_v13  ;;  %v10216_v37 = vld [vmem:[#allocation3 + $0x2a8] sm:$0xff]  ;;  %v10237_v13 = vld [vmem:[#allocation3 + $0x278] sm:$0xff] }
 0x20f   :  { %v4861_v30 = vpop.f32.mrf.mxu1  ;;  %11394 = vst [vmem:[#allocation11_spill] sm:$0xff] %v10216_v37  ;;  %11400 = vst [vmem:[#allocation14_spill] sm:$0xff] %v10237_v13 }
 0x210   :  { %v4867_v59 = vadd.f32 %v4861_v30, %v4749_v44  ;;  %v10240_v44 = vld [vmem:[#allocation3 + $0x270] sm:$0xff] }
 0x211   :  { %11401 = vst [vmem:[#allocation15_spill] sm:$0xff] %v10240_v44 }
 0x213   :  { %v4971_v18 = vpop.f32.mrf.mxu0 }
 0x214   :  { %v4982_v51 = vadd.f32 %v4971_v18, %v4864_v22  ;;  %v10211_v18 = vld [vmem:[#allocation3 + $0x2b0] sm:$0xf] }
 0x215   :  { %v4973_v36 = vpop.f32.mrf.mxu0  ;;  %11393 = vst [vmem:[#allocation34_spill] sm:$0xff] %v10211_v18 }
 0x216   :  { %v4983_v19 = vadd.f32 %v4973_v36, %v4865_v0  ;;  %v10158_v31 = vpop.f32.mrf.mxu1  ;;  %v10227_v36 = vld [vmem:[#allocation3 + $0x290] sm:$0xff]  ;;  %v10244_v0 = vld [vmem:[#allocation3 + $0x268] sm:$0xff] }
 0x217   :  { %11397 = vst [vmem:[#allocation37_spill] sm:$0xff] %v10227_v36  ;;  %11402 = vst [vmem:[#allocation16_spill] sm:$0xff] %v10244_v0 }
 0x218   :  { %v5075_v47 = vpop.f32.mrf.mxu1 }
 0x21a   :  { %v4977_v55 = vpop.f32.mrf.mxu0 }
 0x21b   :  { %v4984_v61 = vadd.f32 %v4977_v55, %v4866_v2 }
 0x21c   :  { %v4979_v3 = vpop.f32.mrf.mxu0 }
 0x21d   :  { %v4985_v32 = vadd.f32 %v4979_v3, %v4867_v59  ;;  %v4986_v17 = vmax.f32 %v4982_v51, %v4984_v61  ;;  %v5079_v4 = vpop.f32.mrf.mxu1  ;;  %v10247_v3 = vld [vmem:[#allocation3 + $0x260] sm:$0xff] }
 0x21e   :  { %11403 = vst [vmem:[#allocation17_spill] sm:$0xff] %v10247_v3 }
 0x21f   :  { %v4987_v35 = vmax.f32 %v4983_v19, %v4985_v32  ;;  %v5081_v42 = vpop.f32.mrf.mxu1  ;;  %v10250_v19 = vld [vmem:[#allocation3 + $0x258] sm:$0xff] }
 0x220   :  { %11404 = vst [vmem:[#allocation18_spill] sm:$0xff] %v10250_v19 }
 0x221   :  { %v4988_v52 = vmax.f32 %v4986_v17, %v4987_v35  ;;  %v10253_v35 = vld [vmem:[#allocation3 + $0x250] sm:$0xff] }
 0x222   :  { %11405 = vst [vmem:[#allocation44_spill] sm:$0xff] %v10253_v35 }
 0x223   :  { %v4995_v54 = vadd.f32 %v10134_v10, %v4988_v52 }
 0x225   :  { %v4996_v7 = vmax.f32 %v4995_v54, 0.0 }
 0x227   :  { %8053 = vmatmul.mubr.msk.f32.vlgmr.msra.gmra.mxu1 %vm5436_vm5, %v4996_v7 }
 0x228   :  { %7832 = vmatpush1.msk.msra.mxu1 %vm4459_vm3, %v10138_v41  ;;  %5724 = vmatprep.mubr.f32.mxu1 %v11317_v6 }
 0x229   :  { %5672 = vmatprep.subr.mxu1 %v10143_v11 }
 0x22a   :  { %5673 = vmatpush1.msra.mxu1 %v10146_v39 }
 0x22b   :  { %5674 = vmatprep.subr.mxu1 %v10149_v5 }
 0x22c   :  { %5675 = vmatpush1.msra.mxu1 %v10152_v8 }
 0x22d   :  { %5676 = vmatprep.subr.mxu1 %v10155_v38  ;;  %v5150_v25 = vpop.f32.mrf.mxu0 }
 0x22e   :  { %5677 = vmatpush1.msra.mxu1 %v10160_v24  ;;  %v5151_v2 = vadd.f32 %v5150_v25, %v10158_v31  ;;  %v10256_v31 = vld [vmem:[#allocation3 + $0x248] sm:$0xff] }
 0x22f   :  { %5678 = vmatprep.subr.mxu1 %v10163_v60  ;;  %v5152_v34 = vpop.f32.mrf.mxu0  ;;  %11406 = vst [vmem:[#allocation46_spill] sm:$0xff] %v10256_v31 }
 0x230   :  { %5679 = vmatpush1.msra.mxu1 %v10166_v43  ;;  %v5227_v23 = vpop.f32.mrf.mxu1  ;;  %v5153_v55 = vadd.f32 %v5152_v34, %v5075_v47 }
 0x231   :  { %5680 = vmatprep.subr.mxu1 %v10169_v56  ;;  %v5238_v52 = vadd.f32 %v5227_v23, %v5151_v2 }
 0x232   :  { %5681 = vmatpush1.msra.mxu1 %v10172_v12  ;;  %v5229_v62 = vpop.f32.mrf.mxu1 }
 0x233   :  { %5682 = vmatprep.subr.mxu1 %v10175_v14  ;;  %v5239_v54 = vadd.f32 %v5229_v62, %v5153_v55  ;;  %v10268_v55 = vld [vmem:[#allocation3 + $0x228] sm:$0xff] }
 0x234   :  { %5683 = vmatpush1.msra.mxu1 %v10178_v33  ;;  %11410 = vst [vmem:[#allocation21_spill] sm:$0xff] %v10268_v55 }
 0x235   :  { %5684 = vmatprep.subr.mxu1 %v10181_v57 }
 0x236   :  { %5685 = vmatpush1.msra.mxu1 %v10184_v21 }
 0x237   :  { %5686 = vmatprep.subr.mxu1 %v10187_v9  ;;  %v5233_v1 = vpop.f32.mrf.mxu1 }
 0x238   :  { %5687 = vmatpush1.msra.mxu1 %v10190_v20 }
 0x239   :  { %5688 = vmatprep.subr.mxu1 %v10193_v16  ;;  %v5235_v61 = vpop.f32.mrf.mxu1 }
 0x23a   :  { %5689 = vmatpush1.msra.mxu1 %v10196_v46 }
 0x23b   :  { %5690 = vmatprep.subr.mxu1 %v10199_v29 }
 0x23c   :  { %5691 = vmatpush1.msra.mxu1 %v10202_v48 }
 0x23d   :  { %7833 = vmatmul.mubr.msk.f32.vlgmr.msra.gmra.mxu1 %vm371_vm2, %v9849_v27  ;;  %7839 = vmatprep.subr.msk.mxu1 %vm4459_vm3, %v10207_v26  ;;  %v5156_v27 = vpop.f32.mrf.mxu0 }
 0x23e   :  { %7840 = vmatpush1.msk.msra.mxu1 %vm4459_vm3, %v10211_v18  ;;  %5730 = vmatprep.mubr.f32.mxu1 %v11317_v6  ;;  %v5157_v30 = vadd.f32 %v5156_v27, %v5079_v4 }
 0x23f   :  { %5838 = vmatprep.subr.mxu1 %v10216_v37 }
 0x240   :  { %5839 = vmatpush1.msra.mxu1 %v10219_v45  ;;  %v5240_v32 = vadd.f32 %v5233_v1, %v5157_v30  ;;  %v10265_v30 = vld [vmem:[#allocation3 + $0x230] sm:$0xff] }
 0x241   :  { %7834 = vmatmul.mubr.msk.f32.gmra.mxu1 %vm371_vm2, %v9893_v28  ;;  %5840 = vmatprep.subr.mxu1 %v10224_v63  ;;  %v5158_v28 = vpop.f32.mrf.mxu0  ;;  %11409 = vst [vmem:[#allocation20_spill] sm:$0xff] %v10265_v30 }
 0x242   :  { %5841 = vmatpush1.msra.mxu1 %v10227_v36  ;;  %5890 = vmatprep.mubr.f32.mxu1 %v11317_v6  ;;  %v5159_v59 = vadd.f32 %v5158_v28, %v5081_v42  ;;  %v10259_v42 = vld [vmem:[#allocation3 + $0x240] sm:$0xff]  ;;  %v10262_v28 = vld [vmem:[#allocation3 + $0x238] sm:$0xff] }
 0x243   :  { %5842 = vmatprep.subr.mxu1 %v10231_v40  ;;  %11407 = vst [vmem:[#allocation19_spill] sm:$0xff] %v10259_v42  ;;  %11408 = vst [vmem:[#allocation48_spill] sm:$0xff] %v10262_v28 }
 0x244   :  { %5843 = vmatpush1.msra.mxu1 %v10234_v50  ;;  %v5241_v47 = vadd.f32 %v5235_v61, %v5159_v59  ;;  %v10271_v61 = vld [vmem:[#allocation3 + $0x220] sm:$0xff] }
 0x245   :  { %5844 = vmatprep.subr.mxu1 %v10237_v13  ;;  %11411 = vst [vmem:[#allocation22_spill] sm:$0xff] %v10271_v61 }
 0x246   :  { %5845 = vmatpush1.msra.mxu1 %v10240_v44 }
 0x247   :  { %v5316_v22 = vpop.f32.mrf.mxu0  ;;  %5846 = vmatprep.subr.mxu1 %v10244_v0 }
 0x248   :  { %5847 = vmatpush1.msra.mxu1 %v10247_v3  ;;  %v5327_v34 = vadd.f32 %v5316_v22, %v5238_v52  ;;  %v10274_v52 = vld [vmem:[#allocation3 + $0x218] sm:$0xff] }
 0x249   :  { %v5318_v51 = vpop.f32.mrf.mxu0  ;;  %5848 = vmatprep.subr.mxu1 %v10250_v19  ;;  %11412 = vst [vmem:[#allocation23_spill] sm:$0xff] %v10274_v52 }
 0x24a   :  { %v5405_v17 = vpop.f32.mrf.mxu1  ;;  %5849 = vmatpush1.msra.mxu1 %v10253_v35  ;;  %v5328_v27 = vadd.f32 %v5318_v51, %v5239_v54  ;;  %v10277_v54 = vld [vmem:[#allocation3 + $0x210] sm:$0xff] }
 0x24b   :  { %v5322_v7 = vpop.f32.mrf.mxu0  ;;  %5850 = vmatprep.subr.mxu1 %v10256_v31  ;;  %v5416_v22 = vadd.f32 %v5405_v17, %v5327_v34  ;;  %11413 = vst [vmem:[#allocation24_spill] sm:$0xff] %v10277_v54 }
 0x24c   :  { %v5329_v4 = vadd.f32 %v5322_v7, %v5240_v32  ;;  %v5407_v25 = vpop.f32.mrf.mxu1  ;;  %5851 = vmatpush1.msra.mxu1 %v10259_v42 }
 0x24d   :  { %v5324_v1 = vpop.f32.mrf.mxu0  ;;  %5852 = vmatprep.subr.mxu1 %v10262_v28  ;;  %v5417_v51 = vadd.f32 %v5407_v25, %v5328_v27  ;;  %v10292_v27 = vld [vmem:[#allocation3 + $0x150] sm:$0xf] }
 0x24e   :  { %v5330_v23 = vadd.f32 %v5324_v1, %v5241_v47  ;;  %v5411_v62 = vpop.f32.mrf.mxu1  ;;  %5853 = vmatpush1.msra.mxu1 %v10265_v30  ;;  %v10297_v1 = vld [vmem:[#allocation3 + $0x148] sm:$0xff] }
 0x24f   :  { %v5418_v2 = vadd.f32 %v5411_v62, %v5329_v4  ;;  %5854 = vmatprep.subr.mxu1 %v10268_v55  ;;  %v10284_v4 = vld [vmem:[#allocation2 + $0x40] sm:$0xff]  ;;  %v10303_v62 = vld [vmem:[#allocation3 + $0x138] sm:$0xff] }
 0x250   :  { %v5413_v59 = vpop.f32.mrf.mxu1  ;;  %5855 = vmatpush1.msra.mxu1 %v10271_v61 }
 0x251   :  { %v5419_v32 = vadd.f32 %v5413_v59, %v5330_v23  ;;  %5856 = vmatprep.subr.mxu1 %v10274_v52  ;;  %v5420_v7 = vmax.f32 %v5416_v22, %v5418_v2  ;;  %v10300_v23 = vld [vmem:[#allocation3 + $0x140] sm:$0xff]  ;;  %v10306_v2 = vld [vmem:[#allocation3 + $0x130] sm:$0xff]  ;;  %v10309_v59 = vld [vmem:[#allocation3 + $0x128] sm:$0xff] }
 0x252   :  { %5857 = vmatpush1.msra.mxu1 %v10277_v54  ;;  %v10312_v22 = vld [vmem:[#allocation3 + $0x120] sm:$0xff] }
 0x253   :  { %v5421_v47 = vmax.f32 %v5417_v51, %v5419_v32  ;;  %7841 = vmatmul.mubr.msk.f32.vlgmr.msra.gmra.mxu1 %vm371_vm2, %v10027_v15  ;;  %8055 = vmatprep.subr.mxu1 %v11317_v6  ;;  %v10315_v51 = vld [vmem:[#allocation3 + $0x118] sm:$0xff]  ;;  %v10318_v32 = vld [vmem:[#allocation3 + $0x110] sm:$0xff] }
 0x254   :  { %5896 = vmatprep.mubr.f32.mxu1 %v11317_v6  ;;  %11414 = vst [vmem:[#allocation25_spill] sm:$0xff] %v10318_v32 }
 0x255   :  { %v5422_v17 = vmax.f32 %v5420_v7, %v5421_v47  ;;  %v10321_v7 = vld [vmem:[#allocation3 + $0x108] sm:$0xff]  ;;  %v10324_v47 = vld [vmem:[#allocation3 + $0x100] sm:$0xff] }
 0x256   :  { %11415 = vst [vmem:[#allocation27_spill] sm:$0xff] %v10321_v7  ;;  %11416 = vst [vmem:[#allocation29_spill] sm:$0xff] %v10324_v47 }
 0x257   :  { %v5423_v25 = vadd.f32 %v10134_v10, %v5422_v17  ;;  %7842 = vmatmul.mubr.msk.f32.gmra.mxu1 %vm371_vm2, %v10284_v4  ;;  %v10327_v17 = vld [vmem:[#allocation3 + $0xf8] sm:$0xff] }
 0x258   :  { %8075 = vmatprep.mubr.msk.f32.mxu1 %vm8329_vm4, %v11317_v6  ;;  %11417 = vst [vmem:[#allocation31_spill] sm:$0xff] %v10327_v17 }
 0x259   :  { %v5424_v34 = vmax.f32 %v5423_v25, 0.0  ;;  %v10330_v25 = vld [vmem:[#allocation3 + $0xf0] sm:$0xff] }
 0x25a   :  { %11418 = vst [vmem:[#allocation33_spill] sm:$0xff] %v10330_v25 }
 0x25b   :  { %8030 = vmatmul.mubr.msk.f32.vlgmr.msra.gmra.mxu0 %vm5436_vm5, %v5424_v34  ;;  %v10333_v34 = vld [vmem:[#allocation3 + $0xe8] sm:$0xff] }
 0x25c   :  { %7828 = vmatpush1.msk.msra.mxu0 %vm4459_vm3, %v10292_v27  ;;  %5647 = vmatprep.mubr.f32.mxu0 %v11317_v6  ;;  %11419 = vst [vmem:[#allocation35_spill] sm:$0xff] %v10333_v34 }
 0x25d   :  { %5595 = vmatprep.subr.mxu0 %v10297_v1 }
 0x25e   :  { %5596 = vmatpush1.msra.mxu0 %v10300_v23 }
 0x25f   :  { %5597 = vmatprep.subr.mxu0 %v10303_v62 }
 0x260   :  { %5598 = vmatpush1.msra.mxu0 %v10306_v2 }
 0x261   :  { %5599 = vmatprep.subr.mxu0 %v10309_v59 }
 0x262   :  { %5600 = vmatpush1.msra.mxu0 %v10312_v22 }
 0x263   :  { %5601 = vmatprep.subr.mxu0 %v10315_v51 }
 0x264   :  { %5602 = vmatpush1.msra.mxu0 %v10318_v32  ;;  %v10336_v32 = vld [vmem:[#allocation3 + $0xe0] sm:$0xff] }
 0x265   :  { %5603 = vmatprep.subr.mxu0 %v10321_v7  ;;  %11420 = vst [vmem:[#allocation38_spill] sm:$0xff] %v10336_v32  ;;  %v10339_v7 = vld [vmem:[#allocation3 + $0xd8] sm:$0xff] }
 0x266   :  { %5604 = vmatpush1.msra.mxu0 %v10324_v47  ;;  %11421 = vst [vmem:[#allocation40_spill] sm:$0xff] %v10339_v7  ;;  %v10342_v47 = vld [vmem:[#allocation3 + $0xd0] sm:$0xff] }
 0x267   :  { %5605 = vmatprep.subr.mxu0 %v10327_v17  ;;  %11422 = vst [vmem:[#allocation41_spill] sm:$0xff] %v10342_v47  ;;  %v10345_v17 = vld [vmem:[#allocation3 + $0xc8] sm:$0xff] }
 0x268   :  { %5606 = vmatpush1.msra.mxu0 %v10330_v25  ;;  %11423 = vst [vmem:[#allocation42_spill] sm:$0xff] %v10345_v17  ;;  %v10348_v25 = vld [vmem:[#allocation3 + $0xc0] sm:$0xff] }
 0x269   :  { %5607 = vmatprep.subr.mxu0 %v10333_v34  ;;  %11424 = vst [vmem:[#allocation52_spill] sm:$0xff] %v10348_v25  ;;  %v10351_v34 = vld [vmem:[#allocation3 + $0xb8] sm:$0xff] }
 0x26a   :  { %5608 = vmatpush1.msra.mxu0 %v10336_v32  ;;  %11425 = vst [vmem:[#allocation43_spill] sm:$0xff] %v10351_v34  ;;  %v10354_v32 = vld [vmem:[#allocation3 + $0xb0] sm:$0xff] }
 0x26b   :  { %5609 = vmatprep.subr.mxu0 %v10339_v7  ;;  %11426 = vst [vmem:[#allocation53_spill] sm:$0xff] %v10354_v32  ;;  %v8254_v7 = vld [vmem:[#allocation2 + $0x28] sm:$0xff] }
 0x26c   :  { %5610 = vmatpush1.msra.mxu0 %v10342_v47  ;;  %v10358_v47 = vld [vmem:[#allocation3 + $0x208] sm:$0xf] }
 0x26d   :  { %5611 = vmatprep.subr.mxu0 %v10345_v17  ;;  %11427 = vst [vmem:[#allocation45_spill] sm:$0xff] %v10358_v47  ;;  %v10362_v17 = vld [vmem:[#allocation3 + $0x200] sm:$0xf] }
 0x26e   :  { %5612 = vmatpush1.msra.mxu0 %v10348_v25  ;;  %11428 = vst [vmem:[#allocation54_spill] sm:$0xff] %v10362_v17  ;;  %v10391_v25 = vld [vmem:[#allocation3 + $0x1c0] sm:$0xff] }
 0x26f   :  { %5613 = vmatprep.subr.mxu0 %v10351_v34  ;;  %v10367_v34 = vld [vmem:[#allocation3 + $0x1f8] sm:$0xff]  ;;  %11436 = vst [vmem:[#allocation58_spill] sm:$0xff] %v10391_v25 }
 0x270   :  { %5614 = vmatpush1.msra.mxu0 %v10354_v32  ;;  %11429 = vst [vmem:[#allocation47_spill] sm:$0xff] %v10367_v34  ;;  %v10370_v32 = vld [vmem:[#allocation3 + $0x1f0] sm:$0xff] }
 0x271   :  { %7829 = vmatmul.mubr.msk.f32.vlgmr.msra.gmra.mxu0 %vm371_vm2, %v8254_v7  ;;  %7835 = vmatprep.subr.msk.mxu0 %vm4459_vm3, %v10358_v47  ;;  %11430 = vst [vmem:[#allocation55_spill] sm:$0xff] %v10370_v32  ;;  %v10375_v7 = vld [vmem:[#allocation3 + $0x1e8] sm:$0xff]  ;;  %v10378_v47 = vld [vmem:[#allocation3 + $0x1e0] sm:$0xff] }
 0x272   :  { %7836 = vmatpush1.msk.msra.mxu0 %vm4459_vm3, %v10362_v17  ;;  %5653 = vmatprep.mubr.f32.mxu0 %v11317_v6  ;;  %11431 = vst [vmem:[#allocation49_spill] sm:$0xff] %v10375_v7  ;;  %11432 = vst [vmem:[#allocation50_spill] sm:$0xff] %v10378_v47  ;;  %v10382_v17 = vld [vmem:[#allocation3 + $0x1d8] sm:$0xff] }
 0x273   :  { %5749 = vmatprep.subr.mxu0 %v10367_v34  ;;  %11433 = vst [vmem:[#allocation51_spill] sm:$0xff] %v10382_v17  ;;  %v10385_v34 = vld [vmem:[#allocation3 + $0x1d0] sm:$0xff] }
 0x274   :  { %5750 = vmatpush1.msra.mxu0 %v10370_v32  ;;  %11434 = vst [vmem:[#allocation56_spill] sm:$0xff] %v10385_v34  ;;  %v10388_v32 = vld [vmem:[#allocation3 + $0x1c8] sm:$0xff] }
 0x275   :  { %7830 = vmatmul.mubr.msk.f32.gmra.mxu0 %vm371_vm2, %v10017_v53  ;;  %5751 = vmatprep.subr.mxu0 %v10375_v7  ;;  %11435 = vst [vmem:[#allocation57_spill] sm:$0xff] %v10388_v32  ;;  %v10394_v7 = vld [vmem:[#allocation3 + $0x1b8] sm:$0xff] }
 0x276   :  { %5752 = vmatpush1.msra.mxu0 %v10378_v47  ;;  %5801 = vmatprep.mubr.f32.mxu0 %v11317_v6  ;;  %11437 = vst [vmem:[#allocation59_spill] sm:$0xff] %v10394_v7  ;;  %v10397_v47 = vld [vmem:[#allocation3 + $0x1b0] sm:$0xff] }
 0x277   :  { %5753 = vmatprep.subr.mxu0 %v10382_v17  ;;  %11438 = vst [vmem:[#allocation60_spill] sm:$0xff] %v10397_v47  ;;  %v10400_v17 = vld [vmem:[#allocation3 + $0x1a8] sm:$0xff] }
 0x278   :  { %5754 = vmatpush1.msra.mxu0 %v10385_v34  ;;  %11439 = vst [vmem:[#allocation61_spill] sm:$0xff] %v10400_v17  ;;  %v10403_v34 = vld [vmem:[#allocation3 + $0x1a0] sm:$0xff] }
 0x279   :  { %5755 = vmatprep.subr.mxu0 %v10388_v32  ;;  %11440 = vst [vmem:[#allocation62_spill] sm:$0xff] %v10403_v34  ;;  %v10406_v32 = vld [vmem:[#allocation3 + $0x198] sm:$0xff] }
 0x27a   :  { %5756 = vmatpush1.msra.mxu0 %v10391_v25  ;;  %11441 = vst [vmem:[#allocation63_spill] sm:$0xff] %v10406_v32  ;;  %v10409_v25 = vld [vmem:[#allocation3 + $0x190] sm:$0xff] }
 0x27b   :  { %5757 = vmatprep.subr.mxu0 %v10394_v7  ;;  %11442 = vst [vmem:[#allocation64_spill] sm:$0xff] %v10409_v25  ;;  %v10412_v7 = vld [vmem:[#allocation3 + $0x188] sm:$0xff] }
 0x27c   :  { %5758 = vmatpush1.msra.mxu0 %v10397_v47  ;;  %11443 = vst [vmem:[#allocation65_spill] sm:$0xff] %v10412_v7  ;;  %v10415_v47 = vld [vmem:[#allocation3 + $0x180] sm:$0xff] }
 0x27d   :  { %5759 = vmatprep.subr.mxu0 %v10400_v17  ;;  %11444 = vst [vmem:[#allocation66_spill] sm:$0xff] %v10415_v47  ;;  %v10418_v17 = vld [vmem:[#allocation3 + $0x178] sm:$0xff] }
 0x27e   :  { %5760 = vmatpush1.msra.mxu0 %v10403_v34  ;;  %11445 = vst [vmem:[#allocation67_spill] sm:$0xff] %v10418_v17  ;;  %v10421_v34 = vld [vmem:[#allocation3 + $0x170] sm:$0xff] }
 0x27f   :  { %5761 = vmatprep.subr.mxu0 %v10406_v32  ;;  %11446 = vst [vmem:[#allocation68_spill] sm:$0xff] %v10421_v34  ;;  %v10424_v32 = vld [vmem:[#allocation3 + $0x168] sm:$0xff] }
 0x280   :  { %5762 = vmatpush1.msra.mxu0 %v10409_v25  ;;  %11447 = vst [vmem:[#allocation69_spill] sm:$0xff] %v10424_v32  ;;  %v10427_v25 = vld [vmem:[#allocation3 + $0x160] sm:$0xff] }
 0x281   :  { %5763 = vmatprep.subr.mxu0 %v10412_v7  ;;  %11448 = vst [vmem:[#allocation70_spill] sm:$0xff] %v10427_v25  ;;  %v10465_v7 = vld [vmem:[#allocation3 + $0x320] sm:$0xff] }
 0x282   :  { %5764 = vmatpush1.msra.mxu0 %v10415_v47  ;;  %v10432_v47 = vld [vmem:[#allocation3 + $0x368] sm:$0xf]  ;;  %11458 = vst [vmem:[#allocation80_spill] sm:$0xff] %v10465_v7 }
 0x283   :  { %5765 = vmatprep.subr.mxu0 %v10418_v17  ;;  %11449 = vst [vmem:[#allocation71_spill] sm:$0xff] %v10432_v47  ;;  %v10436_v17 = vld [vmem:[#allocation3 + $0x360] sm:$0xf] }
 0x284   :  { %5766 = vmatpush1.msra.mxu0 %v10421_v34  ;;  %11450 = vst [vmem:[#allocation72_spill] sm:$0xff] %v10436_v17  ;;  %v10449_v34 = vld [vmem:[#allocation3 + $0x348] sm:$0xff] }
 0x285   :  { %5767 = vmatprep.subr.mxu0 %v10424_v32  ;;  %v10441_v32 = vld [vmem:[#allocation3 + $0x358] sm:$0xff]  ;;  %11453 = vst [vmem:[#allocation75_spill] sm:$0xff] %v10449_v34 }
 0x286   :  { %5768 = vmatpush1.msra.mxu0 %v10427_v25  ;;  %11451 = vst [vmem:[#allocation73_spill] sm:$0xff] %v10441_v32  ;;  %v10444_v25 = vld [vmem:[#allocation3 + $0x350] sm:$0xff] }
 0x287   :  { %7837 = vmatmul.mubr.msk.f32.vlgmr.msra.gmra.mxu0 %vm371_vm2, %v10017_v53  ;;  %7843 = vmatprep.subr.msk.mxu0 %vm4459_vm3, %v10432_v47  ;;  %11452 = vst [vmem:[#allocation74_spill] sm:$0xff] %v10444_v25  ;;  %v10452_v47 = vld [vmem:[#allocation3 + $0x340] sm:$0xff] }
 0x288   :  { %7844 = vmatpush1.msk.msra.mxu0 %vm4459_vm3, %v10436_v17  ;;  %5807 = vmatprep.mubr.f32.mxu0 %v11317_v6  ;;  %11454 = vst [vmem:[#allocation76_spill] sm:$0xff] %v10452_v47  ;;  %v10456_v17 = vld [vmem:[#allocation3 + $0x338] sm:$0xff] }
 0x289   :  { %5927 = vmatprep.subr.mxu0 %v10441_v32  ;;  %11455 = vst [vmem:[#allocation77_spill] sm:$0xff] %v10456_v17  ;;  %v10459_v32 = vld [vmem:[#allocation3 + $0x330] sm:$0xff] }
 0x28a   :  { %5928 = vmatpush1.msra.mxu0 %v10444_v25  ;;  %11456 = vst [vmem:[#allocation78_spill] sm:$0xff] %v10459_v32  ;;  %v10462_v25 = vld [vmem:[#allocation3 + $0x328] sm:$0xff] }
 0x28b   :  { %7838 = vmatmul.mubr.msk.f32.gmra.mxu0 %vm371_vm2, %v10027_v15  ;;  %5929 = vmatprep.subr.mxu0 %v10449_v34  ;;  %11457 = vst [vmem:[#allocation79_spill] sm:$0xff] %v10462_v25  ;;  %v10468_v34 = vld [vmem:[#allocation3 + $0x318] sm:$0xff] }
 0x28c   :  { %5930 = vmatpush1.msra.mxu0 %v10452_v47  ;;  %5979 = vmatprep.mubr.f32.mxu0 %v11317_v6  ;;  %11459 = vst [vmem:[#allocation81_spill] sm:$0xff] %v10468_v34  ;;  %v10471_v47 = vld [vmem:[#allocation3 + $0x310] sm:$0xff] }
 0x28d   :  { %5931 = vmatprep.subr.mxu0 %v10456_v17  ;;  %11460 = vst [vmem:[#allocation82_spill] sm:$0xff] %v10471_v47  ;;  %v10474_v17 = vld [vmem:[#allocation3 + $0x308] sm:$0xff] }
 0x28e   :  { %5932 = vmatpush1.msra.mxu0 %v10459_v32  ;;  %11461 = vst [vmem:[#allocation83_spill] sm:$0xff] %v10474_v17  ;;  %v10477_v32 = vld [vmem:[#allocation3 + $0x300] sm:$0xff] }
 0x28f   :  { %5933 = vmatprep.subr.mxu0 %v10462_v25  ;;  %11462 = vst [vmem:[#allocation84_spill] sm:$0xff] %v10477_v32  ;;  %v10480_v25 = vld [vmem:[#allocation3 + $0x2f8] sm:$0xff] }
 0x290   :  { %5934 = vmatpush1.msra.mxu0 %v10465_v7  ;;  %11463 = vst [vmem:[#allocation85_spill] sm:$0xff] %v10480_v25  ;;  %v10483_v7 = vld [vmem:[#allocation3 + $0x2f0] sm:$0xff] }
 0x291   :  { %5935 = vmatprep.subr.mxu0 %v10468_v34  ;;  %11464 = vst [vmem:[#allocation86_spill] sm:$0xff] %v10483_v7  ;;  %v10486_v34 = vld [vmem:[#allocation3 + $0x2e8] sm:$0xff] }
 0x292   :  { %5936 = vmatpush1.msra.mxu0 %v10471_v47  ;;  %11465 = vst [vmem:[#allocation87_spill] sm:$0xff] %v10486_v34  ;;  %v10489_v47 = vld [vmem:[#allocation3 + $0x2e0] sm:$0xff] }
 0x293   :  { %5937 = vmatprep.subr.mxu0 %v10474_v17  ;;  %11466 = vst [vmem:[#allocation88_spill] sm:$0xff] %v10489_v47  ;;  %v10492_v17 = vld [vmem:[#allocation3 + $0x2d8] sm:$0xff] }
 0x294   :  { %5938 = vmatpush1.msra.mxu0 %v10477_v32  ;;  %11467 = vst [vmem:[#allocation89_spill] sm:$0xff] %v10492_v17  ;;  %v10495_v32 = vld [vmem:[#allocation3 + $0x2d0] sm:$0xff] }
 0x295   :  { %5939 = vmatprep.subr.mxu0 %v10480_v25  ;;  %11468 = vst [vmem:[#allocation90_spill] sm:$0xff] %v10495_v32  ;;  %v10498_v25 = vld [vmem:[#allocation3 + $0x2c8] sm:$0xff] }
 0x296   :  { %5940 = vmatpush1.msra.mxu0 %v10483_v7  ;;  %11469 = vst [vmem:[#allocation91_spill] sm:$0xff] %v10498_v25  ;;  %v10501_v7 = vld [vmem:[#allocation3 + $0x2c0] sm:$0xff] }
 0x297   :  { %5941 = vmatprep.subr.mxu0 %v10486_v34  ;;  %11470 = vst [vmem:[#allocation92_spill] sm:$0xff] %v10501_v7 }
 0x298   :  { %5942 = vmatpush1.msra.mxu0 %v10489_v47 }
 0x299   :  { %5943 = vmatprep.subr.mxu0 %v10492_v17 }
 0x29a   :  { %5944 = vmatpush1.msra.mxu0 %v10495_v32 }
 0x29b   :  { %5945 = vmatprep.subr.mxu0 %v10498_v25  ;;  %v10513_v25 = vld [vmem:[#allocation2 + $0x48] sm:$0xff] }
 0x29c   :  { %5946 = vmatpush1.msra.mxu0 %v10501_v7 }
 0x29d   :  { %7845 = vmatmul.mubr.msk.f32.vlgmr.msra.gmra.mxu0 %vm371_vm2, %v10284_v4  ;;  %7862 = vmatprep.subr.msk.mxu0 %vm4459_vm3, %v10078_v58  ;;  %v7855_v58 = vld [vmem:[%s11083_s5 + $0xe0] sm:$0xff] }
 0x29e   :  { %7863 = vmatpush1.msk.msra.mxu0 %vm4459_vm3, %v10138_v41  ;;  %5985 = vmatprep.mubr.f32.mxu0 %v11317_v6 }
 0x29f   :  { %6175 = vmatprep.subr.mxu0 %v10143_v11 }
 0x2a0   :  { %6176 = vmatpush1.msra.mxu0 %v10146_v39 }
 0x2a1   :  { %7846 = vmatmul.mubr.msk.f32.gmra.mxu0 %vm371_vm2, %v10513_v25  ;;  %6177 = vmatprep.subr.mxu0 %v10149_v5 }
 0x2a2   :  { %6178 = vmatpush1.msra.mxu0 %v10152_v8  ;;  %6227 = vmatprep.mubr.f32.mxu0 %v11317_v6 }
 0x2a3   :  { %6179 = vmatprep.subr.mxu0 %v10155_v38 }
 0x2a4   :  { %6180 = vmatpush1.msra.mxu0 %v10160_v24 }
 0x2a5   :  { %6181 = vmatprep.subr.mxu0 %v10163_v60 }
 0x2a6   :  { %6182 = vmatpush1.msra.mxu0 %v10166_v43 }
 0x2a7   :  { %6183 = vmatprep.subr.mxu0 %v10169_v56 }
 0x2a8   :  { %6184 = vmatpush1.msra.mxu0 %v10172_v12 }
 0x2a9   :  { %6185 = vmatprep.subr.mxu0 %v10175_v14 }
 0x2aa   :  { %6186 = vmatpush1.msra.mxu0 %v10178_v33 }
 0x2ab   :  { %6187 = vmatprep.subr.mxu0 %v10181_v57 }
 0x2ac   :  { %6188 = vmatpush1.msra.mxu0 %v10184_v21 }
 0x2ad   :  { %6189 = vmatprep.subr.mxu0 %v10187_v9 }
 0x2ae   :  { %6190 = vmatpush1.msra.mxu0 %v10190_v20 }
 0x2af   :  { %6191 = vmatprep.subr.mxu0 %v10193_v16 }
 0x2b0   :  { %6192 = vmatpush1.msra.mxu0 %v10196_v46 }
 0x2b1   :  { %6193 = vmatprep.subr.mxu0 %v10199_v29 }
 0x2b2   :  { %6194 = vmatpush1.msra.mxu0 %v10202_v48 }
 0x2b3   :  { %7864 = vmatmul.mubr.msk.f32.vlgmr.msra.gmra.mxu0 %vm371_vm2, %v10017_v53  ;;  %7870 = vmatprep.subr.msk.mxu0 %vm4459_vm3, %v10207_v26  ;;  %v10570_v53 = vld [vmem:[#allocation2 + $0x50] sm:$0xff] }
 0x2b4   :  { %7871 = vmatpush1.msk.msra.mxu0 %vm4459_vm3, %v10211_v18  ;;  %6233 = vmatprep.mubr.f32.mxu0 %v11317_v6 }
 0x2b5   :  { %6341 = vmatprep.subr.mxu0 %v10216_v37 }
 0x2b6   :  { %6342 = vmatpush1.msra.mxu0 %v10219_v45 }
 0x2b7   :  { %7865 = vmatmul.mubr.msk.f32.gmra.mxu0 %vm371_vm2, %v10027_v15  ;;  %6343 = vmatprep.subr.mxu0 %v10224_v63  ;;  %v7856_v15 = vld [vmem:[%s11083_s5 + $0xe8] sm:$0xff] }
 0x2b8   :  { %6344 = vmatpush1.msra.mxu0 %v10227_v36  ;;  %6393 = vmatprep.mubr.f32.mxu0 %v11317_v6 }
 0x2b9   :  { %6345 = vmatprep.subr.mxu0 %v10231_v40  ;;  %8056 = vmatpush3.msra.mxu1 %v7856_v15  ;;  %v7852_v15 = vld [vmem:[%s11083_s5 + $0xc8] sm:$0xff] }
 0x2ba   :  { %6346 = vmatpush1.msra.mxu0 %v10234_v50  ;;  %8057 = vmatprep.subr.mxu1 %v11317_v6 }
 0x2bb   :  { %6347 = vmatprep.subr.mxu0 %v10237_v13  ;;  %8058 = vmatpush3.msra.mxu1 %v7855_v58 }
 0x2bc   :  { %6348 = vmatpush1.msra.mxu0 %v10240_v44  ;;  %8059 = vmatprep.subr.mxu1 %v11317_v6 }
 0x2bd   :  { %6349 = vmatprep.subr.mxu0 %v10244_v0 }
 0x2be   :  { %6350 = vmatpush1.msra.mxu0 %v10247_v3 }
 0x2bf   :  { %6351 = vmatprep.subr.mxu0 %v10250_v19 }
 0x2c0   :  { %6352 = vmatpush1.msra.mxu0 %v10253_v35 }
 0x2c1   :  { %6353 = vmatprep.subr.mxu0 %v10256_v31 }
 0x2c2   :  { %6354 = vmatpush1.msra.mxu0 %v10259_v42 }
 0x2c3   :  { %6355 = vmatprep.subr.mxu0 %v10262_v28 }
 0x2c4   :  { %6356 = vmatpush1.msra.mxu0 %v10265_v30 }
 0x2c5   :  { %6357 = vmatprep.subr.mxu0 %v10268_v55 }
 0x2c6   :  { %6358 = vmatpush1.msra.mxu0 %v10271_v61 }
 0x2c7   :  { %6359 = vmatprep.subr.mxu0 %v10274_v52  ;;  %v7853_v52 = vld [vmem:[%s11083_s5 + $0xd0] sm:$0xff] }
 0x2c8   :  { %6360 = vmatpush1.msra.mxu0 %v10277_v54  ;;  %v7854_v54 = vld [vmem:[%s11083_s5 + $0xd8] sm:$0xff] }
 0x2c9   :  { %7872 = vmatmul.mubr.msk.f32.vlgmr.msra.gmra.mxu0 %vm371_vm2, %v10513_v25  ;;  %8078 = vmatprep.subr.mxu0 %v11317_v6 }
 0x2ca   :  { %6399 = vmatprep.mubr.f32.mxu0 %v11317_v6  ;;  %8060 = vmatpush3.msra.mxu1 %v7854_v54  ;;  %v7851_v54 = vld [vmem:[%s11083_s5 + $0xc0] sm:$0xff] }
 0x2cb   :  { %8061 = vmatprep.subr.mxu1 %v11317_v6 }
 0x2cc   :  { %8062 = vmatpush3.msra.mxu1 %v7853_v52  ;;  %v7850_v52 = vld [vmem:[%s11083_s5 + $0xb8] sm:$0xff] }
 0x2cd   :  { %7873 = vmatmul.mubr.msk.f32.gmra.mxu0 %vm371_vm2, %v10570_v53  ;;  %8063 = vmatprep.subr.mxu1 %v11317_v6 }
 0x2ce   :  { %8098 = vmatprep.mubr.msk.f32.mxu0 %vm8329_vm4, %v11317_v6  ;;  %8064 = vmatpush3.msra.mxu1 %v7852_v15  ;;  %v7849_v15 = vld [vmem:[%s11083_s5 + $0xb0] sm:$0xff] }
 0x2cf   :  { %8065 = vmatprep.subr.mxu1 %v11317_v6 }
 0x2d0   :  { %8066 = vmatpush3.msra.mxu1 %v7851_v54  ;;  %v7848_v54 = vld [vmem:[%s11083_s5 + $0xa8] sm:$0xff] }
 0x2d1   :  { %8067 = vmatprep.subr.mxu1 %v11317_v6 }
 0x2d2   :  { %8068 = vmatpush3.msra.mxu1 %v7850_v52  ;;  %v7847_v52 = vld [vmem:[%s11083_s5 + $0xa0] sm:$0xff] }
 0x2d3   :  { %8069 = vmatprep.subr.mxu1 %v11317_v6 }
 0x2d4   :  { %8070 = vmatpush3.msra.mxu1 %v7849_v15 }
 0x2d5   :  { %8071 = vmatprep.subr.mxu1 %v11317_v6 }
 0x2d6   :  { %8072 = vmatpush3.msra.mxu1 %v7848_v54 }
 0x2d7   :  { %8073 = vmatprep.subr.mxu1 %v11317_v6 }
 0x2d8   :  { %8074 = vmatpush3.msra.mxu1 %v7847_v52 }
 0x2d9   :  { %7858 = vmatprep.subr.msk.mxu1 %vm4459_vm3, %v10127_v49 }
 0x2e7   :  { %v5579_v58 = vpop.f32.mrf.mxu1 }
 0x2e9   :  { %v8054_v61 = vpop.f32.mrf.mxu1 }
 0x2fd   :  { %v5726_v42 = vpop.f32.mrf.mxu1 }
 0x2ff   :  { %v5728_v35 = vpop.f32.mrf.mxu1 }
 0x301   :  { %v5732_v19 = vpop.f32.mrf.mxu1 }
 0x303   :  { %v5734_v0 = vpop.f32.mrf.mxu1 }
 0x313   :  { %v5892_v13 = vpop.f32.mrf.mxu1 }
 0x315   :  { %v5894_v52 = vpop.f32.mrf.mxu1 }
 0x31b   :  { %v5506_v55 = vpop.f32.mrf.mxu0 }
 0x31c   :  { %v10617_v15 = vadd.f32 %v5579_v58, %v5506_v55 }
 0x31d   :  { %v8031_v61 = vpop.f32.mrf.mxu0 }
 0x31e   :  { %11471 = vst [vmem:[#allocation93_spill] sm:$0xff] %v10617_v15  ;;  %v5898_v61 = vpop.f32.mrf.mxu1 }
 0x320   :  { %v5900_v29 = vpop.f32.mrf.mxu1 }
 0x331   :  { %v5649_v30 = vpop.f32.mrf.mxu0 }
 0x332   :  { %v5727_v49 = vadd.f32 %v5726_v42, %v5649_v30  ;;  %v11489_v30 = vld [vmem:[#allocation49_spill] sm:$0xff] }
 0x333   :  { %v5651_v28 = vpop.f32.mrf.mxu0 }
 0x334   :  { %v5729_v63 = vadd.f32 %v5728_v35, %v5651_v28  ;;  %v11488_v28 = vld [vmem:[#allocation55_spill] sm:$0xff] }
 0x335   :  { %v5655_v31 = vpop.f32.mrf.mxu0 }
 0x336   :  { %v5733_v40 = vadd.f32 %v5732_v19, %v5655_v31 }
 0x337   :  { %v5657_v54 = vpop.f32.mrf.mxu0 }
 0x338   :  { %v5735_v55 = vadd.f32 %v5734_v0, %v5657_v54  ;;  %v11491_v54 = vld [vmem:[#allocation51_spill] sm:$0xff] }
 0x347   :  { %v5803_v3 = vpop.f32.mrf.mxu0 }
 0x348   :  { %v5814_v45 = vadd.f32 %v5803_v3, %v5727_v49  ;;  %v11493_v49 = vld [vmem:[#allocation57_spill] sm:$0xff] }
 0x349   :  { %v5805_v44 = vpop.f32.mrf.mxu0 }
 0x34a   :  { %v5815_v37 = vadd.f32 %v5805_v44, %v5729_v63  ;;  %v5903_v16 = vadd.f32 %v5892_v13, %v5814_v45  ;;  %v11484_v45 = vld [vmem:[#allocation53_spill] sm:$0xff]  ;;  %v11486_v13 = vld [vmem:[#allocation54_spill] sm:$0xff]  ;;  %v11487_v44 = vld [vmem:[#allocation47_spill] sm:$0xff] }
 0x34b   :  { %v5809_v50 = vpop.f32.mrf.mxu0  ;;  %v8299_v63 = vld [vmem:[#allocation2 + $0x38] sm:$0xff] }
 0x34c   :  { %v5816_v58 = vadd.f32 %v5809_v50, %v5733_v40  ;;  %v5904_v20 = vadd.f32 %v5894_v52, %v5815_v37  ;;  %v11483_v37 = vld [vmem:[#allocation43_spill] sm:$0xff]  ;;  %v11492_v52 = vld [vmem:[#allocation56_spill] sm:$0xff] }
 0x34d   :  { %v5811_v36 = vpop.f32.mrf.mxu0 }
 0x34e   :  { %v5817_v18 = vadd.f32 %v5811_v36, %v5735_v55  ;;  %v5905_v48 = vadd.f32 %v5898_v61, %v5816_v58  ;;  %v11485_v36 = vld [vmem:[#allocation45_spill] sm:$0xff]  ;;  %v11494_v55 = vld [vmem:[#allocation58_spill] sm:$0xff]  ;;  %v11495_v58 = vld [vmem:[#allocation59_spill] sm:$0xff] }
 0x34f   :  { %v11496_v61 = vld [vmem:[#allocation60_spill] sm:$0xff] }
 0x350   :  { %v5906_v21 = vadd.f32 %v5900_v29, %v5817_v18  ;;  %v11479_v29 = vld [vmem:[#allocation40_spill] sm:$0xff] }
 0x351   :  { %v11482_v18 = vld [vmem:[#allocation52_spill] sm:$0xff] }
 0x35d   :  { %v5981_v15 = vpop.f32.mrf.mxu0 }
 0x35e   :  { %v5992_v19 = vadd.f32 %v5981_v15, %v5903_v16  ;;  %v11477_v16 = vld [vmem:[#allocation35_spill] sm:$0xff]  ;;  %v11490_v15 = vld [vmem:[#allocation50_spill] sm:$0xff] }
 0x35f   :  { %v5983_v26 = vpop.f32.mrf.mxu0 }
 0x360   :  { %v5993_v31 = vadd.f32 %v5983_v26, %v5904_v20  ;;  %v11476_v20 = vld [vmem:[#allocation33_spill] sm:$0xff]  ;;  %v11481_v26 = vld [vmem:[#allocation42_spill] sm:$0xff] }
 0x361   :  { %v5987_v46 = vpop.f32.mrf.mxu0 }
 0x362   :  { %v5994_v9 = vadd.f32 %v5987_v46, %v5905_v48  ;;  %v11478_v46 = vld [vmem:[#allocation38_spill] sm:$0xff]  ;;  %v11480_v48 = vld [vmem:[#allocation41_spill] sm:$0xff] }
 0x363   :  { %v5989_v57 = vpop.f32.mrf.mxu0 }
 0x364   :  { %v5995_v42 = vadd.f32 %v5989_v57, %v5906_v21  ;;  %v5996_v35 = vmax.f32 %v5992_v19, %v5994_v9  ;;  %v11473_v57 = vld [vmem:[#allocation27_spill] sm:$0xff]  ;;  %v11474_v21 = vld [vmem:[#allocation29_spill] sm:$0xff] }
 0x365   :  { %v11475_v9 = vld [vmem:[#allocation31_spill] sm:$0xff]  ;;  %v11497_v19 = vld [vmem:[#allocation61_spill] sm:$0xff] }
 0x366   :  { %v5997_v0 = vmax.f32 %v5993_v31, %v5995_v42  ;;  %v11498_v31 = vld [vmem:[#allocation62_spill] sm:$0xff]  ;;  %v11499_v42 = vld [vmem:[#allocation63_spill] sm:$0xff] }
 0x368   :  { %v5998_v40 = vmax.f32 %v5996_v35, %v5997_v0  ;;  %v11500_v35 = vld [vmem:[#allocation64_spill] sm:$0xff]  ;;  %v11501_v0 = vld [vmem:[#allocation65_spill] sm:$0xff] }
 0x36a   :  { %v5999_v50 = vadd.f32 %v10134_v10, %v5998_v40  ;;  %v11472_v10 = vld [vmem:[#allocation25_spill] sm:$0xff]  ;;  %v11502_v40 = vld [vmem:[#allocation66_spill] sm:$0xff] }
 0x36c   :  { %v6000_v3 = vmax.f32 %v5999_v50, 0.0  ;;  %v11503_v50 = vld [vmem:[#allocation67_spill] sm:$0xff] }
 0x36e   :  { %8076 = vmatmul.mubr.msk.f32.vlgmr.msra.gmra.mxu1 %vm5436_vm5, %v6000_v3  ;;  %v11504_v3 = vld [vmem:[#allocation68_spill] sm:$0xff] }
 0x36f   :  { %7859 = vmatpush1.msk.msra.mxu1 %vm4459_vm3, %v10292_v27  ;;  %6150 = vmatprep.mubr.f32.mxu1 %v11317_v6 }
 0x370   :  { %6098 = vmatprep.subr.mxu1 %v10297_v1 }
 0x371   :  { %6099 = vmatpush1.msra.mxu1 %v10300_v23 }
 0x372   :  { %6100 = vmatprep.subr.mxu1 %v10303_v62 }
 0x373   :  { %6101 = vmatpush1.msra.mxu1 %v10306_v2 }
 0x374   :  { %6102 = vmatprep.subr.mxu1 %v10309_v59 }
 0x375   :  { %6103 = vmatpush1.msra.mxu1 %v10312_v22 }
 0x376   :  { %6104 = vmatprep.subr.mxu1 %v10315_v51 }
 0x377   :  { %6105 = vmatpush1.msra.mxu1 %v11472_v10 }
 0x378   :  { %6106 = vmatprep.subr.mxu1 %v11473_v57 }
 0x379   :  { %6107 = vmatpush1.msra.mxu1 %v11474_v21 }
 0x37a   :  { %6108 = vmatprep.subr.mxu1 %v11475_v9 }
 0x37b   :  { %6109 = vmatpush1.msra.mxu1 %v11476_v20 }
 0x37c   :  { %6110 = vmatprep.subr.mxu1 %v11477_v16 }
 0x37d   :  { %6111 = vmatpush1.msra.mxu1 %v11478_v46 }
 0x37e   :  { %6112 = vmatprep.subr.mxu1 %v11479_v29 }
 0x37f   :  { %6113 = vmatpush1.msra.mxu1 %v11480_v48 }
 0x380   :  { %6114 = vmatprep.subr.mxu1 %v11481_v26 }
 0x381   :  { %6115 = vmatpush1.msra.mxu1 %v11482_v18 }
 0x382   :  { %6116 = vmatprep.subr.mxu1 %v11483_v37 }
 0x383   :  { %6117 = vmatpush1.msra.mxu1 %v11484_v45 }
 0x384   :  { %7860 = vmatmul.mubr.msk.f32.vlgmr.msra.gmra.mxu1 %vm371_vm2, %v8299_v63  ;;  %7866 = vmatprep.subr.msk.mxu1 %vm4459_vm3, %v11485_v36  ;;  %v11505_v63 = vld [vmem:[#allocation69_spill] sm:$0xff] }
 0x385   :  { %7867 = vmatpush1.msk.msra.mxu1 %vm4459_vm3, %v11486_v13  ;;  %6156 = vmatprep.mubr.f32.mxu1 %v11317_v6 }
 0x386   :  { %6252 = vmatprep.subr.mxu1 %v11487_v44 }
 0x387   :  { %6253 = vmatpush1.msra.mxu1 %v11488_v28 }
 0x388   :  { %7861 = vmatmul.mubr.msk.f32.gmra.mxu1 %vm371_vm2, %v10284_v4  ;;  %6254 = vmatprep.subr.mxu1 %v11489_v30 }
 0x389   :  { %6255 = vmatpush1.msra.mxu1 %v11490_v15  ;;  %6304 = vmatprep.mubr.f32.mxu1 %v11317_v6 }
 0x38a   :  { %6256 = vmatprep.subr.mxu1 %v11491_v54 }
 0x38b   :  { %6257 = vmatpush1.msra.mxu1 %v11492_v52 }
 0x38c   :  { %6258 = vmatprep.subr.mxu1 %v11493_v49 }
 0x38d   :  { %6259 = vmatpush1.msra.mxu1 %v11494_v55 }
 0x38e   :  { %6260 = vmatprep.subr.mxu1 %v11495_v58  ;;  %v11506_v58 = vld [vmem:[#allocation70_spill] sm:$0xff] }
 0x38f   :  { %6261 = vmatpush1.msra.mxu1 %v11496_v61 }
 0x390   :  { %6262 = vmatprep.subr.mxu1 %v11497_v19  ;;  %v11520_v19 = vld [vmem:[#allocation84_spill] sm:$0xff] }
 0x391   :  { %6263 = vmatpush1.msra.mxu1 %v11498_v31  ;;  %v11507_v31 = vld [vmem:[#allocation71_spill] sm:$0xff] }
 0x392   :  { %6264 = vmatprep.subr.mxu1 %v11499_v42  ;;  %v11508_v42 = vld [vmem:[#allocation72_spill] sm:$0xff] }
 0x393   :  { %6265 = vmatpush1.msra.mxu1 %v11500_v35  ;;  %v11519_v35 = vld [vmem:[#allocation83_spill] sm:$0xff] }
 0x394   :  { %6266 = vmatprep.subr.mxu1 %v11501_v0  ;;  %v11516_v0 = vld [vmem:[#allocation80_spill] sm:$0xff] }
 0x395   :  { %6267 = vmatpush1.msra.mxu1 %v11502_v40  ;;  %v11509_v40 = vld [vmem:[#allocation73_spill] sm:$0xff] }
 0x396   :  { %6268 = vmatprep.subr.mxu1 %v11503_v50  ;;  %v11510_v50 = vld [vmem:[#allocation74_spill] sm:$0xff] }
 0x397   :  { %6269 = vmatpush1.msra.mxu1 %v11504_v3  ;;  %v11513_v3 = vld [vmem:[#allocation77_spill] sm:$0xff] }
 0x398   :  { %6270 = vmatprep.subr.mxu1 %v11505_v63  ;;  %v11511_v63 = vld [vmem:[#allocation75_spill] sm:$0xff] }
 0x399   :  { %6271 = vmatpush1.msra.mxu1 %v11506_v58  ;;  %v11512_v58 = vld [vmem:[#allocation76_spill] sm:$0xff] }
 0x39a   :  { %7868 = vmatmul.mubr.msk.f32.vlgmr.msra.gmra.mxu1 %vm371_vm2, %v10284_v4  ;;  %7874 = vmatprep.subr.msk.mxu1 %vm4459_vm3, %v11507_v31  ;;  %v11514_v31 = vld [vmem:[#allocation78_spill] sm:$0xff] }
 0x39b   :  { %7875 = vmatpush1.msk.msra.mxu1 %vm4459_vm3, %v11508_v42  ;;  %6310 = vmatprep.mubr.f32.mxu1 %v11317_v6  ;;  %v11515_v42 = vld [vmem:[#allocation79_spill] sm:$0xff] }
 0x39c   :  { %6430 = vmatprep.subr.mxu1 %v11509_v40  ;;  %v11517_v40 = vld [vmem:[#allocation81_spill] sm:$0xff] }
 0x39d   :  { %6431 = vmatpush1.msra.mxu1 %v11510_v50  ;;  %v11518_v50 = vld [vmem:[#allocation82_spill] sm:$0xff] }
 0x39e   :  { %7869 = vmatmul.mubr.msk.f32.gmra.mxu1 %vm371_vm2, %v10513_v25  ;;  %6432 = vmatprep.subr.mxu1 %v11511_v63  ;;  %v11521_v63 = vld [vmem:[#allocation85_spill] sm:$0xff] }
 0x39f   :  { %6433 = vmatpush1.msra.mxu1 %v11512_v58  ;;  %6482 = vmatprep.mubr.f32.mxu1 %v11317_v6  ;;  %v11522_v58 = vld [vmem:[#allocation86_spill] sm:$0xff] }
 0x3a0   :  { %6434 = vmatprep.subr.mxu1 %v11513_v3 }
 0x3a1   :  { %6435 = vmatpush1.msra.mxu1 %v11514_v31 }
 0x3a2   :  { %6436 = vmatprep.subr.mxu1 %v11515_v42 }
 0x3a3   :  { %6437 = vmatpush1.msra.mxu1 %v11516_v0  ;;  %v11523_v0 = vld [vmem:[#allocation91_spill] sm:$0xff] }
 0x3a4   :  { %6438 = vmatprep.subr.mxu1 %v11517_v40 }
 0x3a5   :  { %6439 = vmatpush1.msra.mxu1 %v11518_v50 }
 0x3a6   :  { %6440 = vmatprep.subr.mxu1 %v11519_v35 }
 0x3a7   :  { %6441 = vmatpush1.msra.mxu1 %v11520_v19  ;;  %v8300_v19 = vld [vmem:[#allocation3 + $0xa8] sm:$0xf] }
 0x3a8   :  { %6442 = vmatprep.subr.mxu1 %v11521_v63 }
 0x3a9   :  { %6443 = vmatpush1.msra.mxu1 %v11522_v58 }
 0x3aa   :  { %6444 = vmatprep.subr.mxu1 %v10486_v34 }
 0x3ab   :  { %6445 = vmatpush1.msra.mxu1 %v10489_v47 }
 0x3ac   :  { %6446 = vmatprep.subr.mxu1 %v10492_v17 }
 0x3ad   :  { %6447 = vmatpush1.msra.mxu1 %v10495_v32  ;;  %v10711_v32 = vld [vmem:[#allocation2 + $0x58] sm:$0xff] }
 0x3ae   :  { %6448 = vmatprep.subr.mxu1 %v11523_v0  ;;  %11524 = vst [vmem:[#allocation25_spill] sm:$0xff] %v10711_v32 }
 0x3af   :  { %6449 = vmatpush1.msra.mxu1 %v10501_v7 }
 0x3b0   :  { %7876 = vmatmul.mubr.msk.f32.vlgmr.msra.gmra.mxu1 %vm371_vm2, %v10570_v53  ;;  %7893 = vmatprep.subr.msk.mxu1 %vm4459_vm3, %v8300_v19  ;;  %v11538_v19 = vld [vmem:[#allocation37_spill] sm:$0xff] }
 0x3b1   :  { %7894 = vmatpush1.msk.msra.mxu1 %vm4459_vm3, %v10138_v41  ;;  %6488 = vmatprep.mubr.f32.mxu1 %v11317_v6  ;;  %v11525_v41 = vld [vmem:[#allocation6_spill] sm:$0xff] }
 0x3b2   :  { %6678 = vmatprep.subr.mxu1 %v10143_v11  ;;  %v11526_v11 = vld [vmem:[#allocation26_spill] sm:$0xff] }
 0x3b3   :  { %6679 = vmatpush1.msra.mxu1 %v10146_v39  ;;  %v11527_v39 = vld [vmem:[#allocation7_spill] sm:$0xff] }
 0x3b4   :  { %7877 = vmatmul.mubr.msk.f32.gmra.mxu1 %vm371_vm2, %v10711_v32  ;;  %6680 = vmatprep.subr.mxu1 %v10149_v5  ;;  %v11528_v5 = vld [vmem:[#allocation28_spill] sm:$0xff] }
 0x3b5   :  { %6681 = vmatpush1.msra.mxu1 %v10152_v8  ;;  %6730 = vmatprep.mubr.f32.mxu1 %v11317_v6  ;;  %v11529_v8 = vld [vmem:[#allocation8_spill] sm:$0xff] }
 0x3b6   :  { %6682 = vmatprep.subr.mxu1 %v10155_v38  ;;  %v11530_v38 = vld [vmem:[#allocation30_spill] sm:$0xff] }
 0x3b7   :  { %6683 = vmatpush1.msra.mxu1 %v10160_v24  ;;  %v11531_v24 = vld [vmem:[#allocation9_spill] sm:$0xff] }
 0x3b8   :  { %6684 = vmatprep.subr.mxu1 %v10163_v60  ;;  %v11532_v60 = vld [vmem:[#allocation32_spill] sm:$0xff] }
 0x3b9   :  { %6685 = vmatpush1.msra.mxu1 %v10166_v43  ;;  %v11533_v43 = vld [vmem:[#allocation10_spill] sm:$0xff] }
 0x3ba   :  { %6686 = vmatprep.subr.mxu1 %v10169_v56  ;;  %v11534_v56 = vld [vmem:[#allocation34_spill] sm:$0xff] }
 0x3bb   :  { %6687 = vmatpush1.msra.mxu1 %v10172_v12  ;;  %v11535_v12 = vld [vmem:[#allocation11_spill] sm:$0xff] }
 0x3bc   :  { %6688 = vmatprep.subr.mxu1 %v10175_v14  ;;  %v11536_v14 = vld [vmem:[#allocation36_spill] sm:$0xff] }
 0x3bd   :  { %6689 = vmatpush1.msra.mxu1 %v10178_v33  ;;  %v11537_v33 = vld [vmem:[#allocation12_spill] sm:$0xff] }
 0x3be   :  { %6690 = vmatprep.subr.mxu1 %v11525_v41  ;;  %v11540_v41 = vld [vmem:[#allocation39_spill] sm:$0xff] }
 0x3bf   :  { %6691 = vmatpush1.msra.mxu1 %v11526_v11  ;;  %v11541_v11 = vld [vmem:[#allocation14_spill] sm:$0xff] }
 0x3c0   :  { %6692 = vmatprep.subr.mxu1 %v11527_v39  ;;  %v11542_v39 = vld [vmem:[#allocation15_spill] sm:$0xff] }
 0x3c1   :  { %6693 = vmatpush1.msra.mxu1 %v11528_v5  ;;  %v11543_v5 = vld [vmem:[#allocation16_spill] sm:$0xff] }
 0x3c2   :  { %6694 = vmatprep.subr.mxu1 %v11529_v8  ;;  %v11544_v8 = vld [vmem:[#allocation17_spill] sm:$0xff] }
 0x3c3   :  { %6695 = vmatpush1.msra.mxu1 %v11530_v38  ;;  %v11545_v38 = vld [vmem:[#allocation18_spill] sm:$0xff] }
 0x3c4   :  { %6696 = vmatprep.subr.mxu1 %v11531_v24  ;;  %v11546_v24 = vld [vmem:[#allocation44_spill] sm:$0xff] }
 0x3c5   :  { %6697 = vmatpush1.msra.mxu1 %v11532_v60  ;;  %v11547_v60 = vld [vmem:[#allocation46_spill] sm:$0xff] }
 0x3c6   :  { %7895 = vmatmul.mubr.msk.f32.vlgmr.msra.gmra.mxu1 %vm371_vm2, %v10284_v4  ;;  %7901 = vmatprep.subr.msk.mxu1 %vm4459_vm3, %v11533_v43  ;;  %v11539_v4 = vld [vmem:[#allocation13_spill] sm:$0xff]  ;;  %v11548_v43 = vld [vmem:[#allocation19_spill] sm:$0xff] }
 0x3c7   :  { %7902 = vmatpush1.msk.msra.mxu1 %vm4459_vm3, %v11534_v56  ;;  %6736 = vmatprep.mubr.f32.mxu1 %v11317_v6  ;;  %v11549_v56 = vld [vmem:[#allocation48_spill] sm:$0xff] }
 0x3c8   :  { %6844 = vmatprep.subr.mxu1 %v11535_v12  ;;  %v11550_v12 = vld [vmem:[#allocation20_spill] sm:$0xff] }
 0x3c9   :  { %6845 = vmatpush1.msra.mxu1 %v11536_v14  ;;  %v11551_v14 = vld [vmem:[#allocation21_spill] sm:$0xff] }
 0x3ca   :  { %7896 = vmatmul.mubr.msk.f32.gmra.mxu1 %vm371_vm2, %v10513_v25  ;;  %6846 = vmatprep.subr.mxu1 %v11537_v33  ;;  %v11552_v33 = vld [vmem:[#allocation22_spill] sm:$0xff] }
 0x3cb   :  { %6847 = vmatpush1.msra.mxu1 %v11538_v19  ;;  %6896 = vmatprep.mubr.f32.mxu1 %v11317_v6  ;;  %v11553_v19 = vld [vmem:[#allocation23_spill] sm:$0xff] }
 0x3cc   :  { %6848 = vmatprep.subr.mxu1 %v11539_v4  ;;  %v11554_v4 = vld [vmem:[#allocation24_spill] sm:$0xff] }
 0x3cd   :  { %6849 = vmatpush1.msra.mxu1 %v11540_v41  ;;  %v10768_v41 = vld [vmem:[#allocation2 + $0x60] sm:$0xff] }
 0x3ce   :  { %6850 = vmatprep.subr.mxu1 %v11541_v11  ;;  %11555 = vst [vmem:[#allocation27_spill] sm:$0xff] %v10768_v41  ;;  %v7887_v11 = vld [vmem:[%s11083_s5 + $0x138] sm:$0xff] }
 0x3cf   :  { %6851 = vmatpush1.msra.mxu1 %v11542_v39  ;;  %v7886_v39 = vld [vmem:[%s11083_s5 + $0x130] sm:$0xff]  ;;  %8079 = vmatpush3.msra.mxu0 %v7887_v11 }
 0x3d0   :  { %6852 = vmatprep.subr.mxu1 %v11543_v5  ;;  %8080 = vmatprep.subr.mxu0 %v11317_v6  ;;  %v7885_v5 = vld [vmem:[%s11083_s5 + $0x128] sm:$0xff] }
 0x3d1   :  { %6853 = vmatpush1.msra.mxu1 %v11544_v8  ;;  %8081 = vmatpush3.msra.mxu0 %v7886_v39  ;;  %v7884_v8 = vld [vmem:[%s11083_s5 + $0x120] sm:$0xff] }
 0x3d2   :  { %6854 = vmatprep.subr.mxu1 %v11545_v38  ;;  %8082 = vmatprep.subr.mxu0 %v11317_v6  ;;  %v7883_v38 = vld [vmem:[%s11083_s5 + $0x118] sm:$0xff] }
 0x3d3   :  { %6855 = vmatpush1.msra.mxu1 %v11546_v24  ;;  %8083 = vmatpush3.msra.mxu0 %v7885_v5  ;;  %v7882_v24 = vld [vmem:[%s11083_s5 + $0x110] sm:$0xff] }
 0x3d4   :  { %6856 = vmatprep.subr.mxu1 %v11547_v60  ;;  %8084 = vmatprep.subr.mxu0 %v11317_v6  ;;  %v7881_v60 = vld [vmem:[%s11083_s5 + $0x108] sm:$0xff] }
 0x3d5   :  { %6857 = vmatpush1.msra.mxu1 %v11548_v43  ;;  %8085 = vmatpush3.msra.mxu0 %v7884_v8  ;;  %v7880_v43 = vld [vmem:[%s11083_s5 + $0x100] sm:$0xff]  ;;  %v6229_v8 = vpop.f32.mrf.mxu0 }
 0x3d6   :  { %6858 = vmatprep.subr.mxu1 %v11549_v56  ;;  %8086 = vmatprep.subr.mxu0 %v11317_v6  ;;  %v7879_v56 = vld [vmem:[%s11083_s5 + $0xf8] sm:$0xff] }
 0x3d7   :  { %6859 = vmatpush1.msra.mxu1 %v11550_v12  ;;  %8087 = vmatpush3.msra.mxu0 %v7883_v38  ;;  %v7878_v12 = vld [vmem:[%s11083_s5 + $0xf0] sm:$0xff] }
 0x3d8   :  { %6860 = vmatprep.subr.mxu1 %v11551_v14  ;;  %8088 = vmatprep.subr.mxu0 %v11317_v6  ;;  %v8301_v14 = vld [vmem:[#allocation3 + $0x158] sm:$0xf] }
 0x3d9   :  { %6861 = vmatpush1.msra.mxu1 %v11552_v33  ;;  %8089 = vmatpush3.msra.mxu0 %v7882_v24  ;;  %v6231_v24 = vpop.f32.mrf.mxu0 }
 0x3da   :  { %6862 = vmatprep.subr.mxu1 %v11553_v19  ;;  %8090 = vmatprep.subr.mxu0 %v11317_v6  ;;  %v11556_v19 = vld [vmem:[#allocation93_spill] sm:$0xff] }
 0x3db   :  { %6863 = vmatpush1.msra.mxu1 %v11554_v4  ;;  %8091 = vmatpush3.msra.mxu0 %v7881_v60 }
 0x3dc   :  { %7903 = vmatmul.mubr.msk.f32.vlgmr.msra.gmra.mxu1 %vm371_vm2, %v10711_v32  ;;  %8101 = vmatprep.subr.mxu1 %v11317_v6 }
 0x3dd   :  { %6902 = vmatprep.mubr.f32.mxu1 %v11317_v6  ;;  %8092 = vmatprep.subr.mxu0 %v11317_v6 }
 0x3de   :  { %8093 = vmatpush3.msra.mxu0 %v7880_v43  ;;  %v6235_v43 = vpop.f32.mrf.mxu0 }
 0x3df   :  { %8094 = vmatprep.subr.mxu0 %v11317_v6 }
 0x3e0   :  { %7904 = vmatmul.mubr.msk.f32.gmra.mxu1 %vm371_vm2, %v10768_v41  ;;  %8095 = vmatpush3.msra.mxu0 %v7879_v56  ;;  %v6237_v41 = vpop.f32.mrf.mxu0 }
 0x3e1   :  { %8121 = vmatprep.mubr.msk.f32.mxu1 %vm8329_vm4, %v11317_v6  ;;  %8096 = vmatprep.subr.mxu0 %v11317_v6 }
 0x3e2   :  { %8097 = vmatpush3.msra.mxu0 %v7878_v12  ;;  %v6395_v0 = vpop.f32.mrf.mxu0 }
 0x3e3   :  { %7889 = vmatprep.subr.msk.mxu0 %vm4459_vm3, %v8301_v14 }
 0x3e4   :  { %v6397_v17 = vpop.f32.mrf.mxu0 }
 0x42e   :  { %v6081_v33 = vpop.f32.mrf.mxu1 }
 0x42f   :  { %v10815_v4 = vadd.f32 %v6081_v33, %v11556_v19 }
 0x430   :  { %v8077_v11 = vpop.f32.mrf.mxu1 }
 0x431   :  { %11557 = vst [vmem:[#allocation29_spill] sm:$0xff] %v10815_v4  ;;  %v6401_v11 = vpop.f32.mrf.mxu0 }
 0x433   :  { %v6403_v31 = vpop.f32.mrf.mxu0 }
 0x444   :  { %v6152_v39 = vpop.f32.mrf.mxu1 }
 0x445   :  { %v6230_v34 = vadd.f32 %v6229_v8, %v6152_v39  ;;  %v7913_v8 = vld [vmem:[%s11083_s5 + $0x160] sm:$0xff] }
 0x446   :  { %v6154_v5 = vpop.f32.mrf.mxu1 }
 0x447   :  { %v6232_v58 = vadd.f32 %v6231_v24, %v6154_v5  ;;  %v7912_v24 = vld [vmem:[%s11083_s5 + $0x158] sm:$0xff] }
 0x448   :  { %v6158_v38 = vpop.f32.mrf.mxu1 }
 0x449   :  { %v6236_v47 = vadd.f32 %v6235_v43, %v6158_v38 }
 0x44a   :  { %v6160_v60 = vpop.f32.mrf.mxu1 }
 0x44b   :  { %v6238_v33 = vadd.f32 %v6237_v41, %v6160_v60  ;;  %v7911_v60 = vld [vmem:[%s11083_s5 + $0x150] sm:$0xff] }
 0x45a   :  { %v6306_v56 = vpop.f32.mrf.mxu1 }
 0x45b   :  { %v6317_v63 = vadd.f32 %v6306_v56, %v6230_v34  ;;  %v10820_v34 = vld [vmem:[%s11082_s4] ss:$0 sm:$0xff]  ;;  %v7910_v56 = vld [vmem:[%s11083_s5 + $0x148] sm:$0xff] }
 0x45c   :  { %v6308_v7 = vpop.f32.mrf.mxu1 }
 0x45d   :  { %v6318_v35 = vadd.f32 %v6308_v7, %v6232_v58  ;;  %v6406_v32 = vadd.f32 %v6395_v0, %v6317_v63  ;;  %v6914_v0 = vld [vmem:[#allocation2 + $0x68] sm:$0xff]  ;;  %v7915_v63 = vld [vmem:[%s11083_s5 + $0x170] sm:$0xff] }
 0x45e   :  { %v6312_v12 = vpop.f32.mrf.mxu1 }
 0x45f   :  { %v6319_v19 = vadd.f32 %v6312_v12, %v6236_v47  ;;  %v6407_v61 = vadd.f32 %v6397_v17, %v6318_v35  ;;  %v11567_v17 = vld [vmem:[#allocation65_spill] sm:$0xff]  ;;  %v11596_v35 = vld [vmem:[#allocation27_spill] sm:$0xff]  ;;  %v7909_v12 = vld [vmem:[%s11083_s5 + $0x140] sm:$0xff] }
 0x460   :  { %v6314_v14 = vpop.f32.mrf.mxu1 }
 0x461   :  { %v6320_v50 = vadd.f32 %v6314_v14, %v6238_v33  ;;  %v6408_v42 = vadd.f32 %v6401_v11, %v6319_v19  ;;  %v11597_v33 = vld [vmem:[#allocation29_spill] sm:$0xff] }
 0x463   :  { %v6409_v49 = vadd.f32 %v6403_v31, %v6320_v50  ;;  %v11594_v31 = vld [vmem:[#allocation91_spill] sm:$0xff]  ;;  %v7917_v50 = vld [vmem:[%s11083_s5 + $0x180] sm:$0xff] }
 0x470   :  { %v6484_v4 = vpop.f32.mrf.mxu1 }
 0x471   :  { %v6495_v38 = vadd.f32 %v6484_v4, %v6406_v32  ;;  %v11566_v32 = vld [vmem:[#allocation64_spill] sm:$0xff]  ;;  %v7914_v4 = vld [vmem:[%s11083_s5 + $0x168] sm:$0xff] }
 0x472   :  { %v6486_v40 = vpop.f32.mrf.mxu1 }
 0x473   :  { %v6496_v43 = vadd.f32 %v6486_v40, %v6407_v61  ;;  %v11593_v61 = vld [vmem:[#allocation90_spill] sm:$0xff]  ;;  %v7918_v40 = vld [vmem:[%s11083_s5 + $0x188] sm:$0xff] }
 0x474   :  { %v6490_v3 = vpop.f32.mrf.mxu1  ;;  %8102 = vmatpush3.msra.mxu1 %v7918_v40  ;;  %v7107_v40 = vld [vmem:[%s11085_s7 + $0x30] sm:$0xff] }
 0x475   :  { %v6497_v55 = vadd.f32 %v6490_v3, %v6408_v42  ;;  %v11595_v42 = vld [vmem:[#allocation92_spill] sm:$0xff]  ;;  %8103 = vmatprep.subr.mxu1 %v11317_v6  ;;  %v7916_v3 = vld [vmem:[%s11083_s5 + $0x178] sm:$0xff] }
 0x476   :  { %v6492_v52 = vpop.f32.mrf.mxu1  ;;  %8104 = vmatpush3.msra.mxu1 %v7917_v50  ;;  %v7106_v50 = vld [vmem:[%s11085_s7 + $0x28] sm:$0xff] }
 0x477   :  { %v6498_v39 = vadd.f32 %v6492_v52, %v6409_v49  ;;  %v6499_v5 = vmax.f32 %v6495_v38, %v6497_v55  ;;  %v11590_v52 = vld [vmem:[#allocation87_spill] sm:$0xff]  ;;  %v11591_v49 = vld [vmem:[#allocation88_spill] sm:$0xff]  ;;  %v11592_v55 = vld [vmem:[#allocation89_spill] sm:$0xff]  ;;  %8105 = vmatprep.subr.mxu1 %v11317_v6 }
 0x478   :  { %8106 = vmatpush3.msra.mxu1 %v7916_v3  ;;  %v7105_v3 = vld [vmem:[%s11085_s7 + $0x20] sm:$0xff] }
 0x479   :  { %v6500_v41 = vmax.f32 %v6496_v43, %v6498_v39  ;;  %8107 = vmatprep.subr.mxu1 %v11317_v6 }
 0x47a   :  { %8108 = vmatpush3.msra.mxu1 %v7915_v63  ;;  %v7104_v63 = vld [vmem:[%s11085_s7 + $0x18] sm:$0xff] }
 0x47b   :  { %v6501_v47 = vmax.f32 %v6499_v5, %v6500_v41  ;;  %8109 = vmatprep.subr.mxu1 %v11317_v6 }
 0x47c   :  { %8110 = vmatpush3.msra.mxu1 %v7914_v4  ;;  %v7103_v4 = vld [vmem:[%s11085_s7 + $0x10] sm:$0xff] }
 0x47d   :  { %v6502_v7 = vadd.f32 %v10820_v34, %v6501_v47  ;;  %8111 = vmatprep.subr.mxu1 %v11317_v6 }
 0x47e   :  { %8112 = vmatpush3.msra.mxu1 %v7913_v8  ;;  %v7102_v8 = vld [vmem:[%s11085_s7 + $0x8] sm:$0xff] }
 0x47f   :  { %v6503_v58 = vmax.f32 %v6502_v7, 0.0  ;;  %8113 = vmatprep.subr.mxu1 %v11317_v6 }
 0x480   :  { %8114 = vmatpush3.msra.mxu1 %v7912_v24  ;;  %v7101_v24 = vld [vmem:[%s11085_s7] sm:$0xff] }
 0x481   :  { %8099 = vmatmul.mubr.msk.f32.vlgmr.msra.gmra.mxu0 %vm5436_vm5, %v6503_v58  ;;  %8115 = vmatprep.subr.mxu1 %v11317_v6 }
 0x482   :  { %7890 = vmatpush1.msk.msra.mxu0 %vm4459_vm3, %v10292_v27  ;;  %6653 = vmatprep.mubr.f32.mxu0 %v11317_v6  ;;  %v11558_v27 = vld [vmem:[#allocation56_spill] sm:$0xff] }
 0x483   :  { %6601 = vmatprep.subr.mxu0 %v10297_v1  ;;  %v11559_v1 = vld [vmem:[#allocation57_spill] sm:$0xff]  ;;  %8116 = vmatpush3.msra.mxu1 %v7911_v60  ;;  %v7208_v60 = vld [vmem:[%s11087_s9 + $0x50] sm:$0xf] }
 0x484   :  { %6602 = vmatpush1.msra.mxu0 %v10300_v23  ;;  %v11560_v23 = vld [vmem:[#allocation58_spill] sm:$0xff]  ;;  %8117 = vmatprep.subr.mxu1 %v11317_v6 }
 0x485   :  { %6603 = vmatprep.subr.mxu0 %v10303_v62  ;;  %v11561_v62 = vld [vmem:[#allocation59_spill] sm:$0xff]  ;;  %8118 = vmatpush3.msra.mxu1 %v7910_v56 }
 0x486   :  { %6604 = vmatpush1.msra.mxu0 %v10306_v2  ;;  %v11562_v2 = vld [vmem:[#allocation60_spill] sm:$0xff]  ;;  %8119 = vmatprep.subr.mxu1 %v11317_v6  ;;  %v6732_v39 = vpop.f32.mrf.mxu1  ;;  %v7207_v56 = vld [vmem:[%s11087_s9 + $0x48] sm:$0xff] }
 0x487   :  { %6605 = vmatprep.subr.mxu0 %v10309_v59  ;;  %v11563_v59 = vld [vmem:[#allocation61_spill] sm:$0xff]  ;;  %8120 = vmatpush3.msra.mxu1 %v7909_v12  ;;  %v7206_v12 = vld [vmem:[%s11087_s9 + $0x40] sm:$0xff] }
 0x488   :  { %6606 = vmatpush1.msra.mxu0 %v10312_v22  ;;  %v11564_v22 = vld [vmem:[#allocation62_spill] sm:$0xff]  ;;  %8124 = vmatprep.subr.mxu1 %v11317_v6  ;;  %v6734_v41 = vpop.f32.mrf.mxu1 }
 0x489   :  { %6607 = vmatprep.subr.mxu0 %v10315_v51  ;;  %v11565_v51 = vld [vmem:[#allocation63_spill] sm:$0xff] }
 0x48a   :  { %6608 = vmatpush1.msra.mxu0 %v11472_v10  ;;  %v11569_v10 = vld [vmem:[#allocation67_spill] sm:$0xff]  ;;  %v6738_v7 = vpop.f32.mrf.mxu1 }
 0x48b   :  { %6609 = vmatprep.subr.mxu0 %v11473_v57  ;;  %v11570_v57 = vld [vmem:[#allocation68_spill] sm:$0xff] }
 0x48c   :  { %6610 = vmatpush1.msra.mxu0 %v11474_v21  ;;  %v11571_v21 = vld [vmem:[#allocation69_spill] sm:$0xff] }
 0x48d   :  { %6611 = vmatprep.subr.mxu0 %v11475_v9  ;;  %v11572_v9 = vld [vmem:[#allocation70_spill] sm:$0xff] }
 0x48e   :  { %6612 = vmatpush1.msra.mxu0 %v11476_v20  ;;  %v11573_v20 = vld [vmem:[#allocation71_spill] sm:$0xff] }
 0x48f   :  { %6613 = vmatprep.subr.mxu0 %v11477_v16  ;;  %v11574_v16 = vld [vmem:[#allocation72_spill] sm:$0xff] }
 0x490   :  { %6614 = vmatpush1.msra.mxu0 %v11478_v46  ;;  %v11575_v46 = vld [vmem:[#allocation73_spill] sm:$0xff] }
 0x491   :  { %6615 = vmatprep.subr.mxu0 %v11479_v29  ;;  %v11576_v29 = vld [vmem:[#allocation74_spill] sm:$0xff] }
 0x492   :  { %6616 = vmatpush1.msra.mxu0 %v11480_v48  ;;  %v11577_v48 = vld [vmem:[#allocation25_spill] sm:$0xff] }
 0x493   :  { %6617 = vmatprep.subr.mxu0 %v11481_v26  ;;  %v11578_v26 = vld [vmem:[#allocation75_spill] sm:$0xff] }
 0x494   :  { %6618 = vmatpush1.msra.mxu0 %v11482_v18  ;;  %v11579_v18 = vld [vmem:[#allocation76_spill] sm:$0xff] }
 0x495   :  { %6619 = vmatprep.subr.mxu0 %v11483_v37  ;;  %v11581_v37 = vld [vmem:[#allocation78_spill] sm:$0xff] }
 0x496   :  { %6620 = vmatpush1.msra.mxu0 %v11484_v45  ;;  %v11582_v45 = vld [vmem:[#allocation79_spill] sm:$0xff] }
 0x497   :  { %7891 = vmatmul.mubr.msk.f32.vlgmr.msra.gmra.mxu0 %vm371_vm2, %v10513_v25  ;;  %7897 = vmatprep.subr.msk.mxu0 %vm4459_vm3, %v11485_v36  ;;  %v11568_v25 = vld [vmem:[#allocation66_spill] sm:$0xff]  ;;  %v11583_v36 = vld [vmem:[#allocation80_spill] sm:$0xff] }
 0x498   :  { %7898 = vmatpush1.msk.msra.mxu0 %vm4459_vm3, %v11486_v13  ;;  %6659 = vmatprep.mubr.f32.mxu0 %v11317_v6  ;;  %v11584_v13 = vld [vmem:[#allocation81_spill] sm:$0xff] }
 0x499   :  { %6755 = vmatprep.subr.mxu0 %v11487_v44  ;;  %v11585_v44 = vld [vmem:[#allocation82_spill] sm:$0xff] }
 0x49a   :  { %6756 = vmatpush1.msra.mxu0 %v11488_v28  ;;  %v11586_v28 = vld [vmem:[#allocation83_spill] sm:$0xff] }
 0x49b   :  { %7892 = vmatmul.mubr.msk.f32.gmra.mxu0 %vm371_vm2, %v10570_v53  ;;  %6757 = vmatprep.subr.mxu0 %v11489_v30  ;;  %v11587_v30 = vld [vmem:[#allocation84_spill] sm:$0xff] }
 0x49c   :  { %6758 = vmatpush1.msra.mxu0 %v11490_v15  ;;  %6807 = vmatprep.mubr.f32.mxu0 %v11317_v6  ;;  %v11588_v15 = vld [vmem:[#allocation85_spill] sm:$0xff] }
 0x49d   :  { %6759 = vmatprep.subr.mxu0 %v11491_v54  ;;  %v11589_v54 = vld [vmem:[#allocation86_spill] sm:$0xff] }
 0x49e   :  { %6760 = vmatpush1.msra.mxu0 %v11558_v27  ;;  %v6740_v27 = vpop.f32.mrf.mxu1 }
 0x49f   :  { %6761 = vmatprep.subr.mxu0 %v11559_v1 }
 0x4a0   :  { %6762 = vmatpush1.msra.mxu0 %v11560_v23  ;;  %v6898_v23 = vpop.f32.mrf.mxu1 }
 0x4a1   :  { %6763 = vmatprep.subr.mxu0 %v11561_v62 }
 0x4a2   :  { %6764 = vmatpush1.msra.mxu0 %v11562_v2  ;;  %v6900_v2 = vpop.f32.mrf.mxu1 }
 0x4a3   :  { %6765 = vmatprep.subr.mxu0 %v11563_v59 }
 0x4a4   :  { %6766 = vmatpush1.msra.mxu0 %v11564_v22 }
 0x4a5   :  { %6767 = vmatprep.subr.mxu0 %v11565_v51 }
 0x4a6   :  { %6768 = vmatpush1.msra.mxu0 %v11566_v32 }
 0x4a7   :  { %6769 = vmatprep.subr.mxu0 %v11567_v17 }
 0x4a8   :  { %6770 = vmatpush1.msra.mxu0 %v11568_v25 }
 0x4a9   :  { %6771 = vmatprep.subr.mxu0 %v11569_v10  ;;  %v6904_v10 = vpop.f32.mrf.mxu1 }
 0x4aa   :  { %6772 = vmatpush1.msra.mxu0 %v11570_v57 }
 0x4ab   :  { %6773 = vmatprep.subr.mxu0 %v11571_v21 }
 0x4ac   :  { %6774 = vmatpush1.msra.mxu0 %v11572_v9 }
 0x4ad   :  { %7899 = vmatmul.mubr.msk.f32.vlgmr.msra.gmra.mxu0 %vm371_vm2, %v10570_v53  ;;  %7905 = vmatprep.subr.msk.mxu0 %vm4459_vm3, %v11573_v20  ;;  %v11580_v53 = vld [vmem:[#allocation77_spill] sm:$0xff] }
 0x4ae   :  { %7906 = vmatpush1.msk.msra.mxu0 %vm4459_vm3, %v11574_v16  ;;  %6813 = vmatprep.mubr.f32.mxu0 %v11317_v6 }
 0x4af   :  { %6933 = vmatprep.subr.mxu0 %v11575_v46 }
 0x4b0   :  { %6934 = vmatpush1.msra.mxu0 %v11576_v29  ;;  %v6906_v29 = vpop.f32.mrf.mxu1 }
 0x4b1   :  { %7900 = vmatmul.mubr.msk.f32.gmra.mxu0 %vm371_vm2, %v11577_v48  ;;  %6935 = vmatprep.subr.mxu0 %v11578_v26 }
 0x4b2   :  { %6936 = vmatpush1.msra.mxu0 %v11579_v18  ;;  %6985 = vmatprep.mubr.f32.mxu0 %v11317_v6 }
 0x4b3   :  { %6937 = vmatprep.subr.mxu0 %v11580_v53 }
 0x4b4   :  { %6938 = vmatpush1.msra.mxu0 %v11581_v37 }
 0x4b5   :  { %6939 = vmatprep.subr.mxu0 %v11582_v45 }
 0x4b6   :  { %6940 = vmatpush1.msra.mxu0 %v11583_v36 }
 0x4b7   :  { %6941 = vmatprep.subr.mxu0 %v11584_v13 }
 0x4b8   :  { %6942 = vmatpush1.msra.mxu0 %v11585_v44 }
 0x4b9   :  { %6943 = vmatprep.subr.mxu0 %v11586_v28 }
 0x4ba   :  { %6944 = vmatpush1.msra.mxu0 %v11587_v30 }
 0x4bb   :  { %6945 = vmatprep.subr.mxu0 %v11588_v15 }
 0x4bc   :  { %6946 = vmatpush1.msra.mxu0 %v11589_v54 }
 0x4bd   :  { %6947 = vmatprep.subr.mxu0 %v11590_v52 }
 0x4be   :  { %6948 = vmatpush1.msra.mxu0 %v11591_v49  ;;  %v7115_v49 = vld [vmem:[%s11085_s7 + $0x70] sm:$0xff] }
 0x4bf   :  { %6949 = vmatprep.subr.mxu0 %v11592_v55  ;;  %v7114_v55 = vld [vmem:[%s11085_s7 + $0x68] sm:$0xff] }
 0x4c0   :  { %6950 = vmatpush1.msra.mxu0 %v11593_v61  ;;  %v7112_v61 = vld [vmem:[%s11085_s7 + $0x58] sm:$0xff] }
 0x4c1   :  { %6951 = vmatprep.subr.mxu0 %v11594_v31  ;;  %v7111_v31 = vld [vmem:[%s11085_s7 + $0x50] sm:$0xff] }
 0x4c2   :  { %6952 = vmatpush1.msra.mxu0 %v11595_v42  ;;  %v7110_v42 = vld [vmem:[%s11085_s7 + $0x48] sm:$0xff] }
 0x4c3   :  { %7907 = vmatmul.mubr.msk.f32.vlgmr.msra.gmra.mxu0 %vm371_vm2, %v11596_v35  ;;  %8157 = vmatprep.subr.mxu0 %v11317_v6  ;;  %v7109_v35 = vld [vmem:[%s11085_s7 + $0x40] sm:$0xff] }
 0x4c4   :  { %6991 = vmatprep.mubr.f32.mxu0 %v11317_v6  ;;  %8158 = vmatpush3.msk.msra.mxu0 %vm4459_vm3, %v7208_v60 }
 0x4c5   :  { %8159 = vmatprep.subr.mxu0 %v11317_v6 }
 0x4c6   :  { %8160 = vmatpush3.msra.mxu0 %v7207_v56 }
 0x4c7   :  { %7908 = vmatmul.mubr.msk.f32.gmra.mxu0 %vm371_vm2, %v6914_v0  ;;  %v7108_v0 = vld [vmem:[%s11085_s7 + $0x38] sm:$0xff]  ;;  %8161 = vmatprep.subr.mxu0 %v11317_v6 }
 0x4c8   :  { %8179 = vmatprep.mubr.msk.f32.mxu0 %vm8329_vm4, %v11317_v6  ;;  %8162 = vmatpush3.msra.mxu0 %v7206_v12 }
 0x4c9   :  { %8163 = vmatprep.subr.mxu0 %v11317_v6 }
 0x541   :  { %v6584_v14 = vpop.f32.mrf.mxu0 }
 0x542   :  { %v10955_v19 = vadd.f32 %v6584_v14, %v11597_v33  ;;  %v7205_v14 = vld [vmem:[%s11087_s9 + $0x38] sm:$0xff]  ;;  %v7204_v33 = vld [vmem:[%s11087_s9 + $0x30] sm:$0xff] }
 0x543   :  { %v8100_v11 = vpop.f32.mrf.mxu0  ;;  %8164 = vmatpush3.msra.mxu0 %v7205_v14 }
 0x544   :  { %8165 = vmatprep.subr.mxu0 %v11317_v6  ;;  %v7203_v11 = vld [vmem:[%s11087_s9 + $0x28] sm:$0xff] }
 0x545   :  { %8166 = vmatpush3.msra.mxu0 %v7204_v33 }
 0x546   :  { %8167 = vmatprep.subr.mxu0 %v11317_v6 }
 0x547   :  { %8168 = vmatpush3.msra.mxu0 %v7203_v11 }
 0x548   :  { %8169 = vmatprep.subr.mxu0 %v11317_v6 }
 0x557   :  { %v6655_v38 = vpop.f32.mrf.mxu0 }
 0x558   :  { %v6733_v51 = vadd.f32 %v6732_v39, %v6655_v38  ;;  %v7202_v38 = vld [vmem:[%s11087_s9 + $0x20] sm:$0xff] }
 0x559   :  { %v6657_v43 = vpop.f32.mrf.mxu0  ;;  %8170 = vmatpush3.msra.mxu0 %v7202_v38 }
 0x55a   :  { %v6735_v32 = vadd.f32 %v6734_v41, %v6657_v43  ;;  %v7201_v43 = vld [vmem:[%s11087_s9 + $0x18] sm:$0xff]  ;;  %8171 = vmatprep.subr.mxu0 %v11317_v6 }
 0x55b   :  { %v6661_v5 = vpop.f32.mrf.mxu0  ;;  %8172 = vmatpush3.msra.mxu0 %v7201_v43 }
 0x55c   :  { %v6739_v59 = vadd.f32 %v6738_v7, %v6661_v5  ;;  %8173 = vmatprep.subr.mxu0 %v11317_v6  ;;  %v7920_v5 = vld [vmem:[%s11084_s6] ss:$0 sm:$0xff] }
 0x55d   :  { %v6663_v47 = vpop.f32.mrf.mxu0 }
 0x55e   :  { %v6741_v17 = vadd.f32 %v6740_v27, %v6663_v47  ;;  %v7200_v27 = vld [vmem:[%s11087_s9 + $0x10] sm:$0xff] }
 0x55f   :  { %8174 = vmatpush3.msra.mxu0 %v7200_v27 }
 0x560   :  { %8175 = vmatprep.subr.mxu0 %v11317_v6 }
 0x56d   :  { %v6809_v58 = vpop.f32.mrf.mxu0 }
 0x56e   :  { %v6820_v21 = vadd.f32 %v6809_v58, %v6733_v51  ;;  %v7923_v51 = vld [vmem:[%s11088_s10] ss:$0 sm:$0xff] }
 0x56f   :  { %v6811_v1 = vpop.f32.mrf.mxu0 }
 0x570   :  { %v6821_v9 = vadd.f32 %v6811_v1, %v6735_v32  ;;  %v6909_v26 = vadd.f32 %v6898_v23, %v6820_v21  ;;  %v7199_v1 = vld [vmem:[%s11087_s9 + $0x8] sm:$0xff]  ;;  %v7921_v23 = vld [vmem:[%s11086_s8] ss:$0 sm:$0xff] }
 0x571   :  { %v6815_v62 = vpop.f32.mrf.mxu0  ;;  %8176 = vmatpush3.msra.mxu0 %v7199_v1 }
 0x572   :  { %v6822_v25 = vadd.f32 %v6815_v62, %v6739_v59  ;;  %v6910_v18 = vadd.f32 %v6900_v2, %v6821_v9  ;;  %8177 = vmatprep.subr.mxu0 %v11317_v6 }
 0x573   :  { %v6817_v22 = vpop.f32.mrf.mxu0 }
 0x574   :  { %v6823_v20 = vadd.f32 %v6817_v22, %v6741_v17  ;;  %v6911_v46 = vadd.f32 %v6904_v10, %v6822_v25 }
 0x576   :  { %v6912_v37 = vadd.f32 %v6906_v29, %v6823_v20 }
 0x583   :  { %v6987_v57 = vpop.f32.mrf.mxu0 }
 0x584   :  { %v6998_v36 = vadd.f32 %v6987_v57, %v6909_v26 }
 0x585   :  { %v6989_v16 = vpop.f32.mrf.mxu0 }
 0x586   :  { %v6999_v13 = vadd.f32 %v6989_v16, %v6910_v18 }
 0x587   :  { %v6993_v48 = vpop.f32.mrf.mxu0 }
 0x588   :  { %v7000_v53 = vadd.f32 %v6993_v48, %v6911_v46 }
 0x589   :  { %v6995_v45 = vpop.f32.mrf.mxu0 }
 0x58a   :  { %v7001_v44 = vadd.f32 %v6995_v45, %v6912_v37  ;;  %v7002_v28 = vmax.f32 %v6998_v36, %v7000_v53 }
 0x58c   :  { %v7003_v30 = vmax.f32 %v6999_v13, %v7001_v44 }
 0x58e   :  { %v7004_v15 = vmax.f32 %v7002_v28, %v7003_v30 }
 0x590   :  { %v7005_v54 = vadd.f32 %v10820_v34, %v7004_v15  ;;  %v7113_v34 = vld [vmem:[%s11085_s7 + $0x60] sm:$0xff] }
 0x592   :  { %v7006_v52 = vmax.f32 %v7005_v54, 0.0 }
 0x594   :  { %8122 = vmatmul.mubr.msk.f32.vlgmr.msra.gmra.mxu1 %vm5436_vm5, %v7006_v52 }
 0x595   :  { %8125 = vmatpush3.msra.mxu1 %v7115_v49  ;;  %8154 = vmatprep.mubr.msk.f32.mxu1 %vm8329_vm4, %v11317_v6 }
 0x596   :  { %8126 = vmatprep.subr.mxu1 %v11317_v6 }
 0x597   :  { %8127 = vmatpush3.msra.mxu1 %v7114_v55 }
 0x598   :  { %8128 = vmatprep.subr.mxu1 %v11317_v6 }
 0x599   :  { %8129 = vmatpush3.msra.mxu1 %v7113_v34 }
 0x59a   :  { %8130 = vmatprep.subr.mxu1 %v11317_v6 }
 0x59b   :  { %8131 = vmatpush3.msra.mxu1 %v7112_v61 }
 0x59c   :  { %8132 = vmatprep.subr.mxu1 %v11317_v6 }
 0x59d   :  { %8133 = vmatpush3.msra.mxu1 %v7111_v31 }
 0x59e   :  { %8134 = vmatprep.subr.mxu1 %v11317_v6 }
 0x59f   :  { %8135 = vmatpush3.msra.mxu1 %v7110_v42 }
 0x5a0   :  { %8136 = vmatprep.subr.mxu1 %v11317_v6 }
 0x5a1   :  { %8137 = vmatpush3.msra.mxu1 %v7109_v35 }
 0x5a2   :  { %8138 = vmatprep.subr.mxu1 %v11317_v6 }
 0x5a3   :  { %8139 = vmatpush3.msra.mxu1 %v7108_v0 }
 0x5a4   :  { %8140 = vmatprep.subr.mxu1 %v11317_v6 }
 0x5a5   :  { %8141 = vmatpush3.msra.mxu1 %v7107_v40 }
 0x5a6   :  { %8142 = vmatprep.subr.mxu1 %v11317_v6 }
 0x5a7   :  { %8143 = vmatpush3.msra.mxu1 %v7106_v50 }
 0x5a8   :  { %8144 = vmatprep.subr.mxu1 %v11317_v6 }
 0x5a9   :  { %8145 = vmatpush3.msra.mxu1 %v7105_v3 }
 0x5aa   :  { %8146 = vmatprep.subr.mxu1 %v11317_v6 }
 0x5ab   :  { %8147 = vmatpush3.msra.mxu1 %v7104_v63 }
 0x5ac   :  { %8148 = vmatprep.subr.mxu1 %v11317_v6 }
 0x5ad   :  { %8149 = vmatpush3.msra.mxu1 %v7103_v4 }
 0x5ae   :  { %8150 = vmatprep.subr.mxu1 %v11317_v6 }
 0x5af   :  { %8151 = vmatpush3.msra.mxu1 %v7102_v8 }
 0x5b0   :  { %8152 = vmatprep.subr.mxu1 %v11317_v6 }
 0x5b1   :  { %8153 = vmatpush3.msra.mxu1 %v7101_v24 }
 0x654   :  { %v7087_v39 = vpop.f32.mrf.mxu1 }
 0x655   :  { %v7091_v41 = vadd.f32 %v7087_v39, %v10955_v19  ;;  %v7198_v19 = vld [vmem:[%s11087_s9] sm:$0xff] }
 0x656   :  { %v8123_v47 = vpop.f32.mrf.mxu1  ;;  %8178 = vmatpush3.msra.mxu0 %v7198_v19 }
 0x657   :  { %v7099_v7 = vadd.f32 %v7920_v5, %v7091_v41 }
 0x659   :  { %v7100_v58 = vmax.f32 %v7099_v7, 0.0 }
 0x65b   :  { %8155 = vmatmul.mubr.msk.f32.vlgmr.msra.gmra.mxu1 %vm7123_vm6, %v7100_v58 }
 0x71b   :  { %v7193_v62 = vpop.f32.mrf.mxu1 }
 0x71c   :  { %v7194_v2 = vadd.f32 %v7921_v23, %v7193_v62 }
 0x71d   :  { %v8156_v59 = vpop.f32.mrf.mxu1 }
 0x71e   :  { %v7197_v22 = vmax.f32 %v7194_v2, 0.0 }
 0x720   :  { %8180 = vmatmul.mubr.msk.f32.vlgmr.msra.gmra.mxu0 %vm371_vm2, %v7197_v22 }
 0x7e0   :  { %v7288_v6 = vpop.f32.mrf.mxu0 }
 0x7e1   :  { %v7289_v32 = vadd.f32 %v7923_v51, %v7288_v6 }
 0x7e2   :  { %v8181_v17 = vpop.f32.mrf.mxu0 }
 0x7e3   :  { %7293 = vst.msk [vmem:[%s11089_s11] sm:$0xff] %vm7292_vm7, %v7289_v32 }
 0x7e4   :  { %7298 = vsyncpa [#allocation4], 1 }

</bundles_post_ra>
